<compile_context>
chip_gen: v5e
topology: v5e:2x2
jax: 0.10.0
libtpu: 0.0.40
codegen_flags: <defaults>
</compile_context>

<pallas_src>
import functools

import jax
import jax.numpy as jnp
from jax import lax
from jax.experimental import pallas as pl
from jax.experimental.pallas import tpu as pltpu


# ------------------------------ helpers -------------------------------------

def _silu(x):
    return x * jax.nn.sigmoid(x)


def _pick_row_tile(R, C1, C2):
    """Row tile for the 1x1-conv kernel (multiple of 8 or full)."""
    bytes_per_row = C1 * 4 + C2 * 2
    cap = max(8, min(1024, (4 * 1024 * 1024) // max(1, bytes_per_row)))
    cap = (cap // 8) * 8
    if R <= cap:
        return R
    for t in (1024, 512, 256, 128, 64, 32, 16, 8):
        if t <= cap and R % t == 0:
            return t
    return min(cap, 512)          # remainder block handled by Pallas masking


def _pick_out_row_tile(Ho, Wo, per_row_bytes, budget_bytes=2 * 1024 * 1024,
                       cap=128):
    """Output-row tile for the fused kernel; keeps blocks (8,128)-legal."""
    tmax = int(max(1, min(Ho, cap, budget_bytes // max(1, per_row_bytes))))
    for t in range(tmax, 0, -1):
        if Ho % t == 0 and (t == Ho or (t * Wo) % 8 == 0):
            return t
    return Ho


# ------------------- kernel 1: cv2 = 1x1 conv + BN(fold) + SiLU --------------

def _conv1x1_kernel(x_ref, w_ref, b_ref, o_ref):
    y = jnp.dot(x_ref[...].astype(jnp.bfloat16), w_ref[...],
                preferred_element_type=jnp.float32)
    o_ref[...] = _silu(y + b_ref[...]).astype(o_ref.dtype)


# ------- kernel 2: fused [maxpool2x2 + cv1] and [cv3 3x3/s2] per tile --------

def _fused_tail_kernel(xv_ref, bands_ref, w1_ref, b1_ref, w3_ref, b3_ref,
                       o_ref, *, th, Wo, C1, C2):
    # ---- branch 1: 2x2/s2 max pool + 1x1 conv (+ folded BN) + SiLU ----------
    xb = xv_ref[0]                                   # (2*th, Wo, 2*C1) f32
    xr = xb.reshape(th, 2, Wo, 2 * C1)               # leading-dim split only
    m = jnp.maximum(xr[:, 0], xr[:, 1])              # row-pair max
    m = jnp.maximum(m[..., :C1], m[..., C1:])        # col-pair max -> (th,Wo,C1)
    m2 = m.reshape(th * Wo, C1).astype(jnp.bfloat16)
    y1 = jnp.dot(m2, w1_ref[...], preferred_element_type=jnp.float32)
    y1 = _silu(y1 + b1_ref[...])                     # (th*Wo, C2) f32

    # ---- branch 2: 3x3/s2 conv (+ folded BN) + SiLU on banded cv2 output ----
    acc = jnp.zeros((th * Wo, C2), jnp.float32)
    for kh in range(3):
        band = bands_ref[kh]                         # (th, Wo+1, 2*C2) bf16
        even = band[..., :C2]                        # padded cols 0,2,4,...
        odd = band[..., C2:]                         # padded cols 1,3,5,...
        taps = (even[:, 0:Wo, :], odd[:, 0:Wo, :], even[:, 1:Wo + 1, :])
        for kw in range(3):
            t = taps[kw].reshape(th * Wo, C2)
            acc = acc + jnp.dot(t, w3_ref[kh * 3 + kw],
                                preferred_element_type=jnp.float32)
    y2 = _silu(acc + b3_ref[...])                    # (th*Wo, C2) f32

    # single lane-dense store of the pre-concatenated [cv3 | cv1] tile
    o_ref[0] = jnp.concatenate([y2, y1], axis=-1).astype(o_ref.dtype)


# ------------------------------- wrapper -------------------------------------

def transition_block(x_nchw, p):
    x = jnp.transpose(x_nchw, (0, 2, 3, 1)).astype(jnp.float32)   # NHWC
    N, H, W, C1 = x.shape
    assert H % 2 == 0 and W % 2 == 0, "even H/W expected (MaxPool2d(2,2), s=2)"
    Ho, Wo = H // 2, W // 2
    C2 = p["w1"].shape[1]
    vmem_cp = 32 * 1024 * 1024

    # ---- cv2: 1x1 conv + BN + SiLU over all N*H*W pixels ---------------------
    R = N * H * W
    tm = _pick_row_tile(R, C1, C2)
    xf = x.reshape(R, C1)                                         # free reshape
    x2 = pl.pallas_call(
        _conv1x1_kernel,
        out_shape=jax.ShapeDtypeStruct((R, C2), jnp.bfloat16),
        grid_spec=pltpu.PrefetchScalarGridSpec(
            num_scalar_prefetch=0,
            grid=(pl.cdiv(R, tm),),
            in_specs=[
                pl.BlockSpec((tm, C1), lambda i: (i, 0)),
                pl.BlockSpec((C1, C2), lambda i: (0, 0)),
                pl.BlockSpec((1, C2), lambda i: (0, 0)),
            ],
            out_specs=pl.BlockSpec((tm, C2), lambda i: (i, 0)),
        ),
        compiler_params=pltpu.CompilerParams(
            dimension_semantics=("parallel",),
            vmem_limit_bytes=vmem_cp),
    )(xf, p["w2"], p["b2"])

    # ---- layout glue (XLA): zero-pad cv2 output and build 3 stride-2 row bands
    x2 = x2.reshape(N, H, W, C2)
    x2p = jnp.pad(x2, ((0, 0), (1, 1), (1, 1), (0, 0)))
    bands = jnp.stack([x2p[:, kh:kh + 2 * Ho:2, :, :] for kh in range(3)],
                      axis=1)                                     # (N,3,Ho,W+2,C2)
    # free (bitcast) reshapes: pair the width dimension with channels so the
    # kernel only needs static lane slices (no strided/minor-dim reshapes).
    bands_m = bands.reshape(N * 3, Ho, Wo + 1, 2 * C2)
    xv = x.reshape(N, H, Wo, 2 * C1)

    # ---- fused tail: maxpool+cv1 and cv3, writing concatenated output -------
    per_row = 2 * W * C1 * 4 + 3 * (Wo + 1) * 2 * C2 * 2 + Wo * 2 * C2 * 4
    th = _pick_out_row_tile(Ho, Wo, per_row)
    kernel = functools.partial(_fused_tail_kernel, th=th, Wo=Wo, C1=C1, C2=C2)
    out = pl.pallas_call(
        kernel,
        out_shape=jax.ShapeDtypeStruct((N, Ho * Wo, 2 * C2), jnp.float32),
        grid_spec=pltpu.PrefetchScalarGridSpec(
            num_scalar_prefetch=0,
            grid=(N, Ho // th),
            in_specs=[
                pl.BlockSpec((1, 2 * th, Wo, 2 * C1), lambda n, i: (n, i, 0, 0)),
                pl.BlockSpec((3, th, Wo + 1, 2 * C2), lambda n, i: (n, i, 0, 0)),
                pl.BlockSpec((C1, C2), lambda n, i: (0, 0)),
                pl.BlockSpec((1, C2), lambda n, i: (0, 0)),
                pl.BlockSpec((9, C2, C2), lambda n, i: (0, 0, 0)),
                pl.BlockSpec((1, C2), lambda n, i: (0, 0)),
            ],
            out_specs=pl.BlockSpec((1, th * Wo, 2 * C2),
                                   lambda n, i: (n, i, 0)),
        ),
        compiler_params=pltpu.CompilerParams(
            dimension_semantics=("parallel", "parallel"),
            vmem_limit_bytes=vmem_cp),
    )(xv, bands_m, p["w1"], p["b1"], p["w3"], p["b3"])

    out = out.reshape(N, Ho, Wo, 2 * C2)
    return jnp.transpose(out, (0, 3, 1, 2))                       # back to NCHW


# --------------------------- parameter creation ------------------------------

def _fold_bn(kg, kb, km, kv, c, eps=1e-3):
    gamma = jax.random.uniform(kg, (c,), minval=0.5, maxval=1.5, dtype=jnp.float32)
    beta = 0.1 * jax.random.normal(kb, (c,), dtype=jnp.float32)
    mean = 0.1 * jax.random.normal(km, (c,), dtype=jnp.float32)
    var = jax.random.uniform(kv, (c,), minval=0.5, maxval=1.5, dtype=jnp.float32)
    scale = gamma / jnp.sqrt(var + eps)
    bias = beta - mean * scale
    return scale.reshape(1, c), bias.reshape(1, c)


def init_params(key, c1, c2):
    ks = jax.random.split(key, 15)
    w1 = 0.1 * jax.random.normal(ks[0], (c1, c2), dtype=jnp.float32)
    s1, b1 = _fold_bn(ks[1], ks[2], ks[3], ks[4], c2)
    w2 = 0.1 * jax.random.normal(ks[5], (c1, c2), dtype=jnp.float32)
    s2, b2 = _fold_bn(ks[6], ks[7], ks[8], ks[9], c2)
    # w3 flat layout: row index = (kh*3 + kw)*c2 + cin, col = cout
    w3 = 0.1 * jax.random.normal(ks[10], (9 * c2, c2), dtype=jnp.float32)
    s3, b3 = _fold_bn(ks[11], ks[12], ks[13], ks[14], c2)
    return dict(w1=w1, s1=s1, b1=b1, w2=w2, s2=s2, b2=b2, w3=w3, s3=s3, b3=b3)


def prepare_params(p):
    """Fold BN scale into the conv weights and cast MXU operands to bf16."""
    c2 = p["w1"].shape[1]
    return dict(
        w1=(p["w1"] * p["s1"]).astype(jnp.bfloat16), b1=p["b1"],
        w2=(p["w2"] * p["s2"]).astype(jnp.bfloat16), b2=p["b2"],
        w3=(p["w3"] * p["s3"]).astype(jnp.bfloat16).reshape(9, c2, c2),
        b3=p["b3"],
    )


# ----------------------- pure-JAX reference (NCHW, f32) ----------------------

def _ref_forward(x, p, c2):
    def silu(v):
        return v * jax.nn.sigmoid(v)

    def conv_bn_silu(v, w_oihw, scale, bias, stride, pad):
        y = lax.conv_general_dilated(
            v, w_oihw, window_strides=(stride, stride),
            padding=[(pad, pad), (pad, pad)],
            dimension_numbers=("NCHW", "OIHW", "NCHW"))
        y = y * scale.reshape(1, -1, 1, 1) + bias.reshape(1, -1, 1, 1)
        return silu(y)

    w1_oihw = p["w1"].T[:, :, None, None]
    w2_oihw = p["w2"].T[:, :, None, None]
    w3_oihw = jnp.transpose(p["w3"].reshape(3, 3, c2, c2), (3, 2, 0, 1))

    x1 = lax.reduce_window(x, -jnp.inf, lax.max,
                           (1, 1, 2, 2), (1, 1, 2, 2), "VALID")
    x1 = conv_bn_silu(x1, w1_oihw, p["s1"], p["b1"], 1, 0)
    x2 = conv_bn_silu(x, w2_oihw, p["s2"], p["b2"], 1, 0)
    x2 = conv_bn_silu(x2, w3_oihw, p["s3"], p["b3"], 2, 1)
    return jnp.concatenate([x2, x1], axis=1)


# ---------------------------------- main -------------------------------------

if __name__ == "__main__":
    key = jax.random.PRNGKey(0)
    k_x, k_p = jax.random.split(key)

    N, C1, H, W = 2, 4, 16, 16
    C2 = 4

    x = jax.random.normal(k_x, (N, C1, H, W), dtype=jnp.float32)
    raw_params = init_params(k_p, C1, C2)
    params = prepare_params(raw_params)

    fwd = jax.jit(lambda xx: transition_block(xx, params))
    out = jax.block_until_ready(fwd(x))

    ref = _ref_forward(x, raw_params, C2)
    assert out.shape == (N, 2 * C2, H // 2, W // 2), out.shape
    max_err = float(jnp.max(jnp.abs(out - ref)))
    # bf16 MXU inputs (per perf review) -> compare against f32 reference with a
    # correspondingly loose tolerance.
    assert jnp.allclose(out, ref, atol=5e-2, rtol=5e-2), max_err

    print("KERNEL_OK")
</pallas_src>

<mosaic_0001>
module attributes {stable_mosaic.version = 11 : i64} {
  func.func @_conv1x1_kernel(%arg0: i32, %arg1: memref<512x4xf32, #tpu.memory_space<vmem>>, %arg2: memref<4x4xbf16, #tpu.memory_space<vmem>>, %arg3: memref<1x4xf32, #tpu.memory_space<vmem>>, %arg4: memref<512x4xbf16, #tpu.memory_space<vmem>>) attributes {dimension_semantics = [#tpu.dimension_semantics<parallel>], iteration_bounds = array<i64: 1>, scalar_prefetch = 0 : i64, scratch_operands = 0 : i64, tpu.core_type = #tpu.core_type<tc>, window_params = [{transform_indices = @transform_0, window_bounds = array<i64: 512, 4>}, {pipeline_mode = #tpu.pipeline_mode<synchronous>, transform_indices = @transform_1, window_bounds = array<i64: 4, 4>}, {pipeline_mode = #tpu.pipeline_mode<synchronous>, transform_indices = @transform_2, window_bounds = array<i64: 1, 4>}, {transform_indices = @transform_3, window_bounds = array<i64: 512, 4>}]} {
    %c0 = arith.constant 0 : index
    %c0_0 = arith.constant 0 : index
    %0 = vector.load %arg1[%c0, %c0_0] : memref<512x4xf32, #tpu.memory_space<vmem>>, vector<512x4xf32>
    %1 = arith.truncf %0 : vector<512x4xf32> to vector<512x4xbf16>
    %c0_1 = arith.constant 0 : index
    %c0_2 = arith.constant 0 : index
    %2 = vector.load %arg2[%c0_1, %c0_2] : memref<4x4xbf16, #tpu.memory_space<vmem>>, vector<4x4xbf16>
    %cst = arith.constant dense<0.000000e+00> : vector<512x4xf32>
    %3 = tpu.matmul %1, %2, %cst {dimension_numbers = #tpu.dot_dimension_numbers<[1], [0], [0], [1], [0, 0, 1, 1], [], []>} : vector<512x4xbf16>, vector<4x4xbf16>, vector<512x4xf32> -> vector<512x4xf32>
    %c0_3 = arith.constant 0 : index
    %c0_4 = arith.constant 0 : index
    %4 = vector.load %arg3[%c0_3, %c0_4] : memref<1x4xf32, #tpu.memory_space<vmem>>, vector<1x4xf32>
    %5 = vector.broadcast %4 : vector<1x4xf32> to vector<512x4xf32>
    %6 = arith.addf %3, %5 : vector<512x4xf32>
    %7 = arith.negf %6 : vector<512x4xf32>
    %8 = math.exp %7 : vector<512x4xf32>
    %cst_5 = arith.constant 1.000000e+00 : f32
    %9 = vector.broadcast %cst_5 : f32 to vector<512x4xf32>
    %10 = arith.addf %9, %8 : vector<512x4xf32>
    %11 = arith.divf %9, %10 : vector<512x4xf32>
    %12 = arith.mulf %6, %11 : vector<512x4xf32>
    %13 = arith.truncf %12 : vector<512x4xf32> to vector<512x4xbf16>
    %c0_6 = arith.constant 0 : index
    %c0_7 = arith.constant 0 : index
    %14 = vector.load %arg4[%c0_6, %c0_7] : memref<512x4xbf16, #tpu.memory_space<vmem>>, vector<512x4xbf16>
    tpu.vector_store %arg4[%c0_6, %c0_7], %13 {strides = array<i32>} : memref<512x4xbf16, #tpu.memory_space<vmem>>, vector<512x4xbf16>,
    return
  }
  func.func @transform_0(%arg0: i32) -> (i32, i32) {
    %c0_i32 = arith.constant 0 : i32
    %c0_i32_0 = arith.constant 0 : i32
    return %arg0, %c0_i32 : i32, i32
  }
  func.func @transform_1(%arg0: i32) -> (i32, i32) {
    %c0_i32 = arith.constant 0 : i32
    %c0_i32_0 = arith.constant 0 : i32
    %c0_i32_1 = arith.constant 0 : i32
    return %c0_i32, %c0_i32_0 : i32, i32
  }
  func.func @transform_2(%arg0: i32) -> (i32, i32) {
    %c0_i32 = arith.constant 0 : i32
    %c0_i32_0 = arith.constant 0 : i32
    %c0_i32_1 = arith.constant 0 : i32
    return %c0_i32, %c0_i32_0 : i32, i32
  }
  func.func @transform_3(%arg0: i32) -> (i32, i32) {
    %c0_i32 = arith.constant 0 : i32
    %c0_i32_0 = arith.constant 0 : i32
    return %arg0, %c0_i32 : i32, i32
  }
}

module attributes {stable_mosaic.version = 11 : i64} {
  func.func @_fused_tail_kernel(%arg0: i32, %arg1: i32, %arg2: memref<1x16x8x8xf32, #tpu.memory_space<vmem>>, %arg3: memref<3x8x9x8xbf16, #tpu.memory_space<vmem>>, %arg4: memref<4x4xbf16, #tpu.memory_space<vmem>>, %arg5: memref<1x4xf32, #tpu.memory_space<vmem>>, %arg6: memref<9x4x4xbf16, #tpu.memory_space<vmem>>, %arg7: memref<1x4xf32, #tpu.memory_space<vmem>>, %arg8: memref<1x64x8xf32, #tpu.memory_space<vmem>>) attributes {dimension_semantics = [#tpu.dimension_semantics<parallel>, #tpu.dimension_semantics<parallel>], iteration_bounds = array<i64: 2, 1>, scalar_prefetch = 0 : i64, scratch_operands = 0 : i64, tpu.core_type = #tpu.core_type<tc>, window_params = [{transform_indices = @transform_0, window_bounds = array<i64: 1, 16, 8, 8>}, {transform_indices = @transform_1, window_bounds = array<i64: 3, 8, 9, 8>}, {pipeline_mode = #tpu.pipeline_mode<synchronous>, transform_indices = @transform_2, window_bounds = array<i64: 4, 4>}, {pipeline_mode = #tpu.pipeline_mode<synchronous>, transform_indices = @transform_3, window_bounds = array<i64: 1, 4>}, {pipeline_mode = #tpu.pipeline_mode<synchronous>, transform_indices = @transform_4, window_bounds = array<i64: 9, 4, 4>}, {pipeline_mode = #tpu.pipeline_mode<synchronous>, transform_indices = @transform_5, window_bounds = array<i64: 1, 4>}, {transform_indices = @transform_6, window_bounds = array<i64: 1, 64, 8>}]} {
    %c0 = arith.constant 0 : index
    %c0_0 = arith.constant 0 : index
    %c0_1 = arith.constant 0 : index
    %c0_2 = arith.constant 0 : index
    %0 = vector.load %arg2[%c0, %c0_0, %c0_1, %c0_2] : memref<1x16x8x8xf32, #tpu.memory_space<vmem>>, vector<1x16x8x8xf32>
    %1 = vector.shape_cast %0 : vector<1x16x8x8xf32> to vector<16x8x8xf32>
    %2 = vector.shape_cast %1 : vector<16x8x8xf32> to vector<8x2x8x8xf32>
    %3 = vector.extract_strided_slice %2 {offsets = [0, 0, 0, 0], sizes = [8, 1, 8, 8], strides = [1, 1, 1, 1]} : vector<8x2x8x8xf32> to vector<8x1x8x8xf32>
    %4 = vector.shape_cast %3 : vector<8x1x8x8xf32> to vector<8x8x8xf32>
    %5 = vector.extract_strided_slice %2 {offsets = [0, 1, 0, 0], sizes = [8, 1, 8, 8], strides = [1, 1, 1, 1]} : vector<8x2x8x8xf32> to vector<8x1x8x8xf32>
    %6 = vector.shape_cast %5 : vector<8x1x8x8xf32> to vector<8x8x8xf32>
    %7 = arith.maximumf %4, %6 : vector<8x8x8xf32>
    %8 = vector.extract_strided_slice %7 {offsets = [0, 0, 0], sizes = [8, 8, 4], strides = [1, 1, 1]} : vector<8x8x8xf32> to vector<8x8x4xf32>
    %9 = vector.extract_strided_slice %7 {offsets = [0, 0, 4], sizes = [8, 8, 4], strides = [1, 1, 1]} : vector<8x8x8xf32> to vector<8x8x4xf32>
    %10 = arith.maximumf %8, %9 : vector<8x8x4xf32>
    %11 = vector.shape_cast %10 : vector<8x8x4xf32> to vector<64x4xf32>
    %12 = arith.truncf %11 : vector<64x4xf32> to vector<64x4xbf16>
    %c0_3 = arith.constant 0 : index
    %c0_4 = arith.constant 0 : index
    %13 = vector.load %arg4[%c0_3, %c0_4] : memref<4x4xbf16, #tpu.memory_space<vmem>>, vector<4x4xbf16>
    %cst = arith.constant dense<0.000000e+00> : vector<64x4xf32>
    %14 = tpu.matmul %12, %13, %cst {dimension_numbers = #tpu.dot_dimension_numbers<[1], [0], [0], [1], [0, 0, 1, 1], [], []>} : vector<64x4xbf16>, vector<4x4xbf16>, vector<64x4xf32> -> vector<64x4xf32>
    %c0_5 = arith.constant 0 : index
    %c0_6 = arith.constant 0 : index
    %15 = vector.load %arg5[%c0_5, %c0_6] : memref<1x4xf32, #tpu.memory_space<vmem>>, vector<1x4xf32>
    %16 = vector.broadcast %15 : vector<1x4xf32> to vector<64x4xf32>
    %17 = arith.addf %14, %16 : vector<64x4xf32>
    %18 = arith.negf %17 : vector<64x4xf32>
    %19 = math.exp %18 : vector<64x4xf32>
    %cst_7 = arith.constant 1.000000e+00 : f32
    %20 = vector.broadcast %cst_7 : f32 to vector<64x4xf32>
    %21 = arith.addf %20, %19 : vector<64x4xf32>
    %22 = arith.divf %20, %21 : vector<64x4xf32>
    %23 = arith.mulf %17, %22 : vector<64x4xf32>
    %cst_8 = arith.constant 0.000000e+00 : f32
    %24 = vector.broadcast %cst_8 : f32 to vector<64x4xf32>
    %c0_9 = arith.constant 0 : index
    %c0_10 = arith.constant 0 : index
    %c0_11 = arith.constant 0 : index
    %c0_12 = arith.constant 0 : index
    %25 = vector.load %arg3[%c0_9, %c0_10, %c0_11, %c0_12] : memref<3x8x9x8xbf16, #tpu.memory_space<vmem>>, vector<1x8x9x8xbf16>
    %26 = vector.shape_cast %25 : vector<1x8x9x8xbf16> to vector<8x9x8xbf16>
    %27 = vector.extract_strided_slice %26 {offsets = [0, 0, 0], sizes = [8, 9, 4], strides = [1, 1, 1]} : vector<8x9x8xbf16> to vector<8x9x4xbf16>
    %28 = vector.extract_strided_slice %26 {offsets = [0, 0, 4], sizes = [8, 9, 4], strides = [1, 1, 1]} : vector<8x9x8xbf16> to vector<8x9x4xbf16>
    %29 = vector.extract_strided_slice %27 {offsets = [0, 0, 0], sizes = [8, 8, 4], strides = [1, 1, 1]} : vector<8x9x4xbf16> to vector<8x8x4xbf16>
    %30 = vector.extract_strided_slice %28 {offsets = [0, 0, 0], sizes = [8, 8, 4], strides = [1, 1, 1]} : vector<8x9x4xbf16> to vector<8x8x4xbf16>
    %31 = vector.extract_strided_slice %27 {offsets = [0, 1, 0], sizes = [8, 8, 4], strides = [1, 1, 1]} : vector<8x9x4xbf16> to vector<8x8x4xbf16>
    %32 = vector.shape_cast %29 : vector<8x8x4xbf16> to vector<64x4xbf16>
    %c0_13 = arith.constant 0 : index
    %c0_14 = arith.constant 0 : index
    %c0_15 = arith.constant 0 : index
    %33 = vector.load %arg6[%c0_13, %c0_14, %c0_15] : memref<9x4x4xbf16, #tpu.memory_space<vmem>>, vector<1x4x4xbf16>
    %34 = vector.shape_cast %33 : vector<1x4x4xbf16> to vector<4x4xbf16>
    %cst_16 = arith.constant dense<0.000000e+00> : vector<64x4xf32>
    %35 = tpu.matmul %32, %34, %cst_16 {dimension_numbers = #tpu.dot_dimension_numbers<[1], [0], [0], [1], [0, 0, 1, 1], [], []>} : vector<64x4xbf16>, vector<4x4xbf16>, vector<64x4xf32> -> vector<64x4xf32>
    %36 = arith.addf %24, %35 : vector<64x4xf32>
    %37 = vector.shape_cast %30 : vector<8x8x4xbf16> to vector<64x4xbf16>
    %c1 = arith.constant 1 : index
    %c0_17 = arith.constant 0 : index
    %c0_18 = arith.constant 0 : index
    %38 = vector.load %arg6[%c1, %c0_17, %c0_18] : memref<9x4x4xbf16, #tpu.memory_space<vmem>>, vector<1x4x4xbf16>
    %39 = vector.shape_cast %38 : vector<1x4x4xbf16> to vector<4x4xbf16>
    %cst_19 = arith.constant dense<0.000000e+00> : vector<64x4xf32>
    %40 = tpu.matmul %37, %39, %cst_19 {dimension_numbers = #tpu.dot_dimension_numbers<[1], [0], [0], [1], [0, 0, 1, 1], [], []>} : vector<64x4xbf16>, vector<4x4xbf16>, vector<64x4xf32> -> vector<64x4xf32>
    %41 = arith.addf %36, %40 : vector<64x4xf32>
    %42 = vector.shape_cast %31 : vector<8x8x4xbf16> to vector<64x4xbf16>
    %c2 = arith.constant 2 : index
    %c0_20 = arith.constant 0 : index
    %c0_21 = arith.constant 0 : index
    %43 = vector.load %arg6[%c2, %c0_20, %c0_21] : memref<9x4x4xbf16, #tpu.memory_space<vmem>>, vector<1x4x4xbf16>
    %44 = vector.shape_cast %43 : vector<1x4x4xbf16> to vector<4x4xbf16>
    %cst_22 = arith.constant dense<0.000000e+00> : vector<64x4xf32>
    %45 = tpu.matmul %42, %44, %cst_22 {dimension_numbers = #tpu.dot_dimension_numbers<[1], [0], [0], [1], [0, 0, 1, 1], [], []>} : vector<64x4xbf16>, vector<4x4xbf16>, vector<64x4xf32> -> vector<64x4xf32>
    %46 = arith.addf %41, %45 : vector<64x4xf32>
    %c1_23 = arith.constant 1 : index
    %c0_24 = arith.constant 0 : index
    %c0_25 = arith.constant 0 : index
    %c0_26 = arith.constant 0 : index
    %47 = vector.load %arg3[%c1_23, %c0_24, %c0_25, %c0_26] : memref<3x8x9x8xbf16, #tpu.memory_space<vmem>>, vector<1x8x9x8xbf16>
    %48 = vector.shape_cast %47 : vector<1x8x9x8xbf16> to vector<8x9x8xbf16>
    %49 = vector.extract_strided_slice %48 {offsets = [0, 0, 0], sizes = [8, 9, 4], strides = [1, 1, 1]} : vector<8x9x8xbf16> to vector<8x9x4xbf16>
    %50 = vector.extract_strided_slice %48 {offsets = [0, 0, 4], sizes = [8, 9, 4], strides = [1, 1, 1]} : vector<8x9x8xbf16> to vector<8x9x4xbf16>
    %51 = vector.extract_strided_slice %49 {offsets = [0, 0, 0], sizes = [8, 8, 4], strides = [1, 1, 1]} : vector<8x9x4xbf16> to vector<8x8x4xbf16>
    %52 = vector.extract_strided_slice %50 {offsets = [0, 0, 0], sizes = [8, 8, 4], strides = [1, 1, 1]} : vector<8x9x4xbf16> to vector<8x8x4xbf16>
    %53 = vector.extract_strided_slice %49 {offsets = [0, 1, 0], sizes = [8, 8, 4], strides = [1, 1, 1]} : vector<8x9x4xbf16> to vector<8x8x4xbf16>
    %54 = vector.shape_cast %51 : vector<8x8x4xbf16> to vector<64x4xbf16>
    %c3 = arith.constant 3 : index
    %c0_27 = arith.constant 0 : index
    %c0_28 = arith.constant 0 : index
    %55 = vector.load %arg6[%c3, %c0_27, %c0_28] : memref<9x4x4xbf16, #tpu.memory_space<vmem>>, vector<1x4x4xbf16>
    %56 = vector.shape_cast %55 : vector<1x4x4xbf16> to vector<4x4xbf16>
    %cst_29 = arith.constant dense<0.000000e+00> : vector<64x4xf32>
    %57 = tpu.matmul %54, %56, %cst_29 {dimension_numbers = #tpu.dot_dimension_numbers<[1], [0], [0], [1], [0, 0, 1, 1], [], []>} : vector<64x4xbf16>, vector<4x4xbf16>, vector<64x4xf32> -> vector<64x4xf32>
    %58 = arith.addf %46, %57 : vector<64x4xf32>
    %59 = vector.shape_cast %52 : vector<8x8x4xbf16> to vector<64x4xbf16>
    %c4 = arith.constant 4 : index
    %c0_30 = arith.constant 0 : index
    %c0_31 = arith.constant 0 : index
    %60 = vector.load %arg6[%c4, %c0_30, %c0_31] : memref<9x4x4xbf16, #tpu.memory_space<vmem>>, vector<1x4x4xbf16>
    %61 = vector.shape_cast %60 : vector<1x4x4xbf16> to vector<4x4xbf16>
    %cst_32 = arith.constant dense<0.000000e+00> : vector<64x4xf32>
    %62 = tpu.matmul %59, %61, %cst_32 {dimension_numbers = #tpu.dot_dimension_numbers<[1], [0], [0], [1], [0, 0, 1, 1], [], []>} : vector<64x4xbf16>, vector<4x4xbf16>, vector<64x4xf32> -> vector<64x4xf32>
    %63 = arith.addf %58, %62 : vector<64x4xf32>
    %64 = vector.shape_cast %53 : vector<8x8x4xbf16> to vector<64x4xbf16>
    %c5 = arith.constant 5 : index
    %c0_33 = arith.constant 0 : index
    %c0_34 = arith.constant 0 : index
    %65 = vector.load %arg6[%c5, %c0_33, %c0_34] : memref<9x4x4xbf16, #tpu.memory_space<vmem>>, vector<1x4x4xbf16>
    %66 = vector.shape_cast %65 : vector<1x4x4xbf16> to vector<4x4xbf16>
    %cst_35 = arith.constant dense<0.000000e+00> : vector<64x4xf32>
    %67 = tpu.matmul %64, %66, %cst_35 {dimension_numbers = #tpu.dot_dimension_numbers<[1], [0], [0], [1], [0, 0, 1, 1], [], []>} : vector<64x4xbf16>, vector<4x4xbf16>, vector<64x4xf32> -> vector<64x4xf32>
    %68 = arith.addf %63, %67 : vector<64x4xf32>
    %c2_36 = arith.constant 2 : index
    %c0_37 = arith.constant 0 : index
    %c0_38 = arith.constant 0 : index
    %c0_39 = arith.constant 0 : index
    %69 = vector.load %arg3[%c2_36, %c0_37, %c0_38, %c0_39] : memref<3x8x9x8xbf16, #tpu.memory_space<vmem>>, vector<1x8x9x8xbf16>
    %70 = vector.shape_cast %69 : vector<1x8x9x8xbf16> to vector<8x9x8xbf16>
    %71 = vector.extract_strided_slice %70 {offsets = [0, 0, 0], sizes = [8, 9, 4], strides = [1, 1, 1]} : vector<8x9x8xbf16> to vector<8x9x4xbf16>
    %72 = vector.extract_strided_slice %70 {offsets = [0, 0, 4], sizes = [8, 9, 4], strides = [1, 1, 1]} : vector<8x9x8xbf16> to vector<8x9x4xbf16>
    %73 = vector.extract_strided_slice %71 {offsets = [0, 0, 0], sizes = [8, 8, 4], strides = [1, 1, 1]} : vector<8x9x4xbf16> to vector<8x8x4xbf16>
    %74 = vector.extract_strided_slice %72 {offsets = [0, 0, 0], sizes = [8, 8, 4], strides = [1, 1, 1]} : vector<8x9x4xbf16> to vector<8x8x4xbf16>
    %75 = vector.extract_strided_slice %71 {offsets = [0, 1, 0], sizes = [8, 8, 4], strides = [1, 1, 1]} : vector<8x9x4xbf16> to vector<8x8x4xbf16>
    %76 = vector.shape_cast %73 : vector<8x8x4xbf16> to vector<64x4xbf16>
    %c6 = arith.constant 6 : index
    %c0_40 = arith.constant 0 : index
    %c0_41 = arith.constant 0 : index
    %77 = vector.load %arg6[%c6, %c0_40, %c0_41] : memref<9x4x4xbf16, #tpu.memory_space<vmem>>, vector<1x4x4xbf16>
    %78 = vector.shape_cast %77 : vector<1x4x4xbf16> to vector<4x4xbf16>
    %cst_42 = arith.constant dense<0.000000e+00> : vector<64x4xf32>
    %79 = tpu.matmul %76, %78, %cst_42 {dimension_numbers = #tpu.dot_dimension_numbers<[1], [0], [0], [1], [0, 0, 1, 1], [], []>} : vector<64x4xbf16>, vector<4x4xbf16>, vector<64x4xf32> -> vector<64x4xf32>
    %80 = arith.addf %68, %79 : vector<64x4xf32>
    %81 = vector.shape_cast %74 : vector<8x8x4xbf16> to vector<64x4xbf16>
    %c7 = arith.constant 7 : index
    %c0_43 = arith.constant 0 : index
    %c0_44 = arith.constant 0 : index
    %82 = vector.load %arg6[%c7, %c0_43, %c0_44] : memref<9x4x4xbf16, #tpu.memory_space<vmem>>, vector<1x4x4xbf16>
    %83 = vector.shape_cast %82 : vector<1x4x4xbf16> to vector<4x4xbf16>
    %cst_45 = arith.constant dense<0.000000e+00> : vector<64x4xf32>
    %84 = tpu.matmul %81, %83, %cst_45 {dimension_numbers = #tpu.dot_dimension_numbers<[1], [0], [0], [1], [0, 0, 1, 1], [], []>} : vector<64x4xbf16>, vector<4x4xbf16>, vector<64x4xf32> -> vector<64x4xf32>
    %85 = arith.addf %80, %84 : vector<64x4xf32>
    %86 = vector.shape_cast %75 : vector<8x8x4xbf16> to vector<64x4xbf16>
    %c8 = arith.constant 8 : index
    %c0_46 = arith.constant 0 : index
    %c0_47 = arith.constant 0 : index
    %87 = vector.load %arg6[%c8, %c0_46, %c0_47] : memref<9x4x4xbf16, #tpu.memory_space<vmem>>, vector<1x4x4xbf16>
    %88 = vector.shape_cast %87 : vector<1x4x4xbf16> to vector<4x4xbf16>
    %cst_48 = arith.constant dense<0.000000e+00> : vector<64x4xf32>
    %89 = tpu.matmul %86, %88, %cst_48 {dimension_numbers = #tpu.dot_dimension_numbers<[1], [0], [0], [1], [0, 0, 1, 1], [], []>} : vector<64x4xbf16>, vector<4x4xbf16>, vector<64x4xf32> -> vector<64x4xf32>
    %90 = arith.addf %85, %89 : vector<64x4xf32>
    %c0_49 = arith.constant 0 : index
    %c0_50 = arith.constant 0 : index
    %91 = vector.load %arg7[%c0_49, %c0_50] : memref<1x4xf32, #tpu.memory_space<vmem>>, vector<1x4xf32>
    %92 = vector.broadcast %91 : vector<1x4xf32> to vector<64x4xf32>
    %93 = arith.addf %90, %92 : vector<64x4xf32>
    %94 = arith.negf %93 : vector<64x4xf32>
    %95 = math.exp %94 : vector<64x4xf32>
    %cst_51 = arith.constant 1.000000e+00 : f32
    %96 = vector.broadcast %cst_51 : f32 to vector<64x4xf32>
    %97 = arith.addf %96, %95 : vector<64x4xf32>
    %98 = arith.divf %96, %97 : vector<64x4xf32>
    %99 = arith.mulf %93, %98 : vector<64x4xf32>
    %100 = tpu.concatenate %99, %23 in 1 : vector<64x4xf32>, vector<64x4xf32> -> vector<64x8xf32>
    %c0_52 = arith.constant 0 : index
    %c0_53 = arith.constant 0 : index
    %c0_54 = arith.constant 0 : index
    %101 = vector.load %arg8[%c0_52, %c0_53, %c0_54] : memref<1x64x8xf32, #tpu.memory_space<vmem>>, vector<1x64x8xf32>
    %102 = vector.shape_cast %101 : vector<1x64x8xf32> to vector<64x8xf32>
    %103 = vector.shape_cast %100 : vector<64x8xf32> to vector<1x64x8xf32>
    tpu.vector_store %arg8[%c0_52, %c0_53, %c0_54], %103 {strides = array<i32>} : memref<1x64x8xf32, #tpu.memory_space<vmem>>, vector<1x64x8xf32>,
    return
  }
  func.func @transform_0(%arg0: i32, %arg1: i32) -> (i32, i32, i32, i32) {
    %c0_i32 = arith.constant 0 : i32
    %c0_i32_0 = arith.constant 0 : i32
    %c0_i32_1 = arith.constant 0 : i32
    return %arg0, %arg1, %c0_i32, %c0_i32_0 : i32, i32, i32, i32
  }
  func.func @transform_1(%arg0: i32, %arg1: i32) -> (i32, i32, i32, i32) {
    %c0_i32 = arith.constant 0 : i32
    %c0_i32_0 = arith.constant 0 : i32
    %c0_i32_1 = arith.constant 0 : i32
    return %arg0, %arg1, %c0_i32, %c0_i32_0 : i32, i32, i32, i32
  }
  func.func @transform_2(%arg0: i32, %arg1: i32) -> (i32, i32) {
    %c0_i32 = arith.constant 0 : i32
    %c0_i32_0 = arith.constant 0 : i32
    %c0_i32_1 = arith.constant 0 : i32
    return %c0_i32, %c0_i32_0 : i32, i32
  }
  func.func @transform_3(%arg0: i32, %arg1: i32) -> (i32, i32) {
    %c0_i32 = arith.constant 0 : i32
    %c0_i32_0 = arith.constant 0 : i32
    %c0_i32_1 = arith.constant 0 : i32
    return %c0_i32, %c0_i32_0 : i32, i32
  }
  func.func @transform_4(%arg0: i32, %arg1: i32) -> (i32, i32, i32) {
    %c0_i32 = arith.constant 0 : i32
    %c0_i32_0 = arith.constant 0 : i32
    %c0_i32_1 = arith.constant 0 : i32
    %c0_i32_2 = arith.constant 0 : i32
    return %c0_i32, %c0_i32_0, %c0_i32_1 : i32, i32, i32
  }
  func.func @transform_5(%arg0: i32, %arg1: i32) -> (i32, i32) {
    %c0_i32 = arith.constant 0 : i32
    %c0_i32_0 = arith.constant 0 : i32
    %c0_i32_1 = arith.constant 0 : i32
    return %c0_i32, %c0_i32_0 : i32, i32
  }
  func.func @transform_6(%arg0: i32, %arg1: i32) -> (i32, i32, i32) {
    %c0_i32 = arith.constant 0 : i32
    %c0_i32_0 = arith.constant 0 : i32
    return %arg0, %arg1, %c0_i32 : i32, i32, i32
  }
}

</mosaic_0001>

<bundles_post_ra>
// kernel: _lambda_.2
= control target key start
LH: loop header
LB: loop body
LE: loop exit
PB: predicated region body
PF: predicated region fallthrough
CT: control target
= control target key end

     0   :  { %vm213_vm0 = vcmask 1041408   ;;  %vm116_vm1 = vcmask 31744   ;;  %vm1730_vm7 = vcmask 27648   ;;  %s3886_s1 = inlined_call_operand.vmem [shape: bf16[4,4], index: 1, kind: input, shape index: {}]   ;;  %s3887_s0 = inlined_call_operand.vmem [shape: f32[512,4], index: 0, kind: input, shape index: {}]   ;;  %s3888_s2 = inlined_call_operand.vmem [shape: f32[1,4], index: 2, kind: input, shape index: {}]   ;;  %s3889_s3 = inlined_call_operand.vmem [shape: bf16[512,4], index: 3, kind: output, shape index: {}]  }
   0x1   :  { %v111_v0 = vld [vmem:[%s3886_s1] sm:$0x3]  ;;  %v16_v2 = vld [vmem:[%s3887_s0 + $0x8] sm:$0xff]  ;;  %v17_v14 = vld [vmem:[%s3887_s0 + $0x10] sm:$0xff] }
   0x2   :  { %v15_v1 = vld [vmem:[%s3887_s0] sm:$0xff]  ;;  %v215_v3 = vsel %vm213_vm0, %v111_v0, 0  ;;  %v32_v6 = vld [vmem:[%s3887_s0 + $0x88] sm:$0xff]  ;;  %v18_v15 = vld [vmem:[%s3887_s0 + $0x18] sm:$0xff] }
   0x3   :  { %v79_v4 = vpack.c.bf16 %v16_v2, %v15_v1  ;;  %v31_v5 = vld [vmem:[%s3887_s0 + $0x80] sm:$0xff]  ;;  %224 = vmatpush.bf16.msra.mxu0 %v215_v3  ;;  %1895 = vmatpush.bf16.msra.mxu1 %v215_v3  ;;  %v48_v9 = vld [vmem:[%s3887_s0 + $0x108] sm:$0xff]  ;;  %v33_v16 = vld [vmem:[%s3887_s0 + $0x90] sm:$0xff]  ;;  %v80_v22 = vpack.c.bf16 %v18_v15, %v17_v14 }
   0x4   :  { %v47_v7 = vld [vmem:[%s3887_s0 + $0x100] sm:$0xff]  ;;  %v87_v8 = vpack.c.bf16 %v32_v6, %v31_v5  ;;  %v64_v11 = vld [vmem:[%s3887_s0 + $0x188] sm:$0xff]  ;;  %1896 = vmatpush.bf16.msra.mxu2 %v215_v3  ;;  %1897 = vmatpush.bf16.msra.mxu3 %v215_v3  ;;  %v34_v17 = vld [vmem:[%s3887_s0 + $0x98] sm:$0xff] }
   0x5   :  { %v63_v10 = vld [vmem:[%s3887_s0 + $0x180] sm:$0xff]  ;;  %v95_v12 = vpack.c.bf16 %v48_v9, %v47_v7  ;;  %v49_v18 = vld [vmem:[%s3887_s0 + $0x110] sm:$0xff]  ;;  %v50_v19 = vld [vmem:[%s3887_s0 + $0x118] sm:$0xff]  ;;  %v88_v23 = vpack.c.bf16 %v34_v17, %v33_v16 }
   0x6   :  { %v103_v13 = vpack.c.bf16 %v64_v11, %v63_v10  ;;  %1799 = vmatmul.msk.bf16.vlgmr.msra.gmra.mxu0 %vm116_vm1, %v79_v4  ;;  %1807 = vmatmul.msk.bf16.vlgmr.msra.gmra.mxu1 %vm116_vm1, %v87_v8  ;;  %v65_v20 = vld [vmem:[%s3887_s0 + $0x190] sm:$0xff]  ;;  %v66_v21 = vld [vmem:[%s3887_s0 + $0x198] sm:$0xff]  ;;  %v96_v24 = vpack.c.bf16 %v50_v19, %v49_v18  ;;  %v19_v26 = vld [vmem:[%s3887_s0 + $0x20] sm:$0xff] }
   0x7   :  { %1815 = vmatmul.msk.bf16.vlgmr.msra.gmra.mxu2 %vm116_vm1, %v95_v12  ;;  %v104_v25 = vpack.c.bf16 %v66_v21, %v65_v20  ;;  %v20_v27 = vld [vmem:[%s3887_s0 + $0x28] sm:$0xff]  ;;  %v35_v28 = vld [vmem:[%s3887_s0 + $0xa0] sm:$0xff]  ;;  %v21_v38 = vld [vmem:[%s3887_s0 + $0x30] sm:$0xff] }
   0x8   :  { %1823 = vmatmul.msk.bf16.vlgmr.msra.gmra.mxu3 %vm116_vm1, %v103_v13  ;;  %v36_v29 = vld [vmem:[%s3887_s0 + $0xa8] sm:$0xff]  ;;  %v51_v30 = vld [vmem:[%s3887_s0 + $0x120] sm:$0xff]  ;;  %v81_v34 = vpack.c.bf16 %v20_v27, %v19_v26  ;;  %v22_v39 = vld [vmem:[%s3887_s0 + $0x38] sm:$0xff] }
   0x9   :  { %v52_v31 = vld [vmem:[%s3887_s0 + $0x128] sm:$0xff]  ;;  %v67_v32 = vld [vmem:[%s3887_s0 + $0x1a0] sm:$0xff]  ;;  %v89_v35 = vpack.c.bf16 %v36_v29, %v35_v28  ;;  %v37_v40 = vld [vmem:[%s3887_s0 + $0xb0] sm:$0xff]  ;;  %v82_v46 = vpack.c.bf16 %v22_v39, %v21_v38 }
   0xa   :  { %v68_v33 = vld [vmem:[%s3887_s0 + $0x1a8] sm:$0xff]  ;;  %v97_v36 = vpack.c.bf16 %v52_v31, %v51_v30  ;;  %v38_v41 = vld [vmem:[%s3887_s0 + $0xb8] sm:$0xff]  ;;  %v53_v42 = vld [vmem:[%s3887_s0 + $0x130] sm:$0xff] }
   0xb   :  { %v105_v37 = vpack.c.bf16 %v68_v33, %v67_v32  ;;  %v54_v43 = vld [vmem:[%s3887_s0 + $0x138] sm:$0xff]  ;;  %v69_v44 = vld [vmem:[%s3887_s0 + $0x1b0] sm:$0xff]  ;;  %v90_v47 = vpack.c.bf16 %v38_v41, %v37_v40  ;;  %v23_v50 = vld [vmem:[%s3887_s0 + $0x40] sm:$0xff] }
   0xc   :  { %v70_v45 = vld [vmem:[%s3887_s0 + $0x1b8] sm:$0xff]  ;;  %v98_v48 = vpack.c.bf16 %v54_v43, %v53_v42  ;;  %v24_v51 = vld [vmem:[%s3887_s0 + $0x48] sm:$0xff]  ;;  %v39_v52 = vld [vmem:[%s3887_s0 + $0xc0] sm:$0xff] }
   0xd   :  { %v106_v49 = vpack.c.bf16 %v70_v45, %v69_v44  ;;  %v40_v53 = vld [vmem:[%s3887_s0 + $0xc8] sm:$0xff]  ;;  %v55_v54 = vld [vmem:[%s3887_s0 + $0x140] sm:$0xff]  ;;  %v83_v58 = vpack.c.bf16 %v24_v51, %v23_v50  ;;  %v25_v62 = vld [vmem:[%s3887_s0 + $0x50] sm:$0xff] }
   0xe   :  { %v56_v55 = vld [vmem:[%s3887_s0 + $0x148] sm:$0xff]  ;;  %v71_v56 = vld [vmem:[%s3887_s0 + $0x1c0] sm:$0xff]  ;;  %v91_v59 = vpack.c.bf16 %v40_v53, %v39_v52  ;;  %v26_v63 = vld [vmem:[%s3887_s0 + $0x58] sm:$0xff] }
   0xf   :  { %v72_v57 = vld [vmem:[%s3887_s0 + $0x1c8] sm:$0xff]  ;;  %v99_v60 = vpack.c.bf16 %v56_v55, %v55_v54  ;;  %v41_v0 = vld [vmem:[%s3887_s0 + $0xd0] sm:$0xff]  ;;  %v42_v1 = vld [vmem:[%s3887_s0 + $0xd8] sm:$0xff]  ;;  %v84_v6 = vpack.c.bf16 %v26_v63, %v25_v62 }
  0x10   :  { %v107_v61 = vpack.c.bf16 %v72_v57, %v71_v56  ;;  %v57_v2 = vld [vmem:[%s3887_s0 + $0x150] sm:$0xff]  ;;  %v58_v3 = vld [vmem:[%s3887_s0 + $0x158] sm:$0xff]  ;;  %v92_v7 = vpack.c.bf16 %v42_v1, %v41_v0  ;;  %v27_v10 = vld [vmem:[%s3887_s0 + $0x60] sm:$0xff] }
  0x11   :  { %v73_v4 = vld [vmem:[%s3887_s0 + $0x1d0] sm:$0xff]  ;;  %v74_v5 = vld [vmem:[%s3887_s0 + $0x1d8] sm:$0xff]  ;;  %v100_v8 = vpack.c.bf16 %v58_v3, %v57_v2  ;;  %v28_v11 = vld [vmem:[%s3887_s0 + $0x68] sm:$0xff] }
  0x12   :  { %v108_v9 = vpack.c.bf16 %v74_v5, %v73_v4  ;;  %v43_v12 = vld [vmem:[%s3887_s0 + $0xe0] sm:$0xff]  ;;  %v44_v13 = vld [vmem:[%s3887_s0 + $0xe8] sm:$0xff]  ;;  %v85_v18 = vpack.c.bf16 %v28_v11, %v27_v10  ;;  %v61_v26 = vld [vmem:[%s3887_s0 + $0x170] sm:$0xff] }
  0x13   :  { %v59_v14 = vld [vmem:[%s3887_s0 + $0x160] sm:$0xff]  ;;  %v60_v15 = vld [vmem:[%s3887_s0 + $0x168] sm:$0xff]  ;;  %v93_v19 = vpack.c.bf16 %v44_v13, %v43_v12  ;;  %v62_v27 = vld [vmem:[%s3887_s0 + $0x178] sm:$0xff] }
  0x14   :  { %v75_v16 = vld [vmem:[%s3887_s0 + $0x1e0] sm:$0xff]  ;;  %v76_v17 = vld [vmem:[%s3887_s0 + $0x1e8] sm:$0xff]  ;;  %v101_v20 = vpack.c.bf16 %v60_v15, %v59_v14  ;;  %v77_v28 = vld [vmem:[%s3887_s0 + $0x1f0] sm:$0xff]  ;;  %v102_v32 = vpack.c.bf16 %v62_v27, %v61_v26 }
  0x15   :  { %v109_v21 = vpack.c.bf16 %v76_v17, %v75_v16  ;;  %v78_v29 = vld [vmem:[%s3887_s0 + $0x1f8] sm:$0xff] }
  0x16   :  { %1800 = vmatmul.msk.bf16.gmra.mxu0 %vm116_vm1, %v80_v22  ;;  %1808 = vmatmul.msk.bf16.gmra.mxu1 %vm116_vm1, %v88_v23  ;;  %v29_v22 = vld [vmem:[%s3887_s0 + $0x70] sm:$0xff]  ;;  %v30_v23 = vld [vmem:[%s3887_s0 + $0x78] sm:$0xff]  ;;  %v110_v33 = vpack.c.bf16 %v78_v29, %v77_v28 }
  0x17   :  { %1816 = vmatmul.msk.bf16.gmra.mxu2 %vm116_vm1, %v96_v24  ;;  %v45_v24 = vld [vmem:[%s3887_s0 + $0xf0] sm:$0xff]  ;;  %v86_v30 = vpack.c.bf16 %v30_v23, %v29_v22 }
  0x18   :  { %1824 = vmatmul.msk.bf16.gmra.mxu3 %vm116_vm1, %v104_v25  ;;  %v46_v25 = vld [vmem:[%s3887_s0 + $0xf8] sm:$0xff] }
  0x19   :  { %v94_v31 = vpack.c.bf16 %v46_v25, %v45_v24 }
  0x26   :  { %1801 = vmatmul.msk.bf16.gmra.mxu0 %vm116_vm1, %v81_v34  ;;  %1809 = vmatmul.msk.bf16.gmra.mxu1 %vm116_vm1, %v89_v35  ;;  %v2407_v34 = vld [vmem:[%s3888_s2] ss:$0 sm:$0xff] }
  0x27   :  { %1817 = vmatmul.msk.bf16.gmra.mxu2 %vm116_vm1, %v97_v36 }
  0x28   :  { %1825 = vmatmul.msk.bf16.gmra.mxu3 %vm116_vm1, %v105_v37 }
  0x36   :  { %1802 = vmatmul.msk.bf16.gmra.mxu0 %vm116_vm1, %v82_v46  ;;  %1810 = vmatmul.msk.bf16.gmra.mxu1 %vm116_vm1, %v90_v47 }
  0x37   :  { %1818 = vmatmul.msk.bf16.gmra.mxu2 %vm116_vm1, %v98_v48 }
  0x38   :  { %1826 = vmatmul.msk.bf16.gmra.mxu3 %vm116_vm1, %v106_v49 }
  0x46   :  { %1803 = vmatmul.msk.bf16.gmra.mxu0 %vm116_vm1, %v83_v58  ;;  %1811 = vmatmul.msk.bf16.gmra.mxu1 %vm116_vm1, %v91_v59 }
  0x47   :  { %1819 = vmatmul.msk.bf16.gmra.mxu2 %vm116_vm1, %v99_v60 }
  0x48   :  { %1827 = vmatmul.msk.bf16.gmra.mxu3 %vm116_vm1, %v107_v61 }
  0x56   :  { %1804 = vmatmul.msk.bf16.gmra.mxu0 %vm116_vm1, %v84_v6  ;;  %1812 = vmatmul.msk.bf16.gmra.mxu1 %vm116_vm1, %v92_v7 }
  0x57   :  { %1820 = vmatmul.msk.bf16.gmra.mxu2 %vm116_vm1, %v100_v8 }
  0x58   :  { %1828 = vmatmul.msk.bf16.gmra.mxu3 %vm116_vm1, %v108_v9 }
  0x66   :  { %1805 = vmatmul.msk.bf16.gmra.mxu0 %vm116_vm1, %v85_v18  ;;  %1813 = vmatmul.msk.bf16.gmra.mxu1 %vm116_vm1, %v93_v19 }
  0x67   :  { %1821 = vmatmul.msk.bf16.gmra.mxu2 %vm116_vm1, %v101_v20 }
  0x68   :  { %1829 = vmatmul.msk.bf16.gmra.mxu3 %vm116_vm1, %v109_v21 }
  0x76   :  { %1806 = vmatmul.msk.bf16.gmra.mxu0 %vm116_vm1, %v86_v30  ;;  %1814 = vmatmul.msk.bf16.gmra.mxu1 %vm116_vm1, %v94_v31 }
  0x77   :  { %1822 = vmatmul.msk.bf16.gmra.mxu2 %vm116_vm1, %v102_v32 }
  0x78   :  { %1830 = vmatmul.msk.bf16.gmra.mxu3 %vm116_vm1, %v110_v33 }
  0x83   :  { %v226_v35 = vpop.f32.mrf.mxu0  ;;  %v266_v36 = vpop.f32.mrf.mxu1 }
  0x84   :  { %v2410_v37 = vadd.f32 %v2407_v34, %v226_v35  ;;  %v2413_v38 = vadd.f32 %v2407_v34, %v266_v36 }
  0x86   :  { %v1831_v39 = vmul.f32 -1.442695, %v2410_v37  ;;  %v1847_v40 = vmul.f32 -1.442695, %v2413_v38 }
  0x88   :  { %1899 = vpow2.f32 %v1831_v39 }
  0x89   :  { %1901 = vpow2.f32 %v1847_v40 }
  0x8a   :  { %v306_v41 = vpop.f32.mrf.mxu2 }
  0x8b   :  { %v346_v42 = vpop.f32.mrf.mxu3  ;;  %v2418_v43 = vadd.f32 %v2407_v34, %v306_v41  ;;  %v228_v45 = vpop.f32.mrf.mxu0 }
  0x8c   :  { %v2421_v44 = vadd.f32 %v2407_v34, %v346_v42  ;;  %v268_v46 = vpop.f32.mrf.mxu1  ;;  %v2424_v47 = vadd.f32 %v2407_v34, %v228_v45 }
  0x8d   :  { %v2427_v48 = vadd.f32 %v2407_v34, %v268_v46  ;;  %v1863_v49 = vmul.f32 -1.442695, %v2418_v43 }
  0x8e   :  { %v1879_v50 = vmul.f32 -1.442695, %v2421_v44  ;;  %v1900_v51 = vpop.eup %1899  ;;  %v1832_v54 = vmul.f32 -1.442695, %v2424_v47 }
  0x8f   :  { %v1902_v52 = vpop.eup %1901  ;;  %v2431_v53 = vadd.f32 1.0, %v1900_v51  ;;  %1903 = vpow2.f32 %v1863_v49  ;;  %v1848_v56 = vmul.f32 -1.442695, %v2427_v48 }
  0x90   :  { %v2434_v55 = vadd.f32 1.0, %v1902_v52  ;;  %1905 = vpow2.f32 %v1879_v50 }
  0x91   :  { %1907 = vrcp.f32 %v2431_v53  ;;  %v651_v61 = vand.u32 2147483647, %v2431_v53  ;;  %v653_v62 = vand.u32 2147483648, %v2431_v53  ;;  %vm647_vm2 = vweird.f32 %v2431_v53 }
  0x92   :  { %1909 = vrcp.f32 %v2434_v55  ;;  %v308_v57 = vpop.f32.mrf.mxu2  ;;  %v891_v1 = vand.u32 2147483647, %v2434_v55  ;;  %v893_v5 = vand.u32 2147483648, %v2434_v55  ;;  %vm887_vm3 = vweird.f32 %v2434_v55 }
  0x93   :  { %v348_v58 = vpop.f32.mrf.mxu3  ;;  %1911 = vpow2.f32 %v1832_v54  ;;  %v2440_v59 = vadd.f32 %v2407_v34, %v308_v57  ;;  %v231_v60 = vpop.f32.mrf.mxu0  ;;  %vm2463_vm4 = vcmp.eq.f32.partialorder %v651_v61, 8.507059e+37  ;;  %v654_v14 = vor.u32 1.1754944e-38, %v653_v62 }
  0x94   :  { %1913 = vpow2.f32 %v1848_v56  ;;  %v271_v63 = vpop.f32.mrf.mxu1  ;;  %v2447_v3 = vadd.f32 %v2407_v34, %v348_v58  ;;  %v2453_v7 = vadd.f32 %v2407_v34, %v231_v60  ;;  %vm2469_vm5 = vcmp.eq.f32.partialorder %v891_v1, 8.507059e+37 }
  0x95   :  { %v1904_v0 = vpop.eup %1903  ;;  %v1864_v2 = vmul.f32 -1.442695, %v2440_v59  ;;  %v2460_v10 = vadd.f32 %v2407_v34, %v271_v63  ;;  %v894_v21 = vor.u32 1.1754944e-38, %v893_v5 }
  0x96   :  { %v1906_v4 = vpop.eup %1905  ;;  %v2450_v6 = vadd.f32 1.0, %v1904_v0  ;;  %v1880_v18 = vmul.f32 -1.442695, %v2447_v3  ;;  %v2476_v22 = vmul.f32 -1.442695, %v2453_v7 }
  0x97   :  { %v1908_v8 = vpop.eup %1907  ;;  %v2457_v9 = vadd.f32 1.0, %v1906_v4  ;;  %v2480_v25 = vmul.f32 -1.442695, %v2460_v10 }
  0x98   :  { %v1910_v11 = vpop.eup %1909  ;;  %v643_v12 = vmul.f32 %v1908_v8, %v2431_v53  ;;  %1915 = vrcp.f32 %v2450_v6  ;;  %vm648_vm6 = vweird.f32 %v1908_v8  ;;  %v1131_v24 = vand.u32 2147483647, %v2450_v6 }
  0x99   :  { %v1912_v15 = vpop.eup %1911  ;;  %v883_v16 = vmul.f32 %v1910_v11, %v2434_v55  ;;  %1917 = vpow2.f32 %v1864_v2  ;;  %v1133_v27 = vand.u32 2147483648, %v2450_v6  ;;  %vm888_vm8 = vweird.f32 %v1910_v11  ;;  %vm649_vm10 = vmor %vm647_vm2, %vm648_vm6 }
  0x9a   :  { %v1914_v19 = vpop.eup %1913  ;;  %v644_v20 = vsub.f32 1.0, %v643_v12  ;;  %1919 = vrcp.f32 %v2457_v9  ;;  %v2483_v28 = vadd.f32 1.0, %v1912_v15  ;;  %v1371_v31 = vand.u32 2147483647, %v2457_v9  ;;  %v311_v42 = vpop.f32.mrf.mxu2  ;;  %vm889_vm13 = vmor %vm887_vm3, %vm888_vm8 }
  0x9b   :  { %v884_v23 = vsub.f32 1.0, %v883_v16  ;;  %v2485_v29 = vadd.f32 1.0, %v1914_v19  ;;  %1921 = vpow2.f32 %v1880_v18  ;;  %vm1127_vm9 = vweird.f32 %v2450_v6 }
  0x9c   :  { %v645_v26 = vmul.f32 %v1908_v8, %v644_v20  ;;  %v1373_v35 = vand.u32 2147483648, %v2457_v9  ;;  %1923 = vrcp.f32 %v2483_v28  ;;  %vm2495_vm11 = vcmp.eq.f32.partialorder %v1131_v24, 8.507059e+37 }
  0x9d   :  { %v885_v30 = vmul.f32 %v1910_v11, %v884_v23  ;;  %vm1367_vm12 = vweird.f32 %v2457_v9  ;;  %v1134_v49 = vor.u32 1.1754944e-38, %v1133_v27  ;;  %v666_v50 = vand.u32 2147483647, %v2483_v28 }
  0x9e   :  { %v1916_v32 = vpop.eup %1915  ;;  %v646_v33 = vadd.f32 %v1908_v8, %v645_v26  ;;  %1925 = vrcp.f32 %v2485_v29  ;;  %vm2508_vm14 = vcmp.eq.f32.partialorder %v1371_v31, 8.507059e+37  ;;  %v1374_v58 = vor.u32 1.1754944e-38, %v1373_v35 }
  0x9f   :  { %v1918_v36 = vpop.eup %1917  ;;  %v886_v39 = vadd.f32 %v1910_v11, %v885_v30  ;;  %v1123_v40 = vmul.f32 %v1916_v32, %v2450_v6  ;;  %v2516_v60 = vadd.f32 %v2407_v34, %v311_v42  ;;  %vm1128_vm15 = vweird.f32 %v1916_v32 }
  0xa0   :  { %v1920_v45 = vpop.eup %1919  ;;  %v650_v46 = vsel %vm649_vm10, %v1908_v8, %v646_v33  ;;  %vm662_vm0 = vweird.f32 %v2483_v28  ;;  %v2521_v4 = vadd.f32 1.0, %v1918_v36  ;;  %vm2524_vm2 = vcmp.eq.f32.partialorder %v666_v50, 8.507059e+37  ;;  %vm1129_vm3 = vmor %vm1127_vm9, %vm1128_vm15 }
  0xa1   :  { %v655_v51 = vsel %vm2463_vm4, %v654_v14, %v650_v46  ;;  %v890_v52 = vsel %vm889_vm13, %v1910_v11, %v886_v39  ;;  %v1124_v53 = vsub.f32 1.0, %v1123_v40  ;;  %v1363_v54 = vmul.f32 %v1920_v45, %v2457_v9  ;;  %v1922_v61 = vpop.eup %1921 }
  0xa2   :  { %v1602_v57 = vmul.f32 %v655_v51, %v2410_v37  ;;  %v895_v55 = vsel %vm2469_vm5, %v894_v21, %v890_v52  ;;  %v1924_v1 = vpop.eup %1923  ;;  %vm1368_vm1 = vweird.f32 %v1920_v45  ;;  %v668_v37 = vand.u32 2147483648, %v2483_v28 }
  0xa3   :  { %v1618_v62 = vmul.f32 %v895_v55, %v2413_v38  ;;  %v1125_v63 = vmul.f32 %v1916_v32, %v1124_v53  ;;  %v1364_v0 = vsub.f32 1.0, %v1363_v54  ;;  %v658_v12 = vmul.f32 %v1924_v1, %v2483_v28  ;;  %vm1369_vm5 = vmor %vm1367_vm12, %vm1368_vm1  ;;  %v351_v28 = vpop.f32.mrf.mxu3  ;;  %v233_v54 = vpop.f32.mrf.mxu0 }
  0xa4   :  { %v1666_v2 = vpack.c.bf16 %v1602_v57, %v1602_v57  ;;  %v1926_v38 = vpop.eup %1925  ;;  %vm902_vm4 = vweird.f32 %v2485_v29  ;;  %v906_v14 = vand.u32 2147483647, %v2485_v29  ;;  %1927 = vrcp.f32 %v2521_v4 }
  0xa5   :  { %v1682_v5 = vpack.c.bf16 %v1618_v62, %v1618_v62  ;;  %v1126_v8 = vadd.f32 %v1916_v32, %v1125_v63  ;;  %v1365_v11 = vmul.f32 %v1920_v45, %v1364_v0  ;;  %v2538_v15 = vadd.f32 1.0, %v1922_v61 }
  0xa6   :  { %1731 = vst.msk [vmem:[%s3889_s3] sm:$0xf] %vm1730_vm7, %v1666_v2  ;;  %v659_v18 = vsub.f32 1.0, %v658_v12  ;;  %v898_v19 = vmul.f32 %v1926_v38, %v2485_v29  ;;  %vm663_vm6 = vweird.f32 %v1924_v1  ;;  %vm903_vm8 = vweird.f32 %v1926_v38 }
  0xa7   :  { %1747 = vst.msk [vmem:[%s3889_s3 + $0x40] sm:$0xf] %vm1730_vm7, %v1682_v5  ;;  %v1130_v16 = vsel %vm1129_vm3, %v1916_v32, %v1126_v8  ;;  %v1366_v17 = vadd.f32 %v1920_v45, %v1365_v11  ;;  %v908_v20 = vand.u32 2147483648, %v2485_v29  ;;  %v1146_v30 = vand.u32 2147483647, %v2521_v4  ;;  %vm664_vm9 = vmor %vm662_vm0, %vm663_vm6 }
  0xa8   :  { %v1135_v6 = vsel %vm2495_vm11, %v1134_v49, %v1130_v16  ;;  %v660_v24 = vmul.f32 %v1924_v1, %v659_v18  ;;  %v899_v26 = vsub.f32 1.0, %v898_v19  ;;  %v1148_v31 = vand.u32 2147483648, %v2521_v4  ;;  %vm904_vm12 = vmor %vm902_vm4, %vm903_vm8 }
  0xa9   :  { %v1634_v21 = vmul.f32 %v1135_v6, %v2418_v43  ;;  %v1370_v23 = vsel %vm1369_vm5, %v1920_v45, %v1366_v17  ;;  %1929 = vrcp.f32 %v2538_v15  ;;  %v669_v43 = vor.u32 1.1754944e-38, %v668_v37  ;;  %v313_v37 = vpop.f32.mrf.mxu2 }
  0xaa   :  { %v1375_v27 = vsel %vm2508_vm14, %v1374_v58, %v1370_v23  ;;  %v661_v33 = vadd.f32 %v1924_v1, %v660_v24  ;;  %v900_v35 = vmul.f32 %v1926_v38, %v899_v26  ;;  %v1928_v36 = vpop.eup %1927  ;;  %vm2561_vm10 = vcmp.eq.f32.partialorder %v906_v14, 8.507059e+37  ;;  %v273_v58 = vpop.f32.mrf.mxu1 }
  0xab   :  { %v1698_v9 = vpack.c.bf16 %v1634_v21, %v1634_v21  ;;  %v1650_v32 = vmul.f32 %v1375_v27, %v2421_v44  ;;  %v909_v40 = vor.u32 1.1754944e-38, %v908_v20  ;;  %vm1142_vm11 = vweird.f32 %v2521_v4  ;;  %v353_v21 = vpop.f32.mrf.mxu3 }
  0xac   :  { %v665_v41 = vsel %vm664_vm9, %v1924_v1, %v661_v33  ;;  %v901_v42 = vadd.f32 %v1926_v38, %v900_v35  ;;  %v1138_v45 = vmul.f32 %v1928_v36, %v2521_v4  ;;  %vm1143_vm13 = vweird.f32 %v1928_v36 }
  0xad   :  { %1763 = vst.msk [vmem:[%s3889_s3 + $0x80] sm:$0xf] %vm1730_vm7, %v1698_v9  ;;  %v1714_v44 = vpack.c.bf16 %v1650_v32, %v1650_v32  ;;  %v670_v46 = vsel %vm2524_vm2, %v669_v43, %v665_v41  ;;  %vm2576_vm14 = vcmp.eq.f32.partialorder %v1146_v30, 8.507059e+37  ;;  %v1149_v50 = vor.u32 1.1754944e-38, %v1148_v31  ;;  %vm1144_vm0 = vmor %vm1142_vm11, %vm1143_vm13  ;;  %v236_v30 = vpop.f32.mrf.mxu0 }
  0xae   :  { %v1603_v51 = vmul.f32 %v670_v46, %v2424_v47  ;;  %v905_v52 = vsel %vm904_vm12, %v1926_v38, %v901_v42  ;;  %v1139_v53 = vsub.f32 1.0, %v1138_v45  ;;  %1931 = vpow2.f32 %v2476_v22 }
  0xaf   :  { %1779 = vst.msk [vmem:[%s3889_s3 + $0xc0] sm:$0xf] %vm1730_vm7, %v1714_v44  ;;  %v1930_v29 = vpop.eup %1929  ;;  %v910_v56 = vsel %vm2561_vm10, %v909_v40, %v905_v52  ;;  %1933 = vpow2.f32 %v2480_v25  ;;  %v1865_v57 = vmul.f32 -1.442695, %v2516_v60  ;;  %v2591_v55 = vadd.f32 %v2407_v34, %v351_v28 }
  0xb0   :  { %v1667_v61 = vpack.c.bf16 %v1603_v51, %v1603_v51  ;;  %v1619_v47 = vmul.f32 %v910_v56, %v2427_v48  ;;  %v1140_v62 = vmul.f32 %v1928_v36, %v1139_v53  ;;  %v1378_v63 = vmul.f32 %v1930_v29, %v2538_v15 }
  0xb1   :  { %vm1382_vm15 = vweird.f32 %v2538_v15  ;;  %1935 = vpow2.f32 %v1865_v57  ;;  %v1881_v22 = vmul.f32 -1.442695, %v2591_v55  ;;  %v2598_v0 = vadd.f32 %v2407_v34, %v233_v54 }
  0xb2   :  { %1732 = vst.msk [vmem:[%s3889_s3 + $0x4] sm:$0xf] %vm1730_vm7, %v1667_v61  ;;  %v1683_v25 = vpack.c.bf16 %v1619_v47, %v1619_v47  ;;  %v1141_v1 = vadd.f32 %v1928_v36, %v1140_v62  ;;  %v1379_v2 = vsub.f32 1.0, %v1378_v63  ;;  %v2605_v48 = vadd.f32 %v2407_v34, %v273_v58 }
  0xb3   :  { %v1386_v5 = vand.u32 2147483647, %v2538_v15  ;;  %v1388_v8 = vand.u32 2147483648, %v2538_v15  ;;  %1937 = vpow2.f32 %v1881_v22  ;;  %v1834_v11 = vmul.f32 -1.442695, %v2598_v0 }
  0xb4   :  { %v1932_v12 = vpop.eup %1931  ;;  %1748 = vst.msk [vmem:[%s3889_s3 + $0x44] sm:$0xf] %vm1730_vm7, %v1683_v25  ;;  %v1145_v13 = vsel %vm1144_vm0, %v1928_v36, %v1141_v1  ;;  %v1380_v38 = vmul.f32 %v1930_v29, %v1379_v2  ;;  %vm1383_vm1 = vweird.f32 %v1930_v29  ;;  %v1850_v14 = vmul.f32 -1.442695, %v2605_v48 }
  0xb5   :  { %v1934_v4 = vpop.eup %1933  ;;  %v1150_v16 = vsel %vm2576_vm14, %v1149_v50, %v1145_v13  ;;  %v2620_v17 = vadd.f32 1.0, %v1932_v12  ;;  %1939 = vpow2.f32 %v1834_v11  ;;  %v2623_v18 = vadd.f32 %v2407_v34, %v313_v37  ;;  %vm1384_vm2 = vmor %vm1382_vm15, %vm1383_vm1 }
  0xb6   :  { %v1635_v19 = vmul.f32 %v1150_v16, %v2440_v59  ;;  %v1381_v6 = vadd.f32 %v1930_v29, %v1380_v38  ;;  %v2626_v20 = vadd.f32 1.0, %v1934_v4  ;;  %1941 = vpow2.f32 %v1850_v14 }
  0xb7   :  { %v1936_v23 = vpop.eup %1935  ;;  %v1389_v24 = vor.u32 1.1754944e-38, %v1388_v8  ;;  %1943 = vrcp.f32 %v2620_v17  ;;  %vm1387_vm3 = vcmp.eq.f32.partialorder %v1386_v5, 8.507059e+37  ;;  %v681_v9 = vand.u32 2147483647, %v2620_v17  ;;  %v356_v8 = vpop.f32.mrf.mxu3 }
  0xb8   :  { %v1699_v26 = vpack.c.bf16 %v1635_v19, %v1635_v19  ;;  %v1385_v27 = vsel %vm1384_vm2, %v1930_v29, %v1381_v6  ;;  %1945 = vrcp.f32 %v2626_v20  ;;  %v1866_v32 = vmul.f32 -1.442695, %v2623_v18 }
  0xb9   :  { %v1938_v31 = vpop.eup %1937  ;;  %v1390_v59 = vsel %vm1387_vm3, %v1389_v24, %v1385_v27  ;;  %v2635_v33 = vadd.f32 %v2407_v34, %v353_v21  ;;  %v683_v35 = vand.u32 2147483648, %v2620_v17  ;;  %v2643_v36 = vadd.f32 1.0, %v1936_v23 }
  0xba   :  { %1764 = vst.msk [vmem:[%s3889_s3 + $0x84] sm:$0xf] %vm1730_vm7, %v1699_v26  ;;  %v1651_v15 = vmul.f32 %v1390_v59, %v2447_v3  ;;  %v2645_v43 = vadd.f32 1.0, %v1938_v31  ;;  %v921_v40 = vand.u32 2147483647, %v2626_v20  ;;  %v923_v44 = vand.u32 2147483648, %v2626_v20 }
  0xbb   :  { %v1940_v39 = vpop.eup %1939  ;;  %v2650_v41 = vadd.f32 %v2407_v34, %v236_v30  ;;  %1947 = vrcp.f32 %v2643_v36  ;;  %vm677_vm4 = vweird.f32 %v2620_v17  ;;  %vm917_vm5 = vweird.f32 %v2626_v20 }
  0xbc   :  { %v1942_v42 = vpop.eup %1941  ;;  %v1715_v45 = vpack.c.bf16 %v1651_v15, %v1651_v15  ;;  %1949 = vrcp.f32 %v2645_v43  ;;  %v1882_v3 = vmul.f32 -1.442695, %v2635_v33  ;;  %vm2662_vm6 = vcmp.eq.f32.partialorder %v681_v9, 8.507059e+37 }
  0xbd   :  { %v1944_v28 = vpop.eup %1943  ;;  %v684_v51 = vor.u32 1.1754944e-38, %v683_v35  ;;  %1951 = vpow2.f32 %v1866_v32  ;;  %vm2667_vm8 = vcmp.eq.f32.partialorder %v921_v40, 8.507059e+37  ;;  %v924_v54 = vor.u32 1.1754944e-38, %v923_v44 }
  0xbe   :  { %v1946_v46 = vpop.eup %1945  ;;  %1780 = vst.msk [vmem:[%s3889_s3 + $0xc4] sm:$0xf] %vm1730_vm7, %v1715_v45  ;;  %v673_v49 = vmul.f32 %v1944_v28, %v2620_v17  ;;  %v1161_v29 = vand.u32 2147483647, %v2643_v36  ;;  %v2673_v56 = vmul.f32 -1.442695, %v2650_v41  ;;  %vm1157_vm9 = vweird.f32 %v2643_v36  ;;  %v276_v45 = vpop.f32.mrf.mxu1 }
  0xbf   :  { %v913_v52 = vmul.f32 %v1946_v46, %v2626_v20  ;;  %v1163_v58 = vand.u32 2147483648, %v2643_v36  ;;  %v1401_v61 = vand.u32 2147483647, %v2645_v43  ;;  %v2677_v47 = vadd.f32 1.0, %v1940_v39 }
  0xc0   :  { %v674_v57 = vsub.f32 1.0, %v673_v49  ;;  %v1403_v63 = vand.u32 2147483648, %v2645_v43  ;;  %v2681_v22 = vadd.f32 1.0, %v1942_v42  ;;  %1953 = vpow2.f32 %v1882_v3 }
  0xc1   :  { %v914_v62 = vsub.f32 1.0, %v913_v52  ;;  %v1948_v25 = vpop.eup %1947  ;;  %vm678_vm10 = vweird.f32 %v1944_v28  ;;  %vm1397_vm11 = vweird.f32 %v2645_v43  ;;  %1955 = vrcp.f32 %v2677_v47 }
  0xc2   :  { %v675_v1 = vmul.f32 %v1944_v28, %v674_v57  ;;  %v1950_v2 = vpop.eup %1949  ;;  %vm918_vm12 = vweird.f32 %v1946_v46  ;;  %v1153_v5 = vmul.f32 %v1948_v25, %v2643_v36  ;;  %vm2686_vm13 = vcmp.eq.f32.partialorder %v1161_v29, 8.507059e+37  ;;  %vm679_vm15 = vmor %vm677_vm4, %vm678_vm10 }
  0xc3   :  { %v915_v37 = vmul.f32 %v1946_v46, %v914_v62  ;;  %v1952_v11 = vpop.eup %1951  ;;  %v1164_v13 = vor.u32 1.1754944e-38, %v1163_v58  ;;  %v1393_v38 = vmul.f32 %v1950_v2, %v2645_v43  ;;  %vm2691_vm14 = vcmp.eq.f32.partialorder %v1401_v61, 8.507059e+37  ;;  %vm919_vm0 = vmor %vm917_vm5, %vm918_vm12 }
  0xc4   :  { %v676_v12 = vadd.f32 %v1944_v28, %v675_v1  ;;  %v1154_v16 = vsub.f32 1.0, %v1153_v5  ;;  %v1404_v19 = vor.u32 1.1754944e-38, %v1403_v63  ;;  %1957 = vrcp.f32 %v2681_v22 }
  0xc5   :  { %v916_v4 = vadd.f32 %v1946_v46, %v915_v37  ;;  %vm1158_vm1 = vweird.f32 %v1948_v25  ;;  %v1394_v21 = vsub.f32 1.0, %v1393_v38  ;;  %v696_v23 = vand.u32 2147483647, %v2677_v47 }
  0xc6   :  { %v680_v6 = vsel %vm679_vm15, %v1944_v28, %v676_v12  ;;  %v1954_v24 = vpop.eup %1953  ;;  %v1155_v17 = vmul.f32 %v1948_v25, %v1154_v16  ;;  %v698_v30 = vand.u32 2147483648, %v2677_v47  ;;  %vm1398_vm2 = vweird.f32 %v1950_v2  ;;  %vm1159_vm3 = vmor %vm1157_vm9, %vm1158_vm1  ;;  %v238_v16 = vpop.f32.mrf.mxu0 }
  0xc7   :  { %v685_v26 = vsel %vm2662_vm6, %v684_v51, %v680_v6  ;;  %v920_v27 = vsel %vm919_vm0, %v1946_v46, %v916_v4  ;;  %v1956_v31 = vpop.eup %1955  ;;  %v1395_v20 = vmul.f32 %v1950_v2, %v1394_v21  ;;  %v936_v39 = vand.u32 2147483647, %v2681_v22  ;;  %vm1399_vm4 = vmor %vm1397_vm11, %vm1398_vm2 }
  0xc8   :  { %v1604_v59 = vmul.f32 %v685_v26, %v2453_v7  ;;  %v925_v9 = vsel %vm2667_vm8, %v924_v54, %v920_v27  ;;  %v1156_v15 = vadd.f32 %v1948_v25, %v1155_v17  ;;  %v688_v35 = vmul.f32 %v1956_v31, %v2677_v47  ;;  %v316_v54 = vpop.f32.mrf.mxu2 }
  0xc9   :  { %v1620_v32 = vmul.f32 %v925_v9, %v2460_v10  ;;  %v1396_v44 = vadd.f32 %v1950_v2, %v1395_v20  ;;  %v938_v7 = vand.u32 2147483648, %v2681_v22  ;;  %v2714_v42 = vadd.f32 1.0, %v1952_v11 }
  0xca   :  { %v1668_v40 = vpack.c.bf16 %v1604_v59, %v1604_v59  ;;  %v1958_v28 = vpop.eup %1957  ;;  %v1160_v46 = vsel %vm1159_vm3, %v1948_v25, %v1156_v15  ;;  %v689_v10 = vsub.f32 1.0, %v688_v35  ;;  %v2718_v49 = vadd.f32 1.0, %v1954_v24 }
  0xcb   :  { %v1684_v3 = vpack.c.bf16 %v1620_v32, %v1620_v32  ;;  %v1165_v36 = vsel %vm2686_vm13, %v1164_v13, %v1160_v46  ;;  %v1400_v50 = vsel %vm1399_vm4, %v1950_v2, %v1396_v44  ;;  %vm693_vm5 = vweird.f32 %v1956_v31 }
  0xcc   :  { %1733 = vst.msk [vmem:[%s3889_s3 + $0x8] sm:$0xf] %vm1730_vm7, %v1668_v40  ;;  %v928_v51 = vmul.f32 %v1958_v28, %v2681_v22  ;;  %v1636_v43 = vmul.f32 %v1165_v36, %v2516_v60  ;;  %v1405_v52 = vsel %vm2691_vm14, %v1404_v19, %v1400_v50  ;;  %v690_v53 = vmul.f32 %v1956_v31, %v689_v10  ;;  %v278_v19 = vpop.f32.mrf.mxu1 }
  0xcd   :  { %1749 = vst.msk [vmem:[%s3889_s3 + $0x48] sm:$0xf] %vm1730_vm7, %v1684_v3  ;;  %1959 = vrcp.f32 %v2714_v42  ;;  %v1652_v29 = vmul.f32 %v1405_v52, %v2591_v55  ;;  %vm692_vm6 = vweird.f32 %v2677_v47  ;;  %v2738_v58 = vadd.f32 %v2407_v34, %v276_v45 }
  0xce   :  { %v929_v57 = vsub.f32 1.0, %v928_v51  ;;  %v1700_v61 = vpack.c.bf16 %v1636_v43, %v1636_v43  ;;  %v691_v62 = vadd.f32 %v1956_v31, %v690_v53  ;;  %vm697_vm8 = vcmp.eq.f32.partialorder %v696_v23, 8.507059e+37  ;;  %vm694_vm9 = vmor %vm692_vm6, %vm693_vm5 }
  0xcf   :  { %1961 = vrcp.f32 %v2718_v49  ;;  %v1716_v60 = vpack.c.bf16 %v1652_v29, %v1652_v29  ;;  %v699_v63 = vor.u32 1.1754944e-38, %v698_v30  ;;  %vm933_vm10 = vweird.f32 %v1958_v28 }
  0xd0   :  { %v930_v25 = vmul.f32 %v1958_v28, %v929_v57  ;;  %1765 = vst.msk [vmem:[%s3889_s3 + $0x88] sm:$0xf] %vm1730_vm7, %v1700_v61  ;;  %v695_v55 = vsel %vm694_vm9, %v1956_v31, %v691_v62  ;;  %vm932_vm11 = vweird.f32 %v2681_v22  ;;  %vm2747_vm12 = vcmp.eq.f32.partialorder %v936_v39, 8.507059e+37 }
  0xd1   :  { %v939_v1 = vor.u32 1.1754944e-38, %v938_v7  ;;  %1781 = vst.msk [vmem:[%s3889_s3 + $0xc8] sm:$0xf] %vm1730_vm7, %v1716_v60  ;;  %v700_v2 = vsel %vm697_vm8, %v699_v63, %v695_v55  ;;  %vm1172_vm13 = vweird.f32 %v2714_v42  ;;  %1963 = vpow2.f32 %v2673_v56  ;;  %vm934_vm14 = vmor %vm932_vm11, %vm933_vm10 }
  0xd2   :  { %v931_v37 = vadd.f32 %v1958_v28, %v930_v25  ;;  %v1851_v5 = vmul.f32 -1.442695, %v2738_v58  ;;  %v1605_v11 = vmul.f32 %v700_v2, %v2598_v0  ;;  %v1176_v12 = vand.u32 2147483647, %v2714_v42 }
  0xd3   :  { %v1960_v22 = vpop.eup %1959  ;;  %v1178_v13 = vand.u32 2147483648, %v2714_v42  ;;  %v2763_v38 = vadd.f32 %v2407_v34, %v316_v54  ;;  %v1416_v56 = vand.u32 2147483647, %v2718_v49  ;;  %v2771_v24 = vadd.f32 %v2407_v34, %v356_v8  ;;  %v358_v54 = vpop.f32.mrf.mxu3 }
  0xd4   :  { %v935_v14 = vsel %vm934_vm14, %v1958_v28, %v931_v37  ;;  %v1168_v4 = vmul.f32 %v1960_v22, %v2714_v42  ;;  %1965 = vpow2.f32 %v1851_v5  ;;  %v1669_v21 = vpack.c.bf16 %v1605_v11, %v1605_v11 }
  0xd5   :  { %v1962_v6 = vpop.eup %1961  ;;  %v940_v0 = vsel %vm2747_vm12, %v939_v1, %v935_v14  ;;  %v1867_v23 = vmul.f32 -1.442695, %v2763_v38  ;;  %v1418_v30 = vand.u32 2147483648, %v2718_v49  ;;  %v1883_v31 = vmul.f32 -1.442695, %v2771_v24 }
  0xd6   :  { %v1621_v26 = vmul.f32 %v940_v0, %v2605_v48  ;;  %v1169_v27 = vsub.f32 1.0, %v1168_v4  ;;  %v1408_v17 = vmul.f32 %v1962_v6, %v2718_v49  ;;  %1734 = vst.msk [vmem:[%s3889_s3 + $0xc] sm:$0xf] %vm1730_vm7, %v1669_v21  ;;  %v2782_v59 = vadd.f32 %v2407_v34, %v238_v16  ;;  %v318_v48 = vpop.f32.mrf.mxu2 }
  0xd7   :  { %1967 = vpow2.f32 %v1867_v23  ;;  %v2785_v9 = vadd.f32 %v2407_v34, %v278_v19  ;;  %v1964_v20 = vpop.eup %1963  ;;  %vm1173_vm15 = vweird.f32 %v1960_v22  ;;  %vm1413_vm0 = vweird.f32 %v1962_v6 }
  0xd8   :  { %v1685_v32 = vpack.c.bf16 %v1621_v26, %v1621_v26  ;;  %v1170_v15 = vmul.f32 %v1960_v22, %v1169_v27  ;;  %v1409_v35 = vsub.f32 1.0, %v1408_v17  ;;  %v2787_v39 = vadd.f32 1.0, %v1964_v20  ;;  %vm1174_vm1 = vmor %vm1172_vm13, %vm1173_vm15 }
  0xd9   :  { %1969 = vpow2.f32 %v1883_v31  ;;  %v1836_v40 = vmul.f32 -1.442695, %v2782_v59  ;;  %v1852_v44 = vmul.f32 -1.442695, %v2785_v9  ;;  %v2796_v3 = vadd.f32 %v2407_v34, %v318_v48 }
  0xda   :  { %v1966_v7 = vpop.eup %1965  ;;  %1750 = vst.msk [vmem:[%s3889_s3 + $0x4c] sm:$0xf] %vm1730_vm7, %v1685_v32  ;;  %v1171_v45 = vadd.f32 %v1960_v22, %v1170_v15  ;;  %v1410_v28 = vmul.f32 %v1962_v6, %v1409_v35  ;;  %vm1177_vm2 = vcmp.eq.f32.partialorder %v1176_v12, 8.507059e+37  ;;  %v1179_v46 = vor.u32 1.1754944e-38, %v1178_v13 }
  0xdb   :  { %vm1412_vm3 = vweird.f32 %v2718_v49  ;;  %1971 = vrcp.f32 %v2787_v39  ;;  %v2802_v50 = vadd.f32 1.0, %v1966_v7  ;;  %vm1417_vm5 = vcmp.eq.f32.partialorder %v1416_v56, 8.507059e+37  ;;  %v361_v16 = vpop.f32.mrf.mxu3 }
  0xdc   :  { %v1175_v10 = vsel %vm1174_vm1, %v1960_v22, %v1171_v45  ;;  %v1411_v36 = vadd.f32 %v1962_v6, %v1410_v28  ;;  %1973 = vpow2.f32 %v1836_v40  ;;  %vm1414_vm4 = vmor %vm1412_vm3, %vm1413_vm0  ;;  %v1419_v52 = vor.u32 1.1754944e-38, %v1418_v30 }
  0xdd   :  { %v1968_v51 = vpop.eup %1967  ;;  %v1180_v43 = vsel %vm1177_vm2, %v1179_v46, %v1175_v10  ;;  %1975 = vpow2.f32 %v1852_v44  ;;  %v1868_v49 = vmul.f32 -1.442695, %v2796_v3  ;;  %v711_v61 = vand.u32 2147483647, %v2787_v39 }
  0xde   :  { %v1637_v42 = vmul.f32 %v1180_v43, %v2623_v18  ;;  %v1415_v53 = vsel %vm1414_vm4, %v1962_v6, %v1411_v36  ;;  %1977 = vrcp.f32 %v2802_v50  ;;  %v713_v62 = vand.u32 2147483648, %v2787_v39 }
  0xdf   :  { %v1970_v29 = vpop.eup %1969  ;;  %v1420_v57 = vsel %vm1417_vm5, %v1419_v52, %v1415_v53  ;;  %v2809_v60 = vadd.f32 1.0, %v1968_v51  ;;  %v951_v47 = vand.u32 2147483647, %v2802_v50  ;;  %v953_v1 = vand.u32 2147483648, %v2802_v50 }
  0xe0   :  { %v1701_v63 = vpack.c.bf16 %v1637_v42, %v1637_v42  ;;  %v1653_v25 = vmul.f32 %v1420_v57, %v2635_v33  ;;  %v2812_v55 = vadd.f32 1.0, %v1970_v29  ;;  %v2818_v2 = vadd.f32 %v2407_v34, %v358_v54 }
  0xe1   :  { %v1972_v18 = vpop.eup %1971  ;;  %1979 = vrcp.f32 %v2809_v60  ;;  %vm707_vm6 = vweird.f32 %v2787_v39  ;;  %vm2826_vm8 = vcmp.eq.f32.partialorder %v711_v61, 8.507059e+37  ;;  %v714_v11 = vor.u32 1.1754944e-38, %v713_v62  ;;  %v241_v62 = vpop.f32.mrf.mxu0 }
  0xe2   :  { %v1974_v37 = vpop.eup %1973  ;;  %1766 = vst.msk [vmem:[%s3889_s3 + $0x8c] sm:$0xf] %vm1730_vm7, %v1701_v63  ;;  %v1717_v5 = vpack.c.bf16 %v1653_v25, %v1653_v25  ;;  %v703_v33 = vmul.f32 %v1972_v18, %v2787_v39  ;;  %1981 = vpow2.f32 %v1868_v49  ;;  %v1191_v34 = vand.u32 2147483647, %v2809_v60 }
  0xe3   :  { %v1976_v8 = vpop.eup %1975  ;;  %1983 = vrcp.f32 %v2812_v55  ;;  %vm947_vm9 = vweird.f32 %v2802_v50  ;;  %v1193_v14 = vand.u32 2147483648, %v2809_v60  ;;  %v2838_v4 = vadd.f32 1.0, %v1974_v37 }
  0xe4   :  { %v1978_v12 = vpop.eup %1977  ;;  %1782 = vst.msk [vmem:[%s3889_s3 + $0xcc] sm:$0xf] %vm1730_vm7, %v1717_v5  ;;  %v704_v13 = vsub.f32 1.0, %v703_v33  ;;  %vm2841_vm10 = vcmp.eq.f32.partialorder %v951_v47, 8.507059e+37  ;;  %v954_v19 = vor.u32 1.1754944e-38, %v953_v1  ;;  %v1433_v6 = vand.u32 2147483648, %v2812_v55  ;;  %v321_v47 = vpop.f32.mrf.mxu2 }
  0xe5   :  { %v943_v56 = vmul.f32 %v1978_v12, %v2802_v50  ;;  %vm708_vm11 = vweird.f32 %v1972_v18  ;;  %v1431_v0 = vand.u32 2147483647, %v2812_v55  ;;  %1985 = vrcp.f32 %v2838_v4 }
  0xe6   :  { %v705_v21 = vmul.f32 %v1972_v18, %v704_v13  ;;  %vm1187_vm12 = vweird.f32 %v2809_v60  ;;  %v728_v27 = vand.u32 2147483648, %v2838_v4  ;;  %v2850_v17 = vadd.f32 1.0, %v1976_v8  ;;  %vm709_vm0 = vmor %vm707_vm6, %vm708_vm11 }
  0xe7   :  { %v1980_v23 = vpop.eup %1979  ;;  %v944_v26 = vsub.f32 1.0, %v943_v56  ;;  %vm948_vm13 = vweird.f32 %v1978_v12  ;;  %vm2853_vm14 = vcmp.eq.f32.partialorder %v1191_v34, 8.507059e+37  ;;  %v1194_v32 = vor.u32 1.1754944e-38, %v1193_v14 }
  0xe8   :  { %v1982_v30 = vpop.eup %1981  ;;  %v706_v31 = vadd.f32 %v1972_v18, %v705_v21  ;;  %v1183_v48 = vmul.f32 %v1980_v23, %v2809_v60  ;;  %vm1427_vm15 = vweird.f32 %v2812_v55  ;;  %v1434_v40 = vor.u32 1.1754944e-38, %v1433_v6  ;;  %vm949_vm4 = vmor %vm947_vm9, %vm948_vm13 }
  0xe9   :  { %v1984_v15 = vpop.eup %1983  ;;  %v945_v35 = vmul.f32 %v1978_v12, %v944_v26  ;;  %v726_v44 = vand.u32 2147483647, %v2838_v4  ;;  %1987 = vrcp.f32 %v2850_v17  ;;  %vm1188_vm1 = vweird.f32 %v1980_v23 }
  0xea   :  { %v710_v7 = vsel %vm709_vm0, %v1972_v18, %v706_v31  ;;  %v1184_v45 = vsub.f32 1.0, %v1183_v48  ;;  %v1423_v28 = vmul.f32 %v1984_v15, %v2812_v55  ;;  %vm2864_vm2 = vcmp.eq.f32.partialorder %v1431_v0, 8.507059e+37  ;;  %v281_v18 = vpop.f32.mrf.mxu1  ;;  %v2924_v31 = vld [vmem:[%s3888_s2] ss:$0 sm:$0xff] }
  0xeb   :  { %v715_v10 = vsel %vm2826_vm8, %v714_v11, %v710_v7  ;;  %v946_v39 = vadd.f32 %v1978_v12, %v945_v35  ;;  %vm722_vm3 = vweird.f32 %v2838_v4  ;;  %v729_v36 = vor.u32 1.1754944e-38, %v728_v27  ;;  %v1986_v43 = vpop.eup %1985  ;;  %vm1189_vm8 = vmor %vm1187_vm12, %vm1188_vm1 }
  0xec   :  { %v2871_v51 = vadd.f32 1.0, %v1982_v30  ;;  %v1606_v52 = vmul.f32 %v715_v10, %v2650_v41  ;;  %v1185_v42 = vmul.f32 %v1980_v23, %v1184_v45  ;;  %v1424_v53 = vsub.f32 1.0, %v1423_v28  ;;  %v323_v46 = vpop.f32.mrf.mxu2 }
  0xed   :  { %vm1428_vm5 = vweird.f32 %v1984_v15  ;;  %v950_v49 = vsel %vm949_vm4, %v1978_v12, %v946_v39  ;;  %v718_v54 = vmul.f32 %v1986_v43, %v2838_v4  ;;  %vm2878_vm6 = vcmp.eq.f32.partialorder %v726_v44, 8.507059e+37  ;;  %v243_v44 = vpop.f32.mrf.mxu0 }
  0xee   :  { %v966_v57 = vand.u32 2147483647, %v2850_v17  ;;  %v968_v61 = vand.u32 2147483648, %v2850_v17  ;;  %v1670_v41 = vpack.c.bf16 %v1606_v52, %v1606_v52  ;;  %v955_v50 = vsel %vm2841_vm10, %v954_v19, %v950_v49  ;;  %vm1429_vm11 = vmor %vm1427_vm15, %vm1428_vm5 }
  0xef   :  { %v1186_v63 = vadd.f32 %v1980_v23, %v1185_v42  ;;  %v1425_v25 = vmul.f32 %v1984_v15, %v1424_v53  ;;  %v1988_v1 = vpop.eup %1987  ;;  %v1622_v37 = vmul.f32 %v955_v50, %v2738_v58  ;;  %v719_v5 = vsub.f32 1.0, %v718_v54 }
  0xf0   :  { %vm962_vm9 = vweird.f32 %v2850_v17  ;;  %1989 = vrcp.f32 %v2871_v51  ;;  %1735 = vst.msk [vmem:[%s3889_s3 + $0x10] sm:$0xf] %vm1730_vm7, %v1670_v41  ;;  %vm723_vm10 = vweird.f32 %v1986_v43  ;;  %v958_v22 = vmul.f32 %v1988_v1, %v2850_v17  ;;  %v363_v41 = vpop.f32.mrf.mxu3 }
  0xf1   :  { %v1190_v33 = vsel %vm1189_vm8, %v1980_v23, %v1186_v63  ;;  %v1426_v8 = vadd.f32 %v1984_v15, %v1425_v25  ;;  %v1686_v58 = vpack.c.bf16 %v1622_v37, %v1622_v37  ;;  %v720_v11 = vmul.f32 %v1986_v43, %v719_v5 }
  0xf2   :  { %v1195_v60 = vsel %vm2853_vm14, %v1194_v32, %v1190_v33  ;;  %vm2902_vm12 = vcmp.eq.f32.partialorder %v966_v57, 8.507059e+37  ;;  %v959_v14 = vsub.f32 1.0, %v958_v22  ;;  %v969_v56 = vor.u32 1.1754944e-38, %v968_v61  ;;  %vm724_vm14 = vmor %vm722_vm3, %vm723_vm10  ;;  %v283_v28 = vpop.f32.mrf.mxu1 }
  0xf3   :  { %v1638_v12 = vmul.f32 %v1195_v60, %v2763_v38  ;;  %v1430_v13 = vsel %vm1429_vm11, %v1984_v15, %v1426_v8  ;;  %1751 = vst.msk [vmem:[%s3889_s3 + $0x50] sm:$0xf] %vm1730_vm7, %v1686_v58  ;;  %v721_v19 = vadd.f32 %v1986_v43, %v720_v11  ;;  %vm963_vm13 = vweird.f32 %v1988_v1 }
  0xf4   :  { %v1435_v55 = vsel %vm2864_vm2, %v1434_v40, %v1430_v13  ;;  %v1884_v6 = vmul.f32 -1.442695, %v2818_v2  ;;  %v960_v38 = vmul.f32 %v1988_v1, %v959_v14  ;;  %vm1202_vm15 = vweird.f32 %v2871_v51  ;;  %vm964_vm0 = vmor %vm962_vm9, %vm963_vm13 }
  0xf5   :  { %v1702_v21 = vpack.c.bf16 %v1638_v12, %v1638_v12  ;;  %v1654_v0 = vmul.f32 %v1435_v55, %v2771_v24  ;;  %v1206_v23 = vand.u32 2147483647, %v2871_v51  ;;  %v725_v27 = vsel %vm724_vm14, %v1986_v43, %v721_v19  ;;  %v246_v14 = vpop.f32.mrf.mxu0 }
  0xf6   :  { %v1990_v26 = vpop.eup %1989  ;;  %v1208_v30 = vand.u32 2147483648, %v2871_v51  ;;  %1991 = vpow2.f32 %v1884_v6  ;;  %v2927_v24 = vadd.f32 %v2924_v31, %v241_v62  ;;  %v730_v48 = vsel %vm2878_vm6, %v729_v36, %v725_v27 }
  0xf7   :  { %1767 = vst.msk [vmem:[%s3889_s3 + $0x90] sm:$0xf] %vm1730_vm7, %v1702_v21  ;;  %v1718_v4 = vpack.c.bf16 %v1654_v0, %v1654_v0  ;;  %v961_v20 = vadd.f32 %v1988_v1, %v960_v38  ;;  %v1198_v32 = vmul.f32 %v1990_v26, %v2871_v51  ;;  %v1607_v15 = vmul.f32 %v730_v48, %v2782_v59 }
  0xf8   :  { %vm1203_vm1 = vweird.f32 %v1990_v26  ;;  %v1837_v35 = vmul.f32 -1.442695, %v2927_v24  ;;  %v2942_v40 = vadd.f32 %v2924_v31, %v281_v18  ;;  %v2949_v59 = vadd.f32 %v2924_v31, %v321_v47 }
  0xf9   :  { %1783 = vst.msk [vmem:[%s3889_s3 + $0xd0] sm:$0xf] %vm1730_vm7, %v1718_v4  ;;  %v965_v7 = vsel %vm964_vm0, %v1988_v1, %v961_v20  ;;  %v1199_v45 = vsub.f32 1.0, %v1198_v32  ;;  %v2952_v17 = vadd.f32 %v2924_v31, %v361_v16  ;;  %v1671_v10 = vpack.c.bf16 %v1607_v15, %v1607_v15  ;;  %vm1204_vm2 = vmor %vm1202_vm15, %vm1203_vm1 }
  0xfa   :  { %v970_v39 = vsel %vm2902_vm12, %v969_v56, %v965_v7  ;;  %1993 = vpow2.f32 %v1837_v35  ;;  %v1853_v36 = vmul.f32 -1.442695, %v2942_v40  ;;  %v1869_v42 = vmul.f32 -1.442695, %v2949_v59  ;;  %v286_v27 = vpop.f32.mrf.mxu1 }
  0xfb   :  { %v1623_v43 = vmul.f32 %v970_v39, %v2785_v9  ;;  %v1200_v52 = vmul.f32 %v1990_v26, %v1199_v45  ;;  %v1885_v53 = vmul.f32 -1.442695, %v2952_v17  ;;  %1736 = vst.msk [vmem:[%s3889_s3 + $0x14] sm:$0xf] %vm1730_vm7, %v1671_v10  ;;  %v2965_v54 = vadd.f32 %v2924_v31, %v243_v44 }
  0xfc   :  { %v1992_v49 = vpop.eup %1991  ;;  %1995 = vpow2.f32 %v1853_v36  ;;  %v2968_v29 = vadd.f32 %v2924_v31, %v283_v28  ;;  %v2971_v9 = vadd.f32 %v2924_v31, %v323_v46  ;;  %v1209_v50 = vor.u32 1.1754944e-38, %v1208_v30 }
  0xfd   :  { %v1687_v57 = vpack.c.bf16 %v1623_v43, %v1623_v43  ;;  %v1201_v61 = vadd.f32 %v1990_v26, %v1200_v52  ;;  %v2973_v62 = vadd.f32 1.0, %v1992_v49  ;;  %1997 = vpow2.f32 %v1869_v42 }
  0xfe   :  { %1999 = vpow2.f32 %v1885_v53  ;;  %v1838_v63 = vmul.f32 -1.442695, %v2965_v54  ;;  %vm1207_vm3 = vcmp.eq.f32.partialorder %v1206_v23, 8.507059e+37  ;;  %v1854_v1 = vmul.f32 -1.442695, %v2968_v29 }
  0xff   :  { %1752 = vst.msk [vmem:[%s3889_s3 + $0x54] sm:$0xf] %vm1730_vm7, %v1687_v57  ;;  %v1205_v25 = vsel %vm1204_vm2, %v1990_v26, %v1201_v61  ;;  %2001 = vrcp.f32 %v2973_v62  ;;  %v2986_v51 = vadd.f32 %v2924_v31, %v363_v41  ;;  %v1870_v33 = vmul.f32 -1.442695, %v2971_v9 }
 0x100   :  { %v1994_v18 = vpop.eup %1993  ;;  %v1210_v47 = vsel %vm1207_vm3, %v1209_v50, %v1205_v25  ;;  %2003 = vpow2.f32 %v1838_v63  ;;  %v1446_v60 = vand.u32 2147483647, %v2973_v62  ;;  %v1448_v11 = vand.u32 2147483648, %v2973_v62 }
 0x101   :  { %v1639_v37 = vmul.f32 %v1210_v47, %v2796_v3  ;;  %v2989_v5 = vadd.f32 1.0, %v1994_v18  ;;  %v1886_v3 = vmul.f32 -1.442695, %v2986_v51  ;;  %vm1442_vm4 = vweird.f32 %v2973_v62 }
 0x102   :  { %v1996_v8 = vpop.eup %1995  ;;  %vm3010_vm5 = vcmp.eq.f32.partialorder %v1446_v60, 8.507059e+37  ;;  %v3017_v0 = vadd.f32 %v2924_v31, %v246_v14  ;;  %v1449_v26 = vor.u32 1.1754944e-38, %v1448_v11  ;;  %v3036_v39 = vadd.f32 %v2924_v31, %v286_v27 }
 0x103   :  { %v1998_v22 = vpop.eup %1997  ;;  %v1703_v58 = vpack.c.bf16 %v1639_v37, %v1639_v37  ;;  %2005 = vrcp.f32 %v2989_v5  ;;  %v2995_v12 = vadd.f32 1.0, %v1996_v8  ;;  %v741_v19 = vand.u32 2147483647, %v2989_v5 }
 0x104   :  { %v2000_v34 = vpop.eup %1999  ;;  %v2997_v13 = vadd.f32 1.0, %v1998_v22  ;;  %2007 = vpow2.f32 %v1854_v1  ;;  %v743_v21 = vand.u32 2147483648, %v2989_v5  ;;  %vm737_vm6 = vweird.f32 %v2989_v5 }
 0x105   :  { %v2002_v56 = vpop.eup %2001  ;;  %1768 = vst.msk [vmem:[%s3889_s3 + $0x94] sm:$0xf] %vm1730_vm7, %v1703_v58  ;;  %v3004_v16 = vadd.f32 1.0, %v2000_v34  ;;  %2009 = vpow2.f32 %v1870_v33  ;;  %v981_v4 = vand.u32 2147483647, %v2995_v12  ;;  %v983_v48 = vand.u32 2147483648, %v2995_v12 }
 0x106   :  { %v1438_v55 = vmul.f32 %v2002_v56, %v2973_v62  ;;  %2011 = vrcp.f32 %v2995_v12  ;;  %v2004_v38 = vpop.eup %2003  ;;  %v1223_v20 = vand.u32 2147483648, %v2997_v13  ;;  %vm1443_vm8 = vweird.f32 %v2002_v56 }
 0x107   :  { %2013 = vrcp.f32 %v2997_v13  ;;  %vm3025_vm9 = vcmp.eq.f32.partialorder %v741_v19, 8.507059e+37  ;;  %v1221_v7 = vand.u32 2147483647, %v2997_v13  ;;  %v744_v28 = vor.u32 1.1754944e-38, %v743_v21  ;;  %vm1444_vm12 = vmor %vm1442_vm4, %vm1443_vm8 }
 0x108   :  { %v1439_v23 = vsub.f32 1.0, %v1438_v55  ;;  %2015 = vpow2.f32 %v1886_v3  ;;  %v3030_v46 = vadd.f32 1.0, %v2004_v38  ;;  %v3033_v10 = vmul.f32 -1.442695, %v3017_v0 }
 0x109   :  { %v2006_v30 = vpop.eup %2005  ;;  %2017 = vrcp.f32 %v3004_v16  ;;  %vm977_vm10 = vweird.f32 %v2995_v12  ;;  %vm1217_vm11 = vweird.f32 %v2997_v13  ;;  %vm3044_vm14 = vcmp.eq.f32.partialorder %v981_v4, 8.507059e+37 }
 0x10a   :  { %v2008_v32 = vpop.eup %2007  ;;  %v1440_v15 = vmul.f32 %v2002_v56, %v1439_v23  ;;  %v733_v35 = vmul.f32 %v2006_v30, %v2989_v5  ;;  %vm738_vm13 = vweird.f32 %v2006_v30  ;;  %v984_v57 = vor.u32 1.1754944e-38, %v983_v48 }
 0x10b   :  { %v2010_v45 = vpop.eup %2009  ;;  %v1224_v61 = vor.u32 1.1754944e-38, %v1223_v20  ;;  %vm3051_vm15 = vcmp.eq.f32.partialorder %v1221_v7, 8.507059e+37  ;;  %vm1457_vm0 = vweird.f32 %v3004_v16  ;;  %v1461_v62 = vand.u32 2147483647, %v3004_v16  ;;  %vm739_vm1 = vmor %vm737_vm6, %vm738_vm13 }
 0x10c   :  { %v2012_v36 = vpop.eup %2011  ;;  %v1441_v43 = vadd.f32 %v2002_v56, %v1440_v15  ;;  %v734_v52 = vsub.f32 1.0, %v733_v35  ;;  %2019 = vrcp.f32 %v3030_v46  ;;  %v3060_v33 = vadd.f32 1.0, %v2008_v32 }
 0x10d   :  { %v2014_v42 = vpop.eup %2013  ;;  %v973_v53 = vmul.f32 %v2012_v36, %v2995_v12  ;;  %vm978_vm2 = vweird.f32 %v2012_v36  ;;  %v1463_v34 = vand.u32 2147483648, %v3004_v16  ;;  %v756_v6 = vand.u32 2147483647, %v3030_v46 }
 0x10e   :  { %v3048_v41 = vpop.eup %2015  ;;  %v1445_v50 = vsel %vm1444_vm12, %v2002_v56, %v1441_v43  ;;  %v735_v63 = vmul.f32 %v2006_v30, %v734_v52  ;;  %v1213_v25 = vmul.f32 %v2014_v42, %v2997_v13  ;;  %vm1218_vm3 = vweird.f32 %v2014_v42 }
 0x10f   :  { %v2018_v47 = vpop.eup %2017  ;;  %v1450_v1 = vsel %vm3010_vm5, %v1449_v26, %v1445_v50  ;;  %v974_v37 = vsub.f32 1.0, %v973_v53  ;;  %vm979_vm5 = vmor %vm977_vm10, %vm978_vm2  ;;  %2021 = vrcp.f32 %v3060_v33  ;;  %vm3082_vm8 = vcmp.eq.f32.partialorder %v1461_v62, 8.507059e+37  ;;  %v326_v50 = vpop.f32.mrf.mxu2 }
 0x110   :  { %v1655_v8 = vmul.f32 %v1450_v1, %v2818_v2  ;;  %v736_v22 = vadd.f32 %v2006_v30, %v735_v63  ;;  %v1214_v58 = vsub.f32 1.0, %v1213_v25  ;;  %v1453_v60 = vmul.f32 %v2018_v47, %v3004_v16  ;;  %vm1219_vm6 = vmor %vm1217_vm11, %vm1218_vm3 }
 0x111   :  { %v975_v11 = vmul.f32 %v2012_v36, %v974_v37  ;;  %vm1458_vm4 = vweird.f32 %v2018_v47  ;;  %v3086_v4 = vadd.f32 1.0, %v2010_v45  ;;  %v758_v35 = vand.u32 2147483648, %v3030_v46 }
 0x112   :  { %v1719_v3 = vpack.c.bf16 %v1655_v8, %v1655_v8  ;;  %v740_v14 = vsel %vm739_vm1, %v2006_v30, %v736_v22  ;;  %v1215_v56 = vmul.f32 %v2014_v42, %v1214_v58  ;;  %v1454_v55 = vsub.f32 1.0, %v1453_v60  ;;  %v2020_v23 = vpop.eup %2019  ;;  %v366_v22 = vpop.f32.mrf.mxu3 }
 0x113   :  { %v745_v2 = vsel %vm3025_vm9, %v744_v28, %v740_v14  ;;  %v976_v19 = vadd.f32 %v2012_v36, %v975_v11  ;;  %v1464_v30 = vor.u32 1.1754944e-38, %v1463_v34  ;;  %vm1459_vm9 = vmor %vm1457_vm0, %vm1458_vm4  ;;  %v748_v13 = vmul.f32 %v2020_v23, %v3030_v46  ;;  %v248_v58 = vpop.f32.mrf.mxu0 }
 0x114   :  { %1784 = vst.msk [vmem:[%s3889_s3 + $0xd4] sm:$0xf] %vm1730_vm7, %v1719_v3  ;;  %v1608_v5 = vmul.f32 %v745_v2, %v2927_v24  ;;  %v1216_v21 = vadd.f32 %v2014_v42, %v1215_v56  ;;  %v1455_v38 = vmul.f32 %v2018_v47, %v1454_v55  ;;  %vm752_vm10 = vweird.f32 %v3030_v46 }
 0x115   :  { %v980_v26 = vsel %vm979_vm5, %v2012_v36, %v976_v19  ;;  %vm3104_vm11 = vcmp.eq.f32.partialorder %v756_v6, 8.507059e+37  ;;  %v749_v28 = vsub.f32 1.0, %v748_v13  ;;  %2023 = vrcp.f32 %v3086_v4  ;;  %v2022_v36 = vpop.eup %2021 }
 0x116   :  { %v1672_v24 = vpack.c.bf16 %v1608_v5, %v1608_v5  ;;  %v985_v12 = vsel %vm3044_vm14, %v984_v57, %v980_v26  ;;  %v1220_v48 = vsel %vm1219_vm6, %v2014_v42, %v1216_v21  ;;  %v1456_v20 = vadd.f32 %v2018_v47, %v1455_v38  ;;  %v288_v38 = vpop.f32.mrf.mxu1 }
 0x117   :  { %v1624_v32 = vmul.f32 %v985_v12, %v2942_v40  ;;  %v1225_v15 = vsel %vm3051_vm15, %v1224_v61, %v1220_v48  ;;  %v998_v42 = vand.u32 2147483648, %v3060_v33  ;;  %v750_v53 = vmul.f32 %v2020_v23, %v749_v28 }
 0x118   :  { %1737 = vst.msk [vmem:[%s3889_s3 + $0x18] sm:$0xf] %vm1730_vm7, %v1672_v24  ;;  %v1640_v44 = vmul.f32 %v1225_v15, %v2949_v59  ;;  %v1460_v7 = vsel %vm1459_vm9, %v2018_v47, %v1456_v20  ;;  %v996_v59 = vand.u32 2147483647, %v3060_v33  ;;  %vm753_vm12 = vweird.f32 %v2020_v23 }
 0x119   :  { %v1688_v16 = vpack.c.bf16 %v1624_v32, %v1624_v32  ;;  %v1465_v45 = vsel %vm3082_vm8, %v1464_v30, %v1460_v7  ;;  %v759_v49 = vor.u32 1.1754944e-38, %v758_v35  ;;  %v988_v57 = vmul.f32 %v2022_v36, %v3060_v33  ;;  %vm754_vm14 = vmor %vm752_vm10, %vm753_vm12 }
 0x11a   :  { %v1704_v43 = vpack.c.bf16 %v1640_v44, %v1640_v44  ;;  %v1656_v52 = vmul.f32 %v1465_v45, %v2952_v17  ;;  %vm992_vm13 = vweird.f32 %v3060_v33  ;;  %v3125_v61 = vadd.f32 1.0, %v3048_v41  ;;  %v368_v41 = vpop.f32.mrf.mxu3 }
 0x11b   :  { %1753 = vst.msk [vmem:[%s3889_s3 + $0x58] sm:$0xf] %vm1730_vm7, %v1688_v16  ;;  %2025 = vpow2.f32 %v3033_v10  ;;  %v751_v63 = vadd.f32 %v2020_v23, %v750_v53  ;;  %v989_v25 = vsub.f32 1.0, %v988_v57  ;;  %v1236_v18 = vand.u32 2147483647, %v3086_v4  ;;  %v2024_v47 = vpop.eup %2023 }
 0x11c   :  { %1769 = vst.msk [vmem:[%s3889_s3 + $0x98] sm:$0xf] %vm1730_vm7, %v1704_v43  ;;  %v1720_v17 = vpack.c.bf16 %v1656_v52, %v1656_v52  ;;  %v1855_v62 = vmul.f32 -1.442695, %v3036_v39  ;;  %vm993_vm15 = vweird.f32 %v2022_v36  ;;  %vm3136_vm0 = vcmp.eq.f32.partialorder %v996_v59, 8.507059e+37 }
 0x11d   :  { %v999_v10 = vor.u32 1.1754944e-38, %v998_v42  ;;  %2027 = vrcp.f32 %v3125_v61  ;;  %v755_v1 = vsel %vm754_vm14, %v2020_v23, %v751_v63  ;;  %v990_v37 = vmul.f32 %v2022_v36, %v989_v25  ;;  %vm994_vm3 = vmor %vm992_vm13, %vm993_vm15 }
 0x11e   :  { %1785 = vst.msk [vmem:[%s3889_s3 + $0xd8] sm:$0xf] %vm1730_vm7, %v1720_v17  ;;  %2029 = vpow2.f32 %v1855_v62  ;;  %v3142_v8 = vadd.f32 %v2924_v31, %v326_v50  ;;  %v760_v46 = vsel %vm3104_vm11, %v759_v49, %v755_v1  ;;  %v1228_v60 = vmul.f32 %v2024_v47, %v3086_v4  ;;  %v328_v17 = vpop.f32.mrf.mxu2 }
 0x11f   :  { %vm1232_vm1 = vweird.f32 %v3086_v4  ;;  %v1238_v11 = vand.u32 2147483648, %v3086_v4  ;;  %v1609_v34 = vmul.f32 %v760_v46, %v2965_v54  ;;  %v991_v3 = vadd.f32 %v2022_v36, %v990_v37 }
 0x120   :  { %vm3150_vm2 = vcmp.eq.f32.partialorder %v1236_v18, 8.507059e+37  ;;  %v1871_v56 = vmul.f32 -1.442695, %v3142_v8  ;;  %v1229_v2 = vsub.f32 1.0, %v1228_v60  ;;  %vm1233_vm4 = vweird.f32 %v2024_v47 }
 0x121   :  { %v2026_v55 = vpop.eup %2025  ;;  %v3159_v19 = vadd.f32 %v2924_v31, %v366_v22  ;;  %v3162_v6 = vadd.f32 %v2924_v31, %v248_v58  ;;  %v1673_v54 = vpack.c.bf16 %v1609_v34, %v1609_v34  ;;  %v995_v5 = vsel %vm994_vm3, %v2022_v36, %v991_v3  ;;  %vm1234_vm5 = vmor %vm1232_vm1, %vm1233_vm4 }
 0x122   :  { %v3164_v21 = vadd.f32 1.0, %v2026_v55  ;;  %2031 = vpow2.f32 %v1871_v56  ;;  %v1000_v26 = vsel %vm3136_vm0, %v999_v10, %v995_v5  ;;  %v1230_v33 = vmul.f32 %v2024_v47, %v1229_v2 }
 0x123   :  { %v2028_v23 = vpop.eup %2027  ;;  %v1887_v27 = vmul.f32 -1.442695, %v3159_v19  ;;  %v1840_v30 = vmul.f32 -1.442695, %v3162_v6  ;;  %1738 = vst.msk [vmem:[%s3889_s3 + $0x1c] sm:$0xf] %vm1730_vm7, %v1673_v54  ;;  %v1625_v12 = vmul.f32 %v1000_v26, %v2968_v29  ;;  %v3180_v35 = vadd.f32 %v2924_v31, %v288_v38 }
 0x124   :  { %v2030_v24 = vpop.eup %2029  ;;  %v1239_v48 = vor.u32 1.1754944e-38, %v1238_v11  ;;  %v1468_v20 = vmul.f32 %v2028_v23, %v3125_v61  ;;  %2033 = vrcp.f32 %v3164_v21  ;;  %v1231_v32 = vadd.f32 %v2024_v47, %v1230_v33 }
 0x125   :  { %v1476_v15 = vand.u32 2147483647, %v3125_v61  ;;  %v1478_v13 = vand.u32 2147483648, %v3125_v61  ;;  %v1689_v44 = vpack.c.bf16 %v1625_v12, %v1625_v12  ;;  %v3185_v29 = vadd.f32 1.0, %v2030_v24  ;;  %v251_v12 = vpop.f32.mrf.mxu0 }
 0x126   :  { %v1469_v7 = vsub.f32 1.0, %v1468_v20  ;;  %2035 = vpow2.f32 %v1887_v27  ;;  %v1235_v40 = vsel %vm1234_vm5, %v2024_v47, %v1231_v32  ;;  %v771_v16 = vand.u32 2147483647, %v3164_v21 }
 0x127   :  { %v773_v45 = vand.u32 2147483648, %v3164_v21  ;;  %2037 = vpow2.f32 %v1840_v30  ;;  %1754 = vst.msk [vmem:[%s3889_s3 + $0x5c] sm:$0xf] %vm1730_vm7, %v1689_v44  ;;  %v1240_v4 = vsel %vm3150_vm2, %v1239_v48, %v1235_v40  ;;  %vm1473_vm6 = vweird.f32 %v2028_v23 }
 0x128   :  { %v2032_v28 = vpop.eup %2031  ;;  %v1470_v36 = vmul.f32 %v2028_v23, %v1469_v7  ;;  %2039 = vrcp.f32 %v3185_v29  ;;  %v1641_v43 = vmul.f32 %v1240_v4, %v2971_v9  ;;  %vm1472_vm8 = vweird.f32 %v3125_v61 }
 0x129   :  { %vm3198_vm9 = vcmp.eq.f32.partialorder %v1476_v15, 8.507059e+37  ;;  %v3202_v59 = vadd.f32 1.0, %v2032_v28  ;;  %v1479_v49 = vor.u32 1.1754944e-38, %v1478_v13  ;;  %vm767_vm10 = vweird.f32 %v3164_v21  ;;  %vm1474_vm11 = vmor %vm1472_vm8, %vm1473_vm6 }
 0x12a   :  { %v2034_v42 = vpop.eup %2033  ;;  %v1471_v53 = vadd.f32 %v2028_v23, %v1470_v36  ;;  %v1856_v57 = vmul.f32 -1.442695, %v3180_v35  ;;  %v1705_v50 = vpack.c.bf16 %v1641_v43, %v1641_v43  ;;  %vm3207_vm12 = vcmp.eq.f32.partialorder %v771_v16, 8.507059e+37 }
 0x12b   :  { %v763_v9 = vmul.f32 %v2034_v42, %v3164_v21  ;;  %v774_v63 = vor.u32 1.1754944e-38, %v773_v45  ;;  %vm1007_vm13 = vweird.f32 %v3185_v29  ;;  %v1011_v62 = vand.u32 2147483647, %v3185_v29 }
 0x12c   :  { %v2036_v25 = vpop.eup %2035  ;;  %v1475_v18 = vsel %vm1474_vm11, %v2028_v23, %v1471_v53  ;;  %2041 = vrcp.f32 %v3202_v59  ;;  %1770 = vst.msk [vmem:[%s3889_s3 + $0x9c] sm:$0xf] %vm1730_vm7, %v1705_v50  ;;  %v1013_v37 = vand.u32 2147483648, %v3185_v29  ;;  %v3222_v22 = vadd.f32 %v2924_v31, %v328_v17 }
 0x12d   :  { %v2038_v10 = vpop.eup %2037  ;;  %v1480_v47 = vsel %vm3198_vm9, %v1479_v49, %v1475_v18  ;;  %v764_v1 = vsub.f32 1.0, %v763_v9  ;;  %v3225_v60 = vadd.f32 1.0, %v2036_v25  ;;  %2043 = vpow2.f32 %v1856_v57  ;;  %v291_v18 = vpop.f32.mrf.mxu1 }
 0x12e   :  { %v2040_v58 = vpop.eup %2039  ;;  %v1657_v46 = vmul.f32 %v1480_v47, %v2986_v51  ;;  %v3227_v11 = vadd.f32 1.0, %v2038_v10  ;;  %vm768_vm14 = vweird.f32 %v2034_v42  ;;  %v3231_v14 = vadd.f32 %v2924_v31, %v368_v41  ;;  %v331_v47 = vpop.f32.mrf.mxu2 }
 0x12f   :  { %v765_v34 = vmul.f32 %v2034_v42, %v764_v1  ;;  %v1003_v3 = vmul.f32 %v2040_v58, %v3185_v29  ;;  %v1251_v55 = vand.u32 2147483647, %v3202_v59  ;;  %v1253_v2 = vand.u32 2147483648, %v3202_v59  ;;  %vm769_vm0 = vmor %vm767_vm10, %vm768_vm14  ;;  %v371_v1 = vpop.f32.mrf.mxu3 }
 0x130   :  { %v1721_v56 = vpack.c.bf16 %v1657_v46, %v1657_v46  ;;  %2045 = vrcp.f32 %v3225_v60  ;;  %vm3236_vm15 = vcmp.eq.f32.partialorder %v1011_v62, 8.507059e+37  ;;  %v1014_v38 = vor.u32 1.1754944e-38, %v1013_v37 }
 0x131   :  { %v766_v51 = vadd.f32 %v2034_v42, %v765_v34  ;;  %v1004_v54 = vsub.f32 1.0, %v1003_v3  ;;  %vm1008_vm1 = vweird.f32 %v2040_v58  ;;  %vm1247_vm2 = vweird.f32 %v3202_v59 }
 0x132   :  { %v2042_v23 = vpop.eup %2041  ;;  %1786 = vst.msk [vmem:[%s3889_s3 + $0xdc] sm:$0xf] %vm1730_vm7, %v1721_v56  ;;  %v1493_v26 = vand.u32 2147483648, %v3225_v60  ;;  %2047 = vrcp.f32 %v3227_v11  ;;  %v1491_v24 = vand.u32 2147483647, %v3225_v60  ;;  %vm3253_vm3 = vcmp.eq.f32.partialorder %v1251_v55, 8.507059e+37  ;;  %vm1009_vm5 = vmor %vm1007_vm13, %vm1008_vm1  ;;  %v253_v56 = vpop.f32.mrf.mxu0 }
 0x133   :  { %v770_v33 = vsel %vm769_vm0, %v2034_v42, %v766_v51  ;;  %v1005_v27 = vmul.f32 %v2040_v58, %v1004_v54  ;;  %v1243_v30 = vmul.f32 %v2042_v23, %v3202_v59  ;;  %v2044_v48 = vpop.eup %2043  ;;  %v1254_v32 = vor.u32 1.1754944e-38, %v1253_v2 }
 0x134   :  { %v775_v20 = vsel %vm3207_vm12, %v774_v63, %v770_v33  ;;  %v786_v15 = vand.u32 2147483647, %v3227_v11  ;;  %vm1487_vm4 = vweird.f32 %v3225_v60  ;;  %v788_v40 = vand.u32 2147483648, %v3227_v11 }
 0x135   :  { %v1610_v13 = vmul.f32 %v775_v20, %v3017_v0  ;;  %v1006_v44 = vadd.f32 %v2040_v58, %v1005_v27  ;;  %v1244_v7 = vsub.f32 1.0, %v1243_v30  ;;  %vm1248_vm6 = vweird.f32 %v2042_v23 }
 0x136   :  { %v2046_v16 = vpop.eup %2045  ;;  %v1494_v45 = vor.u32 1.1754944e-38, %v1493_v26  ;;  %v3264_v28 = vadd.f32 1.0, %v2044_v48  ;;  %v1872_v4 = vmul.f32 -1.442695, %v3222_v22  ;;  %vm3268_vm8 = vcmp.eq.f32.partialorder %v1491_v24, 8.507059e+37  ;;  %vm1249_vm10 = vmor %vm1247_vm2, %vm1248_vm6 }
 0x137   :  { %v1674_v36 = vpack.c.bf16 %v1610_v13, %v1610_v13  ;;  %v1010_v43 = vsel %vm1009_vm5, %v2040_v58, %v1006_v44  ;;  %v1245_v0 = vmul.f32 %v2042_v23, %v1244_v7  ;;  %v1483_v52 = vmul.f32 %v2046_v16, %v3225_v60 }
 0x138   :  { %vm782_vm9 = vweird.f32 %v3227_v11  ;;  %v2048_v53 = vpop.eup %2047  ;;  %v1015_v29 = vsel %vm3236_vm15, %v1014_v38, %v1010_v43  ;;  %2049 = vrcp.f32 %v3264_v28  ;;  %v1888_v49 = vmul.f32 -1.442695, %v3231_v14 }
 0x139   :  { %v3278_v57 = vadd.f32 %v2924_v31, %v251_v12  ;;  %1739 = vst.msk [vmem:[%s3889_s3 + $0x20] sm:$0xf] %vm1730_vm7, %v1674_v36  ;;  %v1626_v17 = vmul.f32 %v1015_v29, %v3036_v39  ;;  %v1246_v50 = vadd.f32 %v2042_v23, %v1245_v0  ;;  %v1484_v9 = vsub.f32 1.0, %v1483_v52 }
 0x13a   :  { %v778_v61 = vmul.f32 %v2048_v53, %v3227_v11  ;;  %vm1488_vm11 = vweird.f32 %v2046_v16  ;;  %vm3289_vm12 = vcmp.eq.f32.partialorder %v786_v15, 8.507059e+37  ;;  %v789_v25 = vor.u32 1.1754944e-38, %v788_v40 }
 0x13b   :  { %2051 = vpow2.f32 %v1872_v4  ;;  %v1690_v62 = vpack.c.bf16 %v1626_v17, %v1626_v17  ;;  %v1250_v41 = vsel %vm1249_vm10, %v2042_v23, %v1246_v50  ;;  %v1485_v10 = vmul.f32 %v2046_v16, %v1484_v9  ;;  %vm1489_vm14 = vmor %vm1487_vm4, %vm1488_vm11 }
 0x13c   :  { %v779_v39 = vsub.f32 1.0, %v778_v61  ;;  %v1255_v37 = vsel %vm3253_vm3, %v1254_v32, %v1250_v41  ;;  %vm783_vm13 = vweird.f32 %v2048_v53  ;;  %v1026_v59 = vand.u32 2147483647, %v3264_v28 }
 0x13d   :  { %2053 = vpow2.f32 %v1888_v49  ;;  %1755 = vst.msk [vmem:[%s3889_s3 + $0x60] sm:$0xf] %vm1730_vm7, %v1690_v62  ;;  %v1642_v58 = vmul.f32 %v1255_v37, %v3142_v8  ;;  %v1486_v46 = vadd.f32 %v2046_v16, %v1485_v10  ;;  %v1841_v3 = vmul.f32 -1.442695, %v3278_v57  ;;  %vm784_vm15 = vmor %vm782_vm9, %vm783_vm13 }
 0x13e   :  { %v780_v34 = vmul.f32 %v2048_v53, %v779_v39  ;;  %v2050_v55 = vpop.eup %2049  ;;  %v1028_v2 = vand.u32 2147483648, %v3264_v28  ;;  %v3307_v51 = vadd.f32 %v2924_v31, %v291_v18  ;;  %v3310_v54 = vadd.f32 %v2924_v31, %v331_v47 }
 0x13f   :  { %v3313_v8 = vadd.f32 %v2924_v31, %v371_v1  ;;  %v1706_v5 = vpack.c.bf16 %v1642_v58, %v1642_v58  ;;  %v1490_v38 = vsel %vm1489_vm14, %v2046_v16, %v1486_v46  ;;  %v1018_v26 = vmul.f32 %v2050_v55, %v3264_v28 }
 0x140   :  { %v781_v23 = vadd.f32 %v2048_v53, %v780_v34  ;;  %v1495_v60 = vsel %vm3268_vm8, %v1494_v45, %v1490_v38  ;;  %2055 = vpow2.f32 %v1841_v3  ;;  %v1857_v27 = vmul.f32 -1.442695, %v3307_v51 }
 0x141   :  { %v2052_v33 = vpop.eup %2051  ;;  %v3323_v30 = vadd.f32 %v2924_v31, %v253_v56  ;;  %1771 = vst.msk [vmem:[%s3889_s3 + $0xa0] sm:$0xf] %vm1730_vm7, %v1706_v5  ;;  %v1658_v24 = vmul.f32 %v1495_v60, %v3159_v19  ;;  %v1019_v48 = vsub.f32 1.0, %v1018_v26  ;;  %vm1023_vm0 = vweird.f32 %v2050_v55 }
 0x142   :  { %v785_v12 = vsel %vm784_vm15, %v2048_v53, %v781_v23  ;;  %v3330_v20 = vadd.f32 1.0, %v2052_v33  ;;  %2057 = vpow2.f32 %v1857_v27  ;;  %v1873_v32 = vmul.f32 -1.442695, %v3310_v54  ;;  %v293_v53 = vpop.f32.mrf.mxu1 }
 0x143   :  { %v2054_v21 = vpop.eup %2053  ;;  %v790_v11 = vsel %vm3289_vm12, %v789_v25, %v785_v12  ;;  %v1722_v15 = vpack.c.bf16 %v1658_v24, %v1658_v24  ;;  %v1020_v44 = vmul.f32 %v2050_v55, %v1019_v48  ;;  %v1889_v19 = vmul.f32 -1.442695, %v3313_v8  ;;  %v333_v25 = vpop.f32.mrf.mxu2 }
 0x144   :  { %v1611_v13 = vmul.f32 %v790_v11, %v3162_v6  ;;  %2059 = vrcp.f32 %v3330_v20  ;;  %v3337_v7 = vadd.f32 1.0, %v2054_v21  ;;  %vm1022_vm1 = vweird.f32 %v3264_v28 }
 0x145   :  { %1787 = vst.msk [vmem:[%s3889_s3 + $0xe0] sm:$0xf] %vm1730_vm7, %v1722_v15  ;;  %v1021_v16 = vadd.f32 %v2050_v55, %v1020_v44  ;;  %2061 = vpow2.f32 %v1873_v32  ;;  %vm1024_vm2 = vmor %vm1022_vm1, %vm1023_vm0  ;;  %v1029_v6 = vor.u32 1.1754944e-38, %v1028_v2  ;;  %v1266_v4 = vand.u32 2147483647, %v3330_v20 }
 0x146   :  { %v1675_v40 = vpack.c.bf16 %v1611_v13, %v1611_v13  ;;  %v2056_v45 = vpop.eup %2055  ;;  %v1268_v36 = vand.u32 2147483648, %v3330_v20  ;;  %2063 = vrcp.f32 %v3337_v7  ;;  %vm1027_vm3 = vcmp.eq.f32.partialorder %v1026_v59, 8.507059e+37 }
 0x147   :  { %v1025_v43 = vsel %vm1024_vm2, %v2050_v55, %v1021_v16  ;;  %v3353_v0 = vadd.f32 1.0, %v2056_v45  ;;  %v1842_v28 = vmul.f32 -1.442695, %v3323_v30  ;;  %2065 = vpow2.f32 %v1889_v19 }
 0x148   :  { %1740 = vst.msk [vmem:[%s3889_s3 + $0x24] sm:$0xf] %vm1730_vm7, %v1675_v40  ;;  %v2058_v52 = vpop.eup %2057  ;;  %v1030_v42 = vsel %vm1027_vm3, %v1029_v6, %v1025_v43  ;;  %vm1262_vm4 = vweird.f32 %v3330_v20  ;;  %v1506_v17 = vand.u32 2147483647, %v3337_v7  ;;  %vm3361_vm5 = vcmp.eq.f32.partialorder %v1266_v4, 8.507059e+37 }
 0x149   :  { %v1627_v49 = vmul.f32 %v1030_v42, %v3180_v35  ;;  %2067 = vrcp.f32 %v3353_v0  ;;  %v1269_v61 = vor.u32 1.1754944e-38, %v1268_v36  ;;  %v1508_v63 = vand.u32 2147483648, %v3337_v7 }
 0x14a   :  { %v2060_v29 = vpop.eup %2059  ;;  %vm1502_vm6 = vweird.f32 %v3337_v7  ;;  %v3367_v35 = vadd.f32 1.0, %v2058_v52  ;;  %2069 = vpow2.f32 %v1842_v28  ;;  %v3370_v41 = vadd.f32 %v2924_v31, %v293_v53 }
 0x14b   :  { %v1258_v50 = vmul.f32 %v2060_v29, %v3330_v20  ;;  %v2062_v18 = vpop.eup %2061  ;;  %v1691_v62 = vpack.c.bf16 %v1627_v49, %v1627_v49  ;;  %v801_v47 = vand.u32 2147483647, %v3353_v0  ;;  %v803_v1 = vand.u32 2147483648, %v3353_v0  ;;  %v373_v49 = vpop.f32.mrf.mxu3 }
 0x14c   :  { %v2064_v10 = vpop.eup %2063  ;;  %v3374_v37 = vadd.f32 1.0, %v2062_v18  ;;  %vm3381_vm8 = vcmp.eq.f32.partialorder %v1506_v17, 8.507059e+37  ;;  %2071 = vrcp.f32 %v3367_v35  ;;  %v3387_v46 = vadd.f32 %v2924_v31, %v333_v25 }
 0x14d   :  { %v1259_v39 = vsub.f32 1.0, %v1258_v50  ;;  %1756 = vst.msk [vmem:[%s3889_s3 + $0x64] sm:$0xf] %vm1730_vm7, %v1691_v62  ;;  %v1498_v59 = vmul.f32 %v2064_v10, %v3337_v7  ;;  %v2066_v34 = vpop.eup %2065  ;;  %vm1263_vm9 = vweird.f32 %v2060_v29  ;;  %v1509_v56 = vor.u32 1.1754944e-38, %v1508_v63 }
 0x14e   :  { %vm797_vm10 = vweird.f32 %v3353_v0  ;;  %vm1503_vm11 = vweird.f32 %v2064_v10  ;;  %2073 = vrcp.f32 %v3374_v37  ;;  %v1858_v5 = vmul.f32 -1.442695, %v3370_v41  ;;  %vm1264_vm14 = vmor %vm1262_vm4, %vm1263_vm9 }
 0x14f   :  { %v1260_v3 = vmul.f32 %v2060_v29, %v1259_v39  ;;  %v2068_v55 = vpop.eup %2067  ;;  %v1499_v2 = vsub.f32 1.0, %v1498_v59  ;;  %vm3393_vm12 = vcmp.eq.f32.partialorder %v801_v47, 8.507059e+37  ;;  %v804_v31 = vor.u32 1.1754944e-38, %v803_v1  ;;  %vm1504_vm0 = vmor %vm1502_vm6, %vm1503_vm11 }
 0x150   :  { %v793_v23 = vmul.f32 %v2068_v55, %v3353_v0  ;;  %vm1037_vm13 = vweird.f32 %v3367_v35  ;;  %v2070_v33 = vpop.eup %2069  ;;  %v1041_v27 = vand.u32 2147483647, %v3367_v35  ;;  %v1043_v24 = vand.u32 2147483648, %v3367_v35 }
 0x151   :  { %v1261_v38 = vadd.f32 %v2060_v29, %v1260_v3  ;;  %v1500_v60 = vmul.f32 %v2064_v10, %v1499_v2  ;;  %v1281_v12 = vand.u32 2147483647, %v3374_v37  ;;  %vm798_vm15 = vweird.f32 %v2068_v55 }
 0x152   :  { %v794_v21 = vsub.f32 1.0, %v793_v23  ;;  %v3403_v11 = vadd.f32 1.0, %v2066_v34  ;;  %v2072_v32 = vpop.eup %2071  ;;  %v1283_v20 = vand.u32 2147483648, %v3374_v37  ;;  %2075 = vpow2.f32 %v1858_v5  ;;  %vm799_vm3 = vmor %vm797_vm10, %vm798_vm15 }
 0x153   :  { %v1265_v48 = vsel %vm1264_vm14, %v2060_v29, %v1261_v38  ;;  %v1501_v13 = vadd.f32 %v2064_v10, %v1500_v60  ;;  %v1033_v40 = vmul.f32 %v2072_v32, %v3367_v35  ;;  %v3413_v16 = vadd.f32 1.0, %v2070_v33 }
 0x154   :  { %v1270_v15 = vsel %vm3361_vm5, %v1269_v61, %v1265_v48  ;;  %v795_v19 = vmul.f32 %v2068_v55, %v794_v21  ;;  %v2074_v45 = vpop.eup %2073  ;;  %vm3415_vm1 = vcmp.eq.f32.partialorder %v1041_v27, 8.507059e+37  ;;  %v1044_v36 = vor.u32 1.1754944e-38, %v1043_v24  ;;  %v336_v48 = vpop.f32.mrf.mxu2 }
 0x155   :  { %v1643_v44 = vmul.f32 %v1270_v15, %v3222_v22  ;;  %v1505_v6 = vsel %vm1504_vm0, %v2064_v10, %v1501_v13  ;;  %vm1277_vm2 = vweird.f32 %v3374_v37  ;;  %2077 = vrcp.f32 %v3403_v11  ;;  %v376_v13 = vpop.f32.mrf.mxu3 }
 0x156   :  { %v1510_v7 = vsel %vm3381_vm8, %v1509_v56, %v1505_v6  ;;  %v796_v43 = vadd.f32 %v2068_v55, %v795_v19  ;;  %v1034_v28 = vsub.f32 1.0, %v1033_v40  ;;  %vm1038_vm4 = vweird.f32 %v2072_v32  ;;  %v256_v56 = vpop.f32.mrf.mxu0  ;;  %v3489_v19 = vld [vmem:[%s3888_s2] ss:$0 sm:$0xff] }
 0x157   :  { %v1707_v22 = vpack.c.bf16 %v1643_v44, %v1643_v44  ;;  %v1659_v52 = vmul.f32 %v1510_v7, %v3231_v14  ;;  %v1273_v42 = vmul.f32 %v2074_v45, %v3374_v37  ;;  %vm3428_vm5 = vcmp.eq.f32.partialorder %v1281_v12, 8.507059e+37  ;;  %vm1039_vm9 = vmor %vm1037_vm13, %vm1038_vm4  ;;  %v296_v37 = vpop.f32.mrf.mxu1 }
 0x158   :  { %v1284_v29 = vor.u32 1.1754944e-38, %v1283_v20  ;;  %v800_v17 = vsel %vm799_vm3, %v2068_v55, %v796_v43  ;;  %v1035_v14 = vmul.f32 %v2072_v32, %v1034_v28  ;;  %v1521_v50 = vand.u32 2147483647, %v3403_v11  ;;  %v2076_v0 = vpop.eup %2075 }
 0x159   :  { %1772 = vst.msk [vmem:[%s3889_s3 + $0xa4] sm:$0xf] %vm1730_vm7, %v1707_v22  ;;  %2079 = vrcp.f32 %v3413_v16  ;;  %v1723_v9 = vpack.c.bf16 %v1659_v52, %v1659_v52  ;;  %v805_v61 = vsel %vm3393_vm12, %v804_v31, %v800_v17  ;;  %v1274_v63 = vsub.f32 1.0, %v1273_v42 }
 0x15a   :  { %v1523_v25 = vand.u32 2147483648, %v3403_v11  ;;  %v1612_v18 = vmul.f32 %v805_v61, %v3278_v57  ;;  %v1036_v62 = vadd.f32 %v2072_v32, %v1035_v14  ;;  %vm1278_vm6 = vweird.f32 %v2074_v45 }
 0x15b   :  { %vm1517_vm8 = vweird.f32 %v3403_v11  ;;  %v2078_v10 = vpop.eup %2077  ;;  %1788 = vst.msk [vmem:[%s3889_s3 + $0xe4] sm:$0xf] %vm1730_vm7, %v1723_v9  ;;  %v1275_v39 = vmul.f32 %v2074_v45, %v1274_v63  ;;  %v816_v47 = vand.u32 2147483647, %v3413_v16  ;;  %v818_v1 = vand.u32 2147483648, %v3413_v16  ;;  %vm1279_vm12 = vmor %vm1277_vm2, %vm1278_vm6 }
 0x15c   :  { %v3452_v57 = vadd.f32 1.0, %v2076_v0  ;;  %v1676_v59 = vpack.c.bf16 %v1612_v18, %v1612_v18  ;;  %v1040_v58 = vsel %vm1039_vm9, %v2072_v32, %v1036_v62  ;;  %v1513_v34 = vmul.f32 %v2078_v10, %v3403_v11 }
 0x15d   :  { %vm3455_vm10 = vcmp.eq.f32.partialorder %v1521_v50, 8.507059e+37  ;;  %v1045_v35 = vsel %vm3415_vm1, %v1044_v36, %v1040_v58  ;;  %v1276_v55 = vadd.f32 %v2074_v45, %v1275_v39  ;;  %v1524_v2 = vor.u32 1.1754944e-38, %v1523_v25  ;;  %v338_v58 = vpop.f32.mrf.mxu2  ;;  %v378_v60 = vpop.f32.mrf.mxu3 }
 0x15e   :  { %vm812_vm11 = vweird.f32 %v3413_v16  ;;  %v1874_v5 = vmul.f32 -1.442695, %v3387_v46  ;;  %1741 = vst.msk [vmem:[%s3889_s3 + $0x28] sm:$0xf] %vm1730_vm7, %v1676_v59  ;;  %v1628_v23 = vmul.f32 %v1045_v35, %v3307_v51  ;;  %v1514_v26 = vsub.f32 1.0, %v1513_v34  ;;  %v258_v14 = vpop.f32.mrf.mxu0 }
 0x15f   :  { %v2080_v38 = vpop.eup %2079  ;;  %vm1518_vm13 = vweird.f32 %v2078_v10  ;;  %2081 = vrcp.f32 %v3452_v57  ;;  %v1280_v31 = vsel %vm1279_vm12, %v2074_v45, %v1276_v55  ;;  %vm3473_vm14 = vcmp.eq.f32.partialorder %v816_v47, 8.507059e+37  ;;  %v298_v47 = vpop.f32.mrf.mxu1 }
 0x160   :  { %v808_v33 = vmul.f32 %v2080_v38, %v3413_v16  ;;  %v819_v27 = vor.u32 1.1754944e-38, %v818_v1  ;;  %v1692_v24 = vpack.c.bf16 %v1628_v23, %v1628_v23  ;;  %v1285_v51 = vsel %vm3428_vm5, %v1284_v29, %v1280_v31  ;;  %vm1519_vm0 = vmor %vm1517_vm8, %vm1518_vm13 }
 0x161   :  { %v1515_v12 = vmul.f32 %v2078_v10, %v1514_v26  ;;  %vm813_vm15 = vweird.f32 %v2080_v38  ;;  %v1644_v21 = vmul.f32 %v1285_v51, %v3310_v54  ;;  %v1056_v15 = vand.u32 2147483647, %v3452_v57 }
 0x162   :  { %v809_v32 = vsub.f32 1.0, %v808_v33  ;;  %2083 = vpow2.f32 %v1874_v5  ;;  %1757 = vst.msk [vmem:[%s3889_s3 + $0x68] sm:$0xf] %vm1730_vm7, %v1692_v24  ;;  %v1058_v44 = vand.u32 2147483648, %v3452_v57  ;;  %v3492_v54 = vadd.f32 %v3489_v19, %v373_v49  ;;  %vm814_vm2 = vmor %vm812_vm11, %vm813_vm15 }
 0x163   :  { %v1516_v20 = vadd.f32 %v2078_v10, %v1515_v12  ;;  %v3495_v40 = vadd.f32 %v3489_v19, %v256_v56  ;;  %v1708_v45 = vpack.c.bf16 %v1644_v21, %v1644_v21  ;;  %v3501_v4 = vadd.f32 %v3489_v19, %v296_v37 }
 0x164   :  { %v810_v6 = vmul.f32 %v2080_v38, %v809_v32  ;;  %v3504_v36 = vadd.f32 %v3489_v19, %v336_v48  ;;  %v1890_v43 = vmul.f32 -1.442695, %v3492_v54  ;;  %v3509_v52 = vadd.f32 %v3489_v19, %v376_v13 }
 0x165   :  { %v2082_v22 = vpop.eup %2081  ;;  %v1520_v7 = vsel %vm1519_vm0, %v2078_v10, %v1516_v20  ;;  %v1843_v28 = vmul.f32 -1.442695, %v3495_v40  ;;  %1773 = vst.msk [vmem:[%s3889_s3 + $0xa8] sm:$0xf] %vm1730_vm7, %v1708_v45  ;;  %v1859_v49 = vmul.f32 -1.442695, %v3501_v4  ;;  %v3531_v62 = vadd.f32 %v3489_v19, %v258_v14 }
 0x166   :  { %v1525_v11 = vsel %vm3455_vm10, %v1524_v2, %v1520_v7  ;;  %v811_v42 = vadd.f32 %v2080_v38, %v810_v6  ;;  %v1048_v53 = vmul.f32 %v2082_v22, %v3452_v57  ;;  %vm1053_vm1 = vweird.f32 %v2082_v22 }
 0x167   :  { %v1660_v29 = vmul.f32 %v1525_v11, %v3313_v8  ;;  %2085 = vpow2.f32 %v1890_v43  ;;  %v1875_v17 = vmul.f32 -1.442695, %v3504_v36  ;;  %v1891_v61 = vmul.f32 -1.442695, %v3509_v52 }
 0x168   :  { %v2084_v50 = vpop.eup %2083  ;;  %v815_v0 = vsel %vm814_vm2, %v2080_v38, %v811_v42  ;;  %v1049_v9 = vsub.f32 1.0, %v1048_v53  ;;  %2087 = vpow2.f32 %v1843_v28  ;;  %vm1052_vm3 = vweird.f32 %v3452_v57  ;;  %v261_v42 = vpop.f32.mrf.mxu0 }
 0x169   :  { %v1724_v63 = vpack.c.bf16 %v1660_v29, %v1660_v29  ;;  %v820_v8 = vsel %vm3473_vm14, %v819_v27, %v815_v0  ;;  %v3527_v25 = vadd.f32 1.0, %v2084_v50  ;;  %2089 = vpow2.f32 %v1859_v49  ;;  %vm1054_vm4 = vmor %vm1052_vm3, %vm1053_vm1 }
 0x16a   :  { %v1613_v16 = vmul.f32 %v820_v8, %v3323_v30  ;;  %v1050_v18 = vmul.f32 %v2082_v22, %v1049_v9  ;;  %2091 = vpow2.f32 %v1875_v17  ;;  %vm1057_vm5 = vcmp.eq.f32.partialorder %v1056_v15, 8.507059e+37  ;;  %v341_v9 = vpop.f32.mrf.mxu2 }
 0x16b   :  { %1789 = vst.msk [vmem:[%s3889_s3 + $0xe8] sm:$0xf] %vm1730_vm7, %v1724_v63  ;;  %2093 = vrcp.f32 %v3527_v25  ;;  %v1059_v30 = vor.u32 1.1754944e-38, %v1058_v44  ;;  %v1296_v59 = vand.u32 2147483647, %v3527_v25  ;;  %v1298_v56 = vand.u32 2147483648, %v3527_v25 }
 0x16c   :  { %v1677_v10 = vpack.c.bf16 %v1613_v16, %v1613_v16  ;;  %v1051_v39 = vadd.f32 %v2082_v22, %v1050_v18  ;;  %2095 = vpow2.f32 %v1891_v61  ;;  %v1844_v35 = vmul.f32 -1.442695, %v3531_v62 }
 0x16d   :  { %v2086_v1 = vpop.eup %2085  ;;  %v3552_v38 = vadd.f32 %v3489_v19, %v298_v47  ;;  %v3557_v31 = vadd.f32 %v3489_v19, %v338_v58  ;;  %vm1292_vm6 = vweird.f32 %v3527_v25  ;;  %vm3562_vm8 = vcmp.eq.f32.partialorder %v1296_v59, 8.507059e+37 }
 0x16e   :  { %v2088_v34 = vpop.eup %2087  ;;  %1742 = vst.msk [vmem:[%s3889_s3 + $0x2c] sm:$0xf] %vm1730_vm7, %v1677_v10  ;;  %v1055_v3 = vsel %vm1054_vm4, %v2082_v22, %v1051_v39  ;;  %v3546_v57 = vadd.f32 1.0, %v2086_v1  ;;  %v3581_v44 = vadd.f32 %v3489_v19, %v378_v60 }
 0x16f   :  { %v2090_v55 = vpop.eup %2089  ;;  %v1060_v2 = vsel %vm1057_vm5, %v1059_v30, %v1055_v3  ;;  %v3549_v5 = vadd.f32 1.0, %v2088_v34  ;;  %v1860_v32 = vmul.f32 -1.442695, %v3552_v38  ;;  %v3578_v20 = vmul.f32 -1.442695, %v3557_v31 }
 0x170   :  { %v2092_v23 = vpop.eup %2091  ;;  %v1629_v26 = vmul.f32 %v1060_v2, %v3370_v41  ;;  %2097 = vrcp.f32 %v3546_v57  ;;  %v1299_v41 = vor.u32 1.1754944e-38, %v1298_v56  ;;  %v1536_v37 = vand.u32 2147483647, %v3546_v57 }
 0x171   :  { %v2094_v33 = vpop.eup %2093  ;;  %2099 = vrcp.f32 %v3549_v5  ;;  %v1538_v48 = vand.u32 2147483648, %v3546_v57  ;;  %v3568_v21 = vadd.f32 1.0, %v2090_v55  ;;  %v3575_v13 = vadd.f32 1.0, %v2092_v23 }
 0x172   :  { %v2096_v27 = vpop.eup %2095  ;;  %v1693_v24 = vpack.c.bf16 %v1629_v26, %v1629_v26  ;;  %v1288_v51 = vmul.f32 %v2094_v33, %v3527_v25  ;;  %2101 = vpow2.f32 %v1844_v35  ;;  %vm1532_vm9 = vweird.f32 %v3546_v57 }
 0x173   :  { %v831_v45 = vand.u32 2147483647, %v3549_v5  ;;  %v833_v6 = vand.u32 2147483648, %v3549_v5  ;;  %2103 = vrcp.f32 %v3568_v21  ;;  %v3587_v22 = vadd.f32 1.0, %v2096_v27 }
 0x174   :  { %1758 = vst.msk [vmem:[%s3889_s3 + $0x6c] sm:$0xf] %vm1730_vm7, %v1693_v24  ;;  %v1289_v15 = vsub.f32 1.0, %v1288_v51  ;;  %vm1293_vm10 = vweird.f32 %v2094_v33  ;;  %vm827_vm11 = vweird.f32 %v3549_v5  ;;  %2105 = vrcp.f32 %v3575_v13 }
 0x175   :  { %vm3592_vm12 = vcmp.eq.f32.partialorder %v1536_v37, 8.507059e+37  ;;  %v1539_v53 = vor.u32 1.1754944e-38, %v1538_v48  ;;  %2107 = vpow2.f32 %v1860_v32  ;;  %v1071_v14 = vand.u32 2147483647, %v3568_v21  ;;  %vm1294_vm13 = vmor %vm1292_vm6, %vm1293_vm10 }
 0x176   :  { %v2098_v7 = vpop.eup %2097  ;;  %v1290_v43 = vmul.f32 %v2094_v33, %v1289_v15  ;;  %v1073_v50 = vand.u32 2147483648, %v3568_v21  ;;  %vm3601_vm14 = vcmp.eq.f32.partialorder %v831_v45, 8.507059e+37  ;;  %v834_v61 = vor.u32 1.1754944e-38, %v833_v6 }
 0x177   :  { %v2100_v28 = vpop.eup %2099  ;;  %v1528_v11 = vmul.f32 %v2098_v7, %v3546_v57  ;;  %2109 = vrcp.f32 %v3587_v22  ;;  %vm1533_vm15 = vweird.f32 %v2098_v7  ;;  %vm1067_vm0 = vweird.f32 %v3568_v21 }
 0x178   :  { %v2102_v29 = vpop.eup %2101  ;;  %v1291_v49 = vadd.f32 %v2094_v33, %v1290_v43  ;;  %v823_v17 = vmul.f32 %v2100_v28, %v3549_v5  ;;  %vm828_vm1 = vweird.f32 %v2100_v28  ;;  %vm1307_vm2 = vweird.f32 %v3575_v13  ;;  %vm1534_vm4 = vmor %vm1532_vm9, %vm1533_vm15 }
 0x179   :  { %v1529_v0 = vsub.f32 1.0, %v1528_v11  ;;  %v2104_v16 = vpop.eup %2103  ;;  %v1311_v25 = vand.u32 2147483647, %v3575_v13  ;;  %vm3613_vm3 = vcmp.eq.f32.partialorder %v1071_v14, 8.507059e+37  ;;  %v1074_v58 = vor.u32 1.1754944e-38, %v1073_v50  ;;  %vm829_vm6 = vmor %vm827_vm11, %vm828_vm1 }
 0x17a   :  { %v1295_v63 = vsel %vm1294_vm13, %v2094_v33, %v1291_v49  ;;  %v824_v8 = vsub.f32 1.0, %v823_v17  ;;  %v2106_v39 = vpop.eup %2105  ;;  %v1063_v30 = vmul.f32 %v2104_v16, %v3568_v21  ;;  %v1313_v35 = vand.u32 2147483648, %v3575_v13 }
 0x17b   :  { %v1300_v18 = vsel %vm3562_vm8, %v1299_v41, %v1295_v63  ;;  %v1530_v10 = vmul.f32 %v2098_v7, %v1529_v0  ;;  %v2108_v34 = vpop.eup %2107  ;;  %v1303_v56 = vmul.f32 %v2106_v39, %v3575_v13  ;;  %v1551_v55 = vand.u32 2147483647, %v3587_v22  ;;  %v301_v0 = vpop.f32.mrf.mxu1 }
 0x17c   :  { %v1645_v47 = vmul.f32 %v1300_v18, %v3387_v46  ;;  %v825_v1 = vmul.f32 %v2100_v28, %v824_v8  ;;  %v1064_v23 = vsub.f32 1.0, %v1063_v30  ;;  %vm1068_vm5 = vweird.f32 %v2104_v16 }
 0x17d   :  { %v1531_v3 = vadd.f32 %v2098_v7, %v1530_v10  ;;  %v2110_v26 = vpop.eup %2109  ;;  %v1304_v60 = vsub.f32 1.0, %v1303_v56  ;;  %vm1308_vm8 = vweird.f32 %v2106_v39  ;;  %v3626_v27 = vadd.f32 1.0, %v2102_v29  ;;  %vm1069_vm9 = vmor %vm1067_vm0, %vm1068_vm5 }
 0x17e   :  { %v1709_v2 = vpack.c.bf16 %v1645_v47, %v1645_v47  ;;  %v826_v46 = vadd.f32 %v2100_v28, %v825_v1  ;;  %v1065_v51 = vmul.f32 %v2104_v16, %v1064_v23  ;;  %v1543_v12 = vmul.f32 %v2110_v26, %v3587_v22  ;;  %vm1309_vm10 = vmor %vm1307_vm2, %vm1308_vm8 }
 0x17f   :  { %v1535_v33 = vsel %vm1534_vm4, %v2098_v7, %v1531_v3  ;;  %v1305_v37 = vmul.f32 %v2106_v39, %v1304_v60  ;;  %v3638_v48 = vadd.f32 1.0, %v2108_v34  ;;  %2111 = vrcp.f32 %v3626_v27 }
 0x180   :  { %1774 = vst.msk [vmem:[%s3889_s3 + $0xac] sm:$0xf] %vm1730_vm7, %v1709_v2  ;;  %v1540_v57 = vsel %vm3592_vm12, %v1539_v53, %v1535_v33  ;;  %v830_v24 = vsel %vm829_vm6, %v2100_v28, %v826_v46  ;;  %v1066_v15 = vadd.f32 %v2104_v16, %v1065_v51  ;;  %v1544_v45 = vsub.f32 1.0, %v1543_v12 }
 0x181   :  { %v1661_v41 = vmul.f32 %v1540_v57, %v3492_v54  ;;  %v835_v5 = vsel %vm3601_vm14, %v834_v61, %v830_v24  ;;  %v1306_v7 = vadd.f32 %v2106_v39, %v1305_v37  ;;  %v1314_v43 = vor.u32 1.1754944e-38, %v1313_v35 }
 0x182   :  { %v1614_v32 = vmul.f32 %v835_v5, %v3495_v40  ;;  %v1553_v54 = vand.u32 2147483648, %v3587_v22  ;;  %v1070_v11 = vsel %vm1069_vm9, %v2104_v16, %v1066_v15  ;;  %v1545_v40 = vmul.f32 %v2110_v26, %v1544_v45 }
 0x183   :  { %v1725_v6 = vpack.c.bf16 %v1661_v41, %v1661_v41  ;;  %vm1548_vm11 = vweird.f32 %v2110_v26  ;;  %v1075_v21 = vsel %vm3613_vm3, %v1074_v58, %v1070_v11  ;;  %v1310_v53 = vsel %vm1309_vm10, %v2106_v39, %v1306_v7  ;;  %v303_v37 = vpop.f32.mrf.mxu1 }
 0x184   :  { %v1678_v28 = vpack.c.bf16 %v1614_v32, %v1614_v32  ;;  %vm1312_vm12 = vcmp.eq.f32.partialorder %v1311_v25, 8.507059e+37  ;;  %2113 = vrcp.f32 %v3638_v48  ;;  %v1630_v13 = vmul.f32 %v1075_v21, %v3501_v4  ;;  %v343_v32 = vpop.f32.mrf.mxu2 }
 0x185   :  { %1790 = vst.msk [vmem:[%s3889_s3 + $0xec] sm:$0xf] %vm1730_vm7, %v1725_v6  ;;  %v1315_v29 = vsel %vm1312_vm12, %v1314_v43, %v1310_v53  ;;  %v1546_v49 = vadd.f32 %v2110_v26, %v1545_v40  ;;  %vm1547_vm13 = vweird.f32 %v3587_v22  ;;  %vm1552_vm15 = vcmp.eq.f32.partialorder %v1551_v55, 8.507059e+37  ;;  %v2112_v61 = vpop.eup %2111 }
 0x186   :  { %1743 = vst.msk [vmem:[%s3889_s3 + $0x30] sm:$0xf] %vm1730_vm7, %v1678_v28  ;;  %v1646_v17 = vmul.f32 %v1315_v29, %v3504_v36  ;;  %vm1549_vm14 = vmor %vm1547_vm13, %vm1548_vm11  ;;  %v1554_v14 = vor.u32 1.1754944e-38, %v1553_v54  ;;  %v846_v50 = vand.u32 2147483647, %v3626_v27  ;;  %v1694_v63 = vpack.c.bf16 %v1630_v13, %v1630_v13 }
 0x187   :  { %v1550_v8 = vsel %vm1549_vm14, %v2110_v26, %v1546_v49  ;;  %2115 = vpow2.f32 %v3578_v20  ;;  %v1892_v4 = vmul.f32 -1.442695, %v3581_v44  ;;  %v838_v22 = vmul.f32 %v2112_v61, %v3626_v27  ;;  %v263_v26 = vpop.f32.mrf.mxu0 }
 0x188   :  { %v1710_v16 = vpack.c.bf16 %v1646_v17, %v1646_v17  ;;  %v1555_v18 = vsel %vm1552_vm15, %v1554_v14, %v1550_v8  ;;  %1759 = vst.msk [vmem:[%s3889_s3 + $0x70] sm:$0xf] %vm1730_vm7, %v1694_v63  ;;  %vm842_vm0 = vweird.f32 %v3626_v27  ;;  %v3678_v25 = vadd.f32 %v3489_v19, %v261_v42 }
 0x189   :  { %v1662_v36 = vmul.f32 %v1555_v18, %v3509_v52  ;;  %2117 = vpow2.f32 %v1892_v4  ;;  %v839_v20 = vsub.f32 1.0, %v838_v22  ;;  %v3681_v39 = vadd.f32 %v3489_v19, %v301_v0  ;;  %v381_v52 = vpop.f32.mrf.mxu3 }
 0x18a   :  { %v2114_v10 = vpop.eup %2113  ;;  %1775 = vst.msk [vmem:[%s3889_s3 + $0xb0] sm:$0xf] %vm1730_vm7, %v1710_v16  ;;  %v3684_v47 = vadd.f32 %v3489_v19, %v341_v9  ;;  %vm3686_vm1 = vcmp.eq.f32.partialorder %v846_v50, 8.507059e+37  ;;  %v848_v59 = vand.u32 2147483648, %v3626_v27  ;;  %vm843_vm2 = vweird.f32 %v2112_v61 }
 0x18b   :  { %v1726_v1 = vpack.c.bf16 %v1662_v36, %v1662_v36  ;;  %v1078_v58 = vmul.f32 %v2114_v10, %v3638_v48  ;;  %v840_v34 = vmul.f32 %v2112_v61, %v839_v20  ;;  %v1845_v3 = vmul.f32 -1.442695, %v3678_v25  ;;  %vm844_vm3 = vmor %vm842_vm0, %vm843_vm2 }
 0x18c   :  { %v1861_v56 = vmul.f32 -1.442695, %v3681_v39  ;;  %v1086_v2 = vand.u32 2147483647, %v3638_v48  ;;  %v1088_v46 = vand.u32 2147483648, %v3638_v48  ;;  %v3701_v23 = vadd.f32 %v3489_v19, %v381_v52 }
 0x18d   :  { %v2116_v35 = vpop.eup %2115  ;;  %1791 = vst.msk [vmem:[%s3889_s3 + $0xf0] sm:$0xf] %vm1730_vm7, %v1726_v1  ;;  %v1079_v55 = vsub.f32 1.0, %v1078_v58  ;;  %v841_v33 = vadd.f32 %v2112_v61, %v840_v34  ;;  %2119 = vpow2.f32 %v1845_v3  ;;  %v1877_v57 = vmul.f32 -1.442695, %v3684_v47 }
 0x18e   :  { %v3703_v60 = vadd.f32 1.0, %v2116_v35  ;;  %v849_v51 = vor.u32 1.1754944e-38, %v848_v59  ;;  %vm1083_vm4 = vweird.f32 %v2114_v10  ;;  %2121 = vpow2.f32 %v1861_v56 }
 0x18f   :  { %v2118_v24 = vpop.eup %2117  ;;  %v1080_v12 = vmul.f32 %v2114_v10, %v1079_v55  ;;  %v845_v41 = vsel %vm844_vm3, %v2112_v61, %v841_v33  ;;  %vm1082_vm5 = vweird.f32 %v3638_v48  ;;  %v3712_v5 = vadd.f32 %v3489_v19, %v263_v26 }
 0x190   :  { %2123 = vrcp.f32 %v3703_v60  ;;  %v850_v15 = vsel %vm3686_vm1, %v849_v51, %v845_v41  ;;  %v3716_v27 = vadd.f32 1.0, %v2118_v24  ;;  %v1893_v6 = vmul.f32 -1.442695, %v3701_v23  ;;  %vm1084_vm6 = vmor %vm1082_vm5, %vm1083_vm4 }
 0x191   :  { %v1081_v45 = vadd.f32 %v2114_v10, %v1080_v12  ;;  %v1615_v7 = vmul.f32 %v850_v15, %v3531_v62  ;;  %vm1087_vm8 = vcmp.eq.f32.partialorder %v1086_v2, 8.507059e+37  ;;  %v1089_v48 = vor.u32 1.1754944e-38, %v1088_v46  ;;  %v383_v61 = vpop.f32.mrf.mxu3 }
 0x192   :  { %2125 = vpow2.f32 %v1877_v57  ;;  %v3722_v54 = vadd.f32 %v3489_v19, %v303_v37  ;;  %v3725_v28 = vadd.f32 %v3489_v19, %v343_v32  ;;  %v1326_v21 = vand.u32 2147483647, %v3703_v60 }
 0x193   :  { %v1085_v43 = vsel %vm1084_vm6, %v2114_v10, %v1081_v45  ;;  %2127 = vrcp.f32 %v3716_v27  ;;  %v2120_v11 = vpop.eup %2119  ;;  %v1679_v40 = vpack.c.bf16 %v1615_v7, %v1615_v7  ;;  %v1846_v62 = vmul.f32 -1.442695, %v3712_v5 }
 0x194   :  { %v1090_v42 = vsel %vm1087_vm8, %v1089_v48, %v1085_v43  ;;  %v2122_v53 = vpop.eup %2121  ;;  %v1328_v29 = vand.u32 2147483648, %v3703_v60  ;;  %v3731_v49 = vadd.f32 1.0, %v2120_v11  ;;  %2129 = vpow2.f32 %v1893_v6 }
 0x195   :  { %v1631_v13 = vmul.f32 %v1090_v42, %v3552_v38  ;;  %1744 = vst.msk [vmem:[%s3889_s3 + $0x34] sm:$0xf] %vm1730_vm7, %v1679_v40  ;;  %v1566_v14 = vand.u32 2147483647, %v3716_v27  ;;  %v3738_v50 = vadd.f32 1.0, %v2122_v53  ;;  %vm1322_vm9 = vweird.f32 %v3703_v60 }
 0x196   :  { %v2124_v17 = vpop.eup %2123  ;;  %2131 = vrcp.f32 %v3731_v49  ;;  %v1862_v38 = vmul.f32 -1.442695, %v3722_v54  ;;  %vm3744_vm10 = vcmp.eq.f32.partialorder %v1326_v21, 8.507059e+37  ;;  %v1568_v4 = vand.u32 2147483648, %v3716_v27 }
 0x197   :  { %v1695_v0 = vpack.c.bf16 %v1631_v13, %v1631_v13  ;;  %v1318_v9 = vmul.f32 %v2124_v17, %v3703_v60  ;;  %2133 = vrcp.f32 %v3738_v50  ;;  %v1329_v22 = vor.u32 1.1754944e-38, %v1328_v29 }
 0x198   :  { %v2126_v63 = vpop.eup %2125  ;;  %vm1562_vm11 = vweird.f32 %v3716_v27  ;;  %v3756_v36 = vmul.f32 -1.442695, %v3725_v28  ;;  %vm3759_vm12 = vcmp.eq.f32.partialorder %v1566_v14, 8.507059e+37  ;;  %2135 = vpow2.f32 %v1846_v62 }
 0x199   :  { %v2128_v16 = vpop.eup %2127  ;;  %1760 = vst.msk [vmem:[%s3889_s3 + $0x74] sm:$0xf] %vm1730_vm7, %v1695_v0  ;;  %v1319_v18 = vsub.f32 1.0, %v1318_v9  ;;  %v3764_v52 = vadd.f32 %v3489_v19, %v383_v61  ;;  %vm1323_vm13 = vweird.f32 %v2124_v17  ;;  %v861_v59 = vand.u32 2147483647, %v3731_v49 }
 0x19a   :  { %v1558_v10 = vmul.f32 %v2128_v16, %v3716_v27  ;;  %v2130_v1 = vpop.eup %2129  ;;  %v3767_v58 = vadd.f32 1.0, %v2126_v63  ;;  %v1569_v3 = vor.u32 1.1754944e-38, %v1568_v4  ;;  %vm857_vm14 = vweird.f32 %v3731_v49  ;;  %vm1324_vm0 = vmor %vm1322_vm9, %vm1323_vm13 }
 0x19b   :  { %v1320_v30 = vmul.f32 %v2124_v17, %v1319_v18  ;;  %v863_v56 = vand.u32 2147483648, %v3731_v49  ;;  %vm1097_vm15 = vweird.f32 %v3738_v50  ;;  %v3773_v19 = vadd.f32 1.0, %v2130_v1 }
 0x19c   :  { %v1559_v34 = vsub.f32 1.0, %v1558_v10  ;;  %v2132_v35 = vpop.eup %2131  ;;  %2137 = vrcp.f32 %v3767_v58  ;;  %vm1563_vm1 = vweird.f32 %v2128_v16  ;;  %v1101_v33 = vand.u32 2147483647, %v3738_v50 }
 0x19d   :  { %v1321_v55 = vadd.f32 %v2124_v17, %v1320_v30  ;;  %v2134_v2 = vpop.eup %2133  ;;  %v853_v26 = vmul.f32 %v2132_v35, %v3731_v49  ;;  %vm3779_vm2 = vcmp.eq.f32.partialorder %v861_v59, 8.507059e+37  ;;  %v1103_v12 = vand.u32 2147483648, %v3738_v50  ;;  %vm1564_vm3 = vmor %vm1562_vm11, %vm1563_vm1 }
 0x19e   :  { %v1560_v46 = vmul.f32 %v2128_v16, %v1559_v34  ;;  %v1093_v51 = vmul.f32 %v2134_v2, %v3738_v50  ;;  %v2136_v41 = vpop.eup %2135  ;;  %2139 = vpow2.f32 %v1862_v38  ;;  %v864_v45 = vor.u32 1.1754944e-38, %v863_v56 }
 0x19f   :  { %v1325_v57 = vsel %vm1324_vm0, %v2124_v17, %v1321_v55  ;;  %v854_v32 = vsub.f32 1.0, %v853_v26  ;;  %2141 = vrcp.f32 %v3773_v19  ;;  %vm858_vm4 = vweird.f32 %v2132_v35 }
 0x1a0   :  { %v1330_v60 = vsel %vm3744_vm10, %v1329_v22, %v1325_v57  ;;  %v1561_v37 = vadd.f32 %v2128_v16, %v1560_v46  ;;  %v1094_v6 = vsub.f32 1.0, %v1093_v51  ;;  %vm1098_vm5 = vweird.f32 %v2134_v2  ;;  %vm859_vm8 = vmor %vm857_vm14, %vm858_vm4 }
 0x1a1   :  { %v1647_v15 = vmul.f32 %v1330_v60, %v3557_v31  ;;  %v855_v48 = vmul.f32 %v2132_v35, %v854_v32  ;;  %v3793_v21 = vadd.f32 1.0, %v2136_v41  ;;  %vm3796_vm6 = vcmp.eq.f32.partialorder %v1101_v33, 8.507059e+37  ;;  %vm1099_vm9 = vmor %vm1097_vm15, %vm1098_vm5 }
 0x1a2   :  { %v1565_v7 = vsel %vm1564_vm3, %v2128_v16, %v1561_v37  ;;  %v2138_v43 = vpop.eup %2137  ;;  %v1095_v42 = vmul.f32 %v2134_v2, %v1094_v6  ;;  %v1104_v29 = vor.u32 1.1754944e-38, %v1103_v12  ;;  %v1341_v17 = vand.u32 2147483647, %v3767_v58 }
 0x1a3   :  { %v1711_v11 = vpack.c.bf16 %v1647_v15, %v1647_v15  ;;  %v1570_v40 = vsel %vm3759_vm12, %v1569_v3, %v1565_v7  ;;  %v856_v27 = vadd.f32 %v2132_v35, %v855_v48  ;;  %v1333_v53 = vmul.f32 %v2138_v43, %v3767_v58 }
 0x1a4   :  { %v1663_v31 = vmul.f32 %v1570_v40, %v3581_v44  ;;  %v1096_v13 = vadd.f32 %v2134_v2, %v1095_v42  ;;  %2143 = vrcp.f32 %v3793_v21  ;;  %v2140_v44 = vpop.eup %2139  ;;  %v1894_v38 = vmul.f32 -1.442695, %v3764_v52 }
 0x1a5   :  { %1776 = vst.msk [vmem:[%s3889_s3 + $0xb4] sm:$0xf] %vm1730_vm7, %v1711_v11  ;;  %v860_v0 = vsel %vm859_vm8, %v2132_v35, %v856_v27  ;;  %v1334_v9 = vsub.f32 1.0, %v1333_v53  ;;  %v2142_v61 = vpop.eup %2141  ;;  %vm1338_vm10 = vweird.f32 %v2138_v43  ;;  %v1343_v8 = vand.u32 2147483648, %v3767_v58 }
 0x1a6   :  { %v1727_v14 = vpack.c.bf16 %v1663_v31, %v1663_v31  ;;  %v865_v49 = vsel %vm3779_vm2, %v864_v45, %v860_v0  ;;  %v1100_v63 = vsel %vm1099_vm9, %v2134_v2, %v1096_v13  ;;  %v1573_v18 = vmul.f32 %v2142_v61, %v3773_v19 }
 0x1a7   :  { %v1616_v4 = vmul.f32 %v865_v49, %v3678_v25  ;;  %v1105_v50 = vsel %vm3796_vm6, %v1104_v29, %v1100_v63  ;;  %v1335_v16 = vmul.f32 %v2138_v43, %v1334_v9  ;;  %vm1337_vm11 = vweird.f32 %v3767_v58 }
 0x1a8   :  { %1792 = vst.msk [vmem:[%s3889_s3 + $0xf4] sm:$0xf] %vm1730_vm7, %v1727_v14  ;;  %v1632_v22 = vmul.f32 %v1105_v50, %v3681_v39  ;;  %vm3826_vm12 = vcmp.eq.f32.partialorder %v1341_v17, 8.507059e+37  ;;  %v1581_v20 = vand.u32 2147483647, %v3773_v19  ;;  %v1574_v59 = vsub.f32 1.0, %v1573_v18  ;;  %vm1339_vm13 = vmor %vm1337_vm11, %vm1338_vm10 }
 0x1a9   :  { %v1680_v1 = vpack.c.bf16 %v1616_v4, %v1616_v4  ;;  %v1336_v30 = vadd.f32 %v2138_v43, %v1335_v16  ;;  %v3831_v25 = vadd.f32 1.0, %v2140_v44  ;;  %v1344_v56 = vor.u32 1.1754944e-38, %v1343_v8 }
 0x1aa   :  { %v2144_v34 = vpop.eup %2143  ;;  %v1696_v3 = vpack.c.bf16 %v1632_v22, %v1632_v22  ;;  %v1583_v39 = vand.u32 2147483648, %v3773_v19  ;;  %2145 = vpow2.f32 %v3756_v36  ;;  %v1575_v35 = vmul.f32 %v2142_v61, %v1574_v59 }
 0x1ab   :  { %1745 = vst.msk [vmem:[%s3889_s3 + $0x38] sm:$0xf] %vm1730_vm7, %v1680_v1  ;;  %v1340_v58 = vsel %vm1339_vm13, %v2138_v43, %v1336_v30  ;;  %vm1578_vm14 = vweird.f32 %v2142_v61  ;;  %v868_v55 = vmul.f32 %v2144_v34, %v3793_v21  ;;  %vm1577_vm15 = vweird.f32 %v3773_v19 }
 0x1ac   :  { %1761 = vst.msk [vmem:[%s3889_s3 + $0x78] sm:$0xf] %vm1730_vm7, %v1696_v3  ;;  %v1345_v2 = vsel %vm3826_vm12, %v1344_v56, %v1340_v58  ;;  %2147 = vrcp.f32 %v3831_v25  ;;  %v1576_v46 = vadd.f32 %v2142_v61, %v1575_v35  ;;  %vm1582_vm0 = vcmp.eq.f32.partialorder %v1581_v20, 8.507059e+37  ;;  %vm1579_vm1 = vmor %vm1577_vm15, %vm1578_vm14 }
 0x1ad   :  { %v1648_v36 = vmul.f32 %v1345_v2, %v3684_v47  ;;  %v869_v26 = vsub.f32 1.0, %v868_v55  ;;  %v1584_v33 = vor.u32 1.1754944e-38, %v1583_v39  ;;  %v876_v57 = vand.u32 2147483647, %v3793_v21 }
 0x1ae   :  { %v878_v24 = vand.u32 2147483648, %v3793_v21  ;;  %2149 = vpow2.f32 %v1894_v38  ;;  %v1580_v12 = vsel %vm1579_vm1, %v2142_v61, %v1576_v46  ;;  %vm873_vm2 = vweird.f32 %v2144_v34 }
 0x1af   :  { %v1712_v51 = vpack.c.bf16 %v1648_v36, %v1648_v36  ;;  %v870_v41 = vmul.f32 %v2144_v34, %v869_v26  ;;  %v1585_v19 = vsel %vm1582_vm0, %v1584_v33, %v1580_v12  ;;  %vm872_vm3 = vweird.f32 %v3793_v21 }
 0x1b0   :  { %v2146_v60 = vpop.eup %2145  ;;  %v1664_v47 = vmul.f32 %v1585_v19, %v3701_v23  ;;  %vm874_vm4 = vmor %vm872_vm3, %vm873_vm2  ;;  %v879_v45 = vor.u32 1.1754944e-38, %v878_v24  ;;  %vm877_vm5 = vcmp.eq.f32.partialorder %v876_v57, 8.507059e+37  ;;  %v1116_v21 = vand.u32 2147483647, %v3831_v25 }
 0x1b1   :  { %1777 = vst.msk [vmem:[%s3889_s3 + $0xb8] sm:$0xf] %vm1730_vm7, %v1712_v51  ;;  %v871_v37 = vadd.f32 %v2144_v34, %v870_v41  ;;  %v625_v32 = vadd.f32 1.0, %v2146_v60  ;;  %v1118_v31 = vand.u32 2147483648, %v3831_v25  ;;  %vm1112_vm8 = vweird.f32 %v3831_v25 }
 0x1b2   :  { %v2148_v15 = vpop.eup %2147  ;;  %v1728_v6 = vpack.c.bf16 %v1664_v47, %v1664_v47  ;;  %vm1117_vm10 = vcmp.eq.f32.partialorder %v1116_v21, 8.507059e+37 }
 0x1b3   :  { %v875_v7 = vsel %vm874_vm4, %v2144_v34, %v871_v37  ;;  %v1108_v48 = vmul.f32 %v2148_v15, %v3831_v25  ;;  %2151 = vrcp.f32 %v625_v32  ;;  %vm1113_vm6 = vweird.f32 %v2148_v15 }
 0x1b4   :  { %v2150_v43 = vpop.eup %2149  ;;  %v880_v11 = vsel %vm877_vm5, %v879_v45, %v875_v7  ;;  %1793 = vst.msk [vmem:[%s3889_s3 + $0xf8] sm:$0xf] %vm1730_vm7, %v1728_v6  ;;  %vm1114_vm9 = vmor %vm1112_vm8, %vm1113_vm6  ;;  %v1358_v38 = vand.u32 2147483648, %v625_v32  ;;  %v1356_v8 = vand.u32 2147483647, %v625_v32  ;;  %vm1352_vm12 = vweird.f32 %v625_v32 }
 0x1b5   :  { %v1617_v23 = vmul.f32 %v880_v11, %v3712_v5  ;;  %v1109_v40 = vsub.f32 1.0, %v1108_v48  ;;  %v641_v42 = vadd.f32 1.0, %v2150_v43  ;;  %v1119_v5 = vor.u32 1.1754944e-38, %v1118_v31 }
 0x1b6   :  { %v1359_v18 = vor.u32 1.1754944e-38, %v1358_v38  ;;  %vm1357_vm15 = vcmp.eq.f32.partialorder %v1356_v8, 8.507059e+37 }
 0x1b7   :  { %v1681_v27 = vpack.c.bf16 %v1617_v23, %v1617_v23  ;;  %v1110_v62 = vmul.f32 %v2148_v15, %v1109_v40  ;;  %2153 = vrcp.f32 %v641_v42  ;;  %v1598_v16 = vand.u32 2147483648, %v641_v42 }
 0x1b8   :  { %vm1592_vm0 = vweird.f32 %v641_v42 }
 0x1b9   :  { %1746 = vst.msk [vmem:[%s3889_s3 + $0x3c] sm:$0xf] %vm1730_vm7, %v1681_v27  ;;  %v1111_v53 = vadd.f32 %v2148_v15, %v1110_v62  ;;  %v2152_v13 = vpop.eup %2151  ;;  %v1599_v59 = vor.u32 1.1754944e-38, %v1598_v16 }
 0x1ba   :  { %v1348_v17 = vmul.f32 %v2152_v13, %v625_v32  ;;  %vm1353_vm11 = vweird.f32 %v2152_v13 }
 0x1bb   :  { %v1115_v29 = vsel %vm1114_vm9, %v2148_v15, %v1111_v53  ;;  %vm1354_vm13 = vmor %vm1352_vm12, %vm1353_vm11 }
 0x1bc   :  { %v1120_v44 = vsel %vm1117_vm10, %v1119_v5, %v1115_v29  ;;  %v1349_v9 = vsub.f32 1.0, %v1348_v17 }
 0x1bd   :  { %v2154_v14 = vpop.eup %2153  ;;  %v1633_v0 = vmul.f32 %v1120_v44, %v3722_v54  ;;  %v1596_v54 = vand.u32 2147483647, %v641_v42 }
 0x1be   :  { %v1588_v61 = vmul.f32 %v2154_v14, %v641_v42  ;;  %v1350_v63 = vmul.f32 %v2152_v13, %v1349_v9  ;;  %vm1593_vm14 = vweird.f32 %v2154_v14 }
 0x1bf   :  { %v1697_v49 = vpack.c.bf16 %v1633_v0, %v1633_v0  ;;  %vm1594_vm1 = vmor %vm1592_vm0, %vm1593_vm14  ;;  %vm1597_vm2 = vcmp.eq.f32.partialorder %v1596_v54, 8.507059e+37 }
 0x1c0   :  { %v1589_v4 = vsub.f32 1.0, %v1588_v61  ;;  %v1351_v50 = vadd.f32 %v2152_v13, %v1350_v63 }
 0x1c1   :  { %1762 = vst.msk [vmem:[%s3889_s3 + $0x7c] sm:$0xf] %vm1730_vm7, %v1697_v49 }
 0x1c2   :  { %v1590_v22 = vmul.f32 %v2154_v14, %v1589_v4  ;;  %v1355_v10 = vsel %vm1354_vm13, %v2152_v13, %v1351_v50 }
 0x1c3   :  { %v1360_v20 = vsel %vm1357_vm15, %v1359_v18, %v1355_v10 }
 0x1c4   :  { %v1591_v1 = vadd.f32 %v2154_v14, %v1590_v22  ;;  %v1649_v30 = vmul.f32 %v1360_v20, %v3725_v28 }
 0x1c6   :  { %v1595_v25 = vsel %vm1594_vm1, %v2154_v14, %v1591_v1  ;;  %v1713_v34 = vpack.c.bf16 %v1649_v30, %v1649_v30 }
 0x1c7   :  { %v1600_v3 = vsel %vm1597_vm2, %v1599_v59, %v1595_v25 }
 0x1c8   :  { %v1665_v56 = vmul.f32 %v1600_v3, %v3764_v52  ;;  %1778 = vst.msk [vmem:[%s3889_s3 + $0xbc] sm:$0xf] %vm1730_vm7, %v1713_v34 }
 0x1ca   :  { %v1729_v39 = vpack.c.bf16 %v1665_v56, %v1665_v56 }
 0x1cc   :  { %1794 = vst.msk [vmem:[%s3889_s3 + $0xfc] sm:$0xf] %vm1730_vm7, %v1729_v39 }

// kernel: _lambda_.3
= control target key start
LH: loop header
LB: loop body
LE: loop exit
PB: predicated region body
PF: predicated region fallthrough
CT: control target
= control target key end

     0   :  { %s2269_s21 = smov 0   ;;  %s2271_s22 = smov 0   ;;  %s3000_s0 = inlined_call_operand.vmem [shape: f32[2,16,8,8], index: 0, kind: input, shape index: {}]   ;;  %s3001_s1 = inlined_call_operand.vmem [shape: bf16[6,8,9,8], index: 1, kind: input, shape index: {}]   ;;  %s3002_s2 = inlined_call_operand.vmem [shape: bf16[4,4], index: 2, kind: input, shape index: {}]   ;;  %s3003_s3 = inlined_call_operand.vmem [shape: f32[1,4], index: 3, kind: input, shape index: {}]   ;;  %s3004_s4 = inlined_call_operand.vmem [shape: bf16[9,4,4], index: 4, kind: input, shape index: {}]   ;;  %s3005_s5 = inlined_call_operand.vmem [shape: f32[1,4], index: 5, kind: input, shape index: {}]   ;;  %s3006_s6 = inlined_call_operand.vmem [shape: f32[2,64,8], index: 6, kind: output, shape index: {}]  }
   0x1   :  { %s2273_s23 = smov 0  }
   0x2 LB: > { %s28_s24 = sadd.s32 1, %s2226_s22  ;;  %p1926_p0 = scmp.ge.s32.totalorder %s2230_s23, 1  ;;  %s2230_s23 = sphi %s2273_s23, %s16_s23   ;;  %s2226_s22 = sphi %s2271_s22, %s3022_s22   ;;  %s2222_s21 = sphi %s2269_s21, %s3021_s21  }
   0x3   : > { %p30_p1 = scmp.ge.s32.totalorder %s28_s24, 2  ;;  %p253_p2 = scmp.lt.s32.totalorder %s2230_s23, 3 }
   0x5   : > { %s3024_s24 = smov (%p30_p1, %s28_s24), 0  ;;  %p254_p3 = pnand %p1926_p0, %p253_p2 }
   0x6   : > { %p303_p4 = scmp.lt.s32.totalorder (!%p254_p3), %s2222_s21, 1  ;;  %s312_s25 = smul.u32 (!%p254_p3), 3, %s2222_s21 }
   0x7   : > { %257 = sbr.rel (%p254_p3) target bundleno = 468 (0x1d4), region = 44  ;;  %s2232_s10 = smov (!%p254_p3), 124  }
   0x8   : > { %p314_p5 = scmp.lt.s32.totalorder (!%p254_p3), %s312_s25, 5 }
   0xc   : > { %s3026_s21 = smov (!%p303_p4, %s2222_s21), 1  ;;  %s3028_s25 = smov (!%p314_p5, %s312_s25), 5  ;;  %v404_v55 = vld [vmem:[%s3002_s2] sm:$0x3]  ;;  %vm422_vm0 = vcmask 1041408   ;;  %vm409_vm1 = vcmask 31744  }
   0xd   : > { %s2079_s26 = sshll.u32 %s3026_s21, 7  ;;  %s2080_s30 = sshll.u32 %s3028_s25, 6  ;;  %v424_v56 = vsel %vm422_vm0, %v404_v55, 0  ;;  %v1945_v57 = vld [vmem:[%s3004_s4 + $0x2] sm:$0x3] }
   0xe   : > { %s2293_s29 = scalar_lea.vmem %s3000_s0, %s2079_s26  ;;  %s2316_s9 = scalar_lea.vmem %s3001_s1, %s2080_s30  ;;  %433 = vmatpush.bf16.msra.mxu0 %v424_v56  ;;  %2094 = vmatpush.bf16.msra.mxu2 %v424_v56  ;;  %v675_v59 = vsel %vm422_vm0, %v1945_v57, 0  ;;  %v631_v62 = vld [vmem:[%s3004_s4] sm:$0x3]  ;;  %vm750_vm2 = vsmask.f32 3328 }
   0xf   : > { %v344_v0 = vld [vmem:[%s2293_s29 + $0x40] sm:$0xff]  ;;  %v345_v1 = vld [vmem:[%s2293_s29 + $0x48] sm:$0xff]  ;;  %v346_v2 = vld [vmem:[%s2293_s29 + $0x50] sm:$0xff]  ;;  %684 = vmatpush.bf16.msra.mxu1 %v675_v59  ;;  %2095 = vmatpush.bf16.msra.mxu3 %v675_v59  ;;  %v719_v63 = vsel %vm422_vm0, %v631_v62, 0  ;;  %vm751_vm3 = vsmask.f32 7440 }
  0x10   : > { %v347_v3 = vld [vmem:[%s2293_s29 + $0x58] sm:$0xff]  ;;  %v2299_v4 = vmax.f32 %v344_v0, %v345_v1  ;;  %v336_v5 = vld [vmem:[%s2293_s29] sm:$0xff]  ;;  %v337_v6 = vld [vmem:[%s2293_s29 + $0x8] sm:$0xff]  ;;  %s2081_s16 = sshll.u32 %s3026_s21, 6 }
  0x11   : > { %v2303_v7 = vmax.f32 %v346_v2, %v347_v3  ;;  %v338_v8 = vld [vmem:[%s2293_s29 + $0x10] sm:$0xff]  ;;  %v339_v9 = vld [vmem:[%s2293_s29 + $0x18] sm:$0xff]  ;;  %v2307_v10 = vmax.f32 %v336_v5, %v337_v6  ;;  %v348_v13 = vld [vmem:[%s2293_s29 + $0x60] sm:$0xff]  ;;  %s2901_s18 = scalar_lea.vmem %s3006_s6, %s2081_s16 }
  0x12   : > { %v2309_v11 = vmax.f32 %v338_v8, %v339_v9  ;;  %v349_v15 = vld [vmem:[%s2293_s29 + $0x68] sm:$0xff]  ;;  %v350_v16 = vld [vmem:[%s2293_s29 + $0x70] sm:$0xff]  ;;  %v351_v17 = vld [vmem:[%s2293_s29 + $0x78] sm:$0xff]  ;;  %728 = vmatpush.bf16.msrb.mxu2 %v719_v63 }
  0x13   : > { %v2122_v12 = vpack.i.bf16 %v2303_v7, %v2299_v4  ;;  %v1948_v18 = vld [vmem:[%s2316_s9] sm:$0xf]  ;;  %v2084_v20 = vld [vmem:[%s2316_s9 + $0x24] sm:$0xf0]  ;;  %v2329_v21 = vmax.f32 %v348_v13, %v349_v15  ;;  %v2331_v22 = vmax.f32 %v350_v16, %v351_v17  ;;  %v342_v28 = vld [vmem:[%s2293_s29 + $0x30] sm:$0xff] }
  0x14   : > { %v2127_v14 = vpack.i.bf16 %v2309_v11, %v2307_v10  ;;  %v1956_v19 = vld [vmem:[%s2316_s9 + $0x20] sm:$0xf]  ;;  %v2082_v23 = vld [vmem:[%s2316_s9 + $0x4] sm:$0xf0]  ;;  %v343_v29 = vld [vmem:[%s2293_s29 + $0x38] sm:$0xff] }
  0x15   : > { %2123 = vrot.lane.b32.xlu0 %v2122_v12, %s2232_s10  ;;  %v2334_v24 = vor.u32 %v2082_v23, %v1948_v18  ;;  %v2336_v25 = vor.u32 %v2084_v20, %v1956_v19  ;;  %v340_v26 = vld [vmem:[%s2293_s29 + $0x20] sm:$0xff]  ;;  %v341_v27 = vld [vmem:[%s2293_s29 + $0x28] sm:$0xff]  ;;  %v2132_v30 = vpack.i.bf16 %v2331_v22, %v2329_v21  ;;  %v1960_v31 = vld [vmem:[%s2316_s9 + $0x30] sm:$0xf]  ;;  %v2352_v34 = vmax.f32 %v342_v28, %v343_v29 }
  0x16   : > { %2128 = vrot.lane.b32.xlu1 %v2127_v14, %s2232_s10  ;;  %v2085_v32 = vld [vmem:[%s2316_s9 + $0x34] sm:$0xf0]  ;;  %v2350_v33 = vmax.f32 %v340_v26, %v341_v27  ;;  %v1952_v36 = vld [vmem:[%s2316_s9 + $0x10] sm:$0xf]  ;;  %v1994_v40 = vld [vmem:[%s2316_s9 + $0x40] sm:$0xf] }
  0x17   : > { %654 = vrot.lane.b32.xlu2 %v2334_v24, %s2232_s10  ;;  %v2354_v35 = vor.u32 %v2085_v32, %v1960_v31  ;;  %v2083_v37 = vld [vmem:[%s2316_s9 + $0x14] sm:$0xf0]  ;;  %v2086_v41 = vld [vmem:[%s2316_s9 + $0x44] sm:$0xf0]  ;;  %v1998_v43 = vld [vmem:[%s2316_s9 + $0x50] sm:$0xf] }
  0x18   : > { %v2137_v38 = vpack.i.bf16 %v2352_v34, %v2350_v33  ;;  %v2363_v39 = vor.u32 %v2083_v37, %v1952_v36  ;;  %v2368_v42 = vor.u32 %v2086_v41, %v1994_v40  ;;  %v2087_v44 = vld [vmem:[%s2316_s9 + $0x54] sm:$0xf0]  ;;  %v2002_v45 = vld [vmem:[%s2316_s9 + $0x60] sm:$0xf]  ;;  %v2088_v46 = vld [vmem:[%s2316_s9 + $0x64] sm:$0xf0] }
  0x19   : > { %v2376_v47 = vor.u32 %v2087_v44, %v1998_v43  ;;  %v2380_v48 = vor.u32 %v2088_v46, %v2002_v45  ;;  %v2006_v49 = vld [vmem:[%s2316_s9 + $0x70] sm:$0xf]  ;;  %v2089_v50 = vld [vmem:[%s2316_s9 + $0x74] sm:$0xf0]  ;;  %v2041_v52 = vld [vmem:[%s2316_s9 + $0x80] sm:$0xf] }
  0x1a   : > { %v2386_v51 = vor.u32 %v2089_v50, %v2006_v49  ;;  %v2090_v53 = vld [vmem:[%s2316_s9 + $0x84] sm:$0xf0]  ;;  %v2045_v58 = vld [vmem:[%s2316_s9 + $0x90] sm:$0xf]  ;;  %v2091_v60 = vld [vmem:[%s2316_s9 + $0x94] sm:$0xf0] }
  0x1b   : > { %v2392_v54 = vor.u32 %v2090_v53, %v2041_v52  ;;  %v2408_v61 = vor.u32 %v2091_v60, %v2045_v58  ;;  %v1970_v0 = vld [vmem:[%s3004_s4 + $0x4] sm:$0x3]  ;;  %v1991_v3 = vld [vmem:[%s3004_s4 + $0x6] sm:$0x3]  ;;  %v2012_v5 = vld [vmem:[%s3004_s4 + $0x8] sm:$0x3] }
  0x1c   : > { %v892_v1 = vsel %vm422_vm0, %v1970_v0, 0  ;;  %v983_v6 = vsel %vm422_vm0, %v1991_v3, 0  ;;  %v1045_v8 = vsel %vm422_vm0, %v2012_v5, 0  ;;  %v2053_v9 = vld [vmem:[%s2316_s9 + $0xb0] sm:$0xf]  ;;  %vm2476_vm4 = vmor %vm750_vm2, %vm751_vm3 }
  0x1d   : > { %658 = vrot.lane.b32.xlu0 %v2336_v25, %s2232_s10  ;;  %901 = vmatpush.bf16.msrb.mxu3 %v892_v1  ;;  %v2093_v12 = vld [vmem:[%s2316_s9 + $0xb4] sm:$0xf0]  ;;  %v617_v32 = vld [vmem:[%s2316_s9 + $0x8] sm:$0xf]  ;;  %v2049_v36 = vld [vmem:[%s2316_s9 + $0xa0] sm:$0xf] }
  0x1e   : > { %2133 = vrot.lane.b32.xlu1 %v2132_v30, %s2232_s10  ;;  %992 = vmatpush.bf16.msrb.mxu0 %v983_v6  ;;  %v2431_v13 = vor.u32 %v2093_v12, %v2053_v9  ;;  %v2017_v30 = vld [vmem:[%s3004_s4 + $0xa] sm:$0x3]  ;;  %v2059_v41 = vld [vmem:[%s3004_s4 + $0xe] sm:$0x3]  ;;  %v2064_v43 = vld [vmem:[%s3004_s4 + $0x10] sm:$0x3] }
  0x1f   : > { %660 = vrot.lane.b32.xlu2 %v2354_v35, %s2232_s10  ;;  %1054 = vmatpush.bf16.msrb.mxu1 %v1045_v8  ;;  %v2092_v37 = vld [vmem:[%s2316_s9 + $0xa4] sm:$0xf0]  ;;  %v1376_v46 = vsel %vm422_vm0, %v2059_v41, 0  ;;  %v1554_v49 = vsel %vm422_vm0, %v2064_v43, 0  ;;  %v768_v53 = vshrl.u32 %v617_v32, 16  ;;  %v771_v55 = vshll.u32 %v617_v32, 16 }
  0x20   : > { %v2460_v45 = vor.u32 %v2092_v37, %v2049_v36  ;;  %v616_v3 = vld [vmem:[%s2316_s9 + $0x4] sm:$0x1]  ;;  %v618_v5 = vld [vmem:[%s2316_s9 + $0xc] sm:$0x1] }
  0x21   : > { %v770_v1 = vrot.slane %v768_v53, 4  ;;  %v763_v12 = vshll.u32 %v616_v3, 16 }
  0x25   : > { %2138 = vrot.lane.b32.xlu0 %v2137_v38, %s2232_s10 }
  0x26   : > { %656 = vrot.lane.b32.xlu1 %v2363_v39, %s2232_s10 }
  0x27   : > { %1024 = vrot.lane.b32.xlu2 %v2368_v42, %s2232_s10 }
  0x2d   : > { %1026 = vrot.lane.b32.xlu0 %v2376_v47, %s2232_s10 }
  0x2e   : > { %1028 = vrot.lane.b32.xlu1 %v2380_v48, %s2232_s10 }
  0x2f   : > { %1030 = vrot.lane.b32.xlu2 %v2386_v51, %s2232_s10 }
  0x35   : > { %1355 = vrot.lane.b32.xlu0 %v2392_v54, %s2232_s10 }
  0x36   : > { %1357 = vrot.lane.b32.xlu1 %v2408_v61, %s2232_s10 }
  0x37   : > { %1359 = vrot.lane.b32.xlu2 %v2460_v45, %s2232_s10 }
  0x3d   : > { %1361 = vrot.lane.b32.xlu0 %v2431_v13, %s2232_s10 }
  0x71   : > { %v655_v2 = vpop.permute.xlu2 %654 }
  0x72   : > { %1962 = vmatmul.msk.bf16.vlgmr.msra.gmra.mxu1 %vm409_vm1, %v655_v2  ;;  %v773_v2 = vrot.slane %v771_v55, 5 }
  0x73   : > { %1563 = vmatpush.bf16.msra.mxu1 %v1554_v49 }
  0x87   : > { %v2124_v14 = vpop.permute.xlu0 %2123 }
  0x88   : > { %v2126_v15 = vunpack.i.h.bf16 %v2124_v14  ;;  %v2125_v16 = vunpack.i.l.bf16 %v2124_v14  ;;  %v2129_v17 = vpop.permute.xlu1 %2128  ;;  %v774_v14 = vor.u32 %v773_v2, %v770_v1 }
  0x89   : > { %v2131_v18 = vunpack.i.h.bf16 %v2129_v17  ;;  %v2130_v19 = vunpack.i.l.bf16 %v2129_v17  ;;  %v765_v17 = vrot.slane %v763_v12, 5 }
  0x8a   : > { %v397_v20 = vmax.f32 %v2303_v7, %v2126_v15  ;;  %v396_v23 = vmax.f32 %v2299_v4, %v2125_v16  ;;  %v1223_v7 = vsel %vm422_vm0, %v2017_v30, 0  ;;  %v615_v4 = vld [vmem:[%s2316_s9] sm:$0xf]  ;;  %v777_v15 = vshll.u32 %v618_v5, 16  ;;  %v661_v16 = vpop.permute.xlu2 %660 }
  0x8b   : > { %v393_v26 = vmax.f32 %v2309_v11, %v2131_v18  ;;  %v392_v27 = vmax.f32 %v2307_v10, %v2130_v19  ;;  %v2038_v10 = vld [vmem:[%s3004_s4 + $0xc] sm:$0x3]  ;;  %v754_v50 = vshrl.u32 %v615_v4, 16  ;;  %v757_v52 = vshll.u32 %v615_v4, 16 }
  0x8c   : > { %v402_v28 = vpack.c.bf16 %v397_v20, %v396_v23  ;;  %v1314_v40 = vsel %vm422_vm0, %v2038_v10, 0  ;;  %v779_v18 = vrot.slane %v777_v15, 5  ;;  %v619_v20 = vld [vmem:[%s2316_s9 + $0x10] sm:$0xf]  ;;  %v621_v23 = vld [vmem:[%s2316_s9 + $0x18] sm:$0xf] }
  0x8d   : > { %v400_v29 = vpack.c.bf16 %v393_v26, %v392_v27  ;;  %v756_v59 = vrot.slane %v754_v50, 4  ;;  %v759_v60 = vrot.slane %v757_v52, 5  ;;  %v796_v30 = vshrl.u32 %v621_v23, 16  ;;  %v623_v50 = vld [vmem:[%s2316_s9 + $0x20] sm:$0xf] }
  0x8e   : > { %1935 = vmatmul.msk.bf16.vlgmr.msra.gmra.mxu2 %vm409_vm1, %v402_v28  ;;  %v782_v28 = vshrl.u32 %v619_v20, 16  ;;  %v625_v52 = vld [vmem:[%s2316_s9 + $0x28] sm:$0xf] }
  0x8f   : > { %1933 = vmatmul.msk.bf16.vlgmr.msra.gmra.mxu0 %vm409_vm1, %v400_v29  ;;  %v659_v31 = vpop.permute.xlu0 %658  ;;  %1232 = vmatpush.bf16.msra.mxu2 %v1223_v7  ;;  %v785_v29 = vshll.u32 %v619_v20, 16  ;;  %v798_v36 = vrot.slane %v796_v30, 4  ;;  %v629_v20 = vld [vmem:[%s2316_s9 + $0x38] sm:$0xf] }
  0x90   : > { %1964 = vmatmul.msk.bf16.vlgmr.msra.gmra.mxu3 %vm409_vm1, %v659_v31  ;;  %v2134_v11 = vpop.permute.xlu1 %2133  ;;  %1385 = vmatpush.bf16.msra.mxu0 %v1376_v46  ;;  %v799_v31 = vshll.u32 %v621_v23, 16 }
  0x91   : > { %v2136_v38 = vunpack.i.h.bf16 %v2134_v11  ;;  %v2135_v44 = vunpack.i.l.bf16 %v2134_v11  ;;  %1323 = vmatpush.bf16.msra.mxu3 %v1314_v40  ;;  %v784_v11 = vrot.slane %v782_v28, 4  ;;  %v787_v10 = vrot.slane %v785_v29, 5  ;;  %v622_v40 = vld [vmem:[%s2316_s9 + $0x1c] sm:$0x1] }
  0x92   : > { %v1025_v7 = vpop.permute.xlu2 %1024  ;;  %v801_v37 = vrot.slane %v799_v31, 5  ;;  %v805_v49 = vshll.u32 %v622_v40, 16  ;;  %v855_v28 = vshll.u32 %v629_v20, 16  ;;  %v2024_v40 = vld [vmem:[%s2316_s9 + $0x88] sm:$0xf] }
  0x93   : > { %v399_v56 = vmax.f32 %v2331_v22, %v2136_v38  ;;  %v398_v57 = vmax.f32 %v2329_v21, %v2135_v44  ;;  %v760_v22 = vor.u32 %v759_v60, %v756_v59  ;;  %v620_v38 = vld [vmem:[%s2316_s9 + $0x14] sm:$0x1]  ;;  %v788_v43 = vor.u32 %v787_v10, %v784_v11 }
  0x94   : > { %v791_v44 = vshll.u32 %v620_v38, 16  ;;  %v802_v46 = vor.u32 %v801_v37, %v798_v36  ;;  %v813_v59 = vshll.u32 %v623_v50, 16  ;;  %v824_v60 = vshrl.u32 %v625_v52, 16  ;;  %v628_v10 = vld [vmem:[%s2316_s9 + $0x34] sm:$0x1] }
  0x95   : > { %v403_v9 = vpack.c.bf16 %v399_v56, %v398_v57  ;;  %v789_v53 = vrot.slane %v788_v43, 4  ;;  %v807_v57 = vrot.slane %v805_v49, 5  ;;  %v857_v11 = vrot.slane %v855_v28, 5  ;;  %v630_v36 = vld [vmem:[%s2316_s9 + $0x3c] sm:$0x1] }
  0x96   : > { %v793_v55 = vrot.slane %v791_v44, 5  ;;  %v803_v56 = vrot.slane %v802_v46, 4  ;;  %v815_v1 = vrot.slane %v813_v59, 5  ;;  %v826_v2 = vrot.slane %v824_v60, 4  ;;  %v2022_v38 = vld [vmem:[%s2316_s9 + $0x80] sm:$0xf] }
  0x97   : > { %v2139_v58 = vpop.permute.xlu0 %2138  ;;  %v847_v43 = vshll.u32 %v628_v10, 16  ;;  %v861_v46 = vshll.u32 %v630_v36, 16  ;;  %v1975_v49 = vld [vmem:[%s2316_s9 + $0x40] sm:$0xf]  ;;  %v2028_v28 = vld [vmem:[%s2316_s9 + $0x98] sm:$0xf] }
  0x98   : > { %v2141_v62 = vunpack.i.h.bf16 %v2139_v58  ;;  %v2140_v63 = vunpack.i.l.bf16 %v2139_v58  ;;  %v657_v0 = vpop.permute.xlu1 %656  ;;  %v810_v58 = vshrl.u32 %v623_v50, 16  ;;  %v1977_v50 = vld [vmem:[%s2316_s9 + $0x48] sm:$0xf]  ;;  %v1458_v10 = vshrl.u32 %v2028_v28, 16 }
  0x99   : > { %1963 = vmatmul.msk.bf16.gmra.mxu1 %vm409_vm1, %v657_v0  ;;  %v863_v60 = vrot.slane %v861_v46, 5  ;;  %v1461_v36 = vshll.u32 %v2028_v28, 16  ;;  %v1979_v46 = vld [vmem:[%s2316_s9 + $0x50] sm:$0xf]  ;;  %v1983_v28 = vld [vmem:[%s2316_s9 + $0x60] sm:$0xf] }
  0x9a   : > { %v395_v6 = vmax.f32 %v2352_v34, %v2141_v62  ;;  %v394_v8 = vmax.f32 %v2350_v33, %v2140_v63  ;;  %v761_v34 = vrot.slane %v760_v22, 4  ;;  %v775_v33 = vrot.slane %v774_v14, 4 }
  0x9b   : > { %v827_v62 = vshll.u32 %v625_v52, 16  ;;  %v812_v0 = vrot.slane %v810_v58, 4  ;;  %v1416_v52 = vshrl.u32 %v2022_v38, 16  ;;  %v849_v58 = vrot.slane %v847_v43, 5 }
  0x9c   : > { %v401_v21 = vpack.c.bf16 %v395_v6, %v394_v8  ;;  %v766_v26 = vsel %vm2476_vm4, %v761_v34, %v765_v17  ;;  %v780_v27 = vsel %vm2476_vm4, %v775_v33, %v779_v18  ;;  %v624_v8 = vld [vmem:[%s2316_s9 + $0x24] sm:$0x1]  ;;  %v627_v18 = vld [vmem:[%s2316_s9 + $0x30] sm:$0xf] }
  0x9d   : > { %v867_v4 = vunpack.c.l.b16 %v766_v26  ;;  %v868_v32 = vunpack.c.l.b16 %v780_v27  ;;  %v829_v3 = vrot.slane %v827_v62, 5  ;;  %v816_v22 = vor.u32 %v815_v1, %v812_v0 }
  0x9e   : > { %1936 = vmatmul.msk.bf16.gmra.mxu2 %vm409_vm1, %v403_v9  ;;  %v626_v9 = vld [vmem:[%s2316_s9 + $0x2c] sm:$0x1]  ;;  %v852_v27 = vshrl.u32 %v629_v20, 16  ;;  %v1085_v62 = vshrl.u32 %v1975_v49, 16 }
  0x9f   : > { %1934 = vmatmul.msk.bf16.gmra.mxu0 %vm409_vm1, %v401_v21  ;;  %v875_v41 = vpack.c.b16 %v868_v32, %v867_v4  ;;  %v1027_v63 = vpop.permute.xlu0 %1026  ;;  %v819_v21 = vshll.u32 %v624_v8, 16  ;;  %v830_v12 = vor.u32 %v829_v3, %v826_v2  ;;  %v833_v14 = vshll.u32 %v626_v9, 16  ;;  %v2023_v3 = vld [vmem:[%s2316_s9 + $0x84] sm:$0x1] }
  0xa0   : > { %1965 = vmatmul.msk.bf16.gmra.mxu3 %vm409_vm1, %v661_v16  ;;  %v817_v16 = vrot.slane %v816_v22, 4  ;;  %v1029_v29 = vpop.permute.xlu1 %1028  ;;  %v854_v32 = vrot.slane %v852_v27, 4  ;;  %v1087_v8 = vrot.slane %v1085_v62, 4  ;;  %v2026_v27 = vld [vmem:[%s2316_s9 + $0x90] sm:$0xf]  ;;  %v1116_v62 = vshll.u32 %v1979_v46, 16 }
  0xa1   : > { %v821_v34 = vrot.slane %v819_v21, 5  ;;  %v831_v17 = vrot.slane %v830_v12, 4  ;;  %v835_v33 = vrot.slane %v833_v14, 5  ;;  %v1031_v12 = vpop.permute.xlu2 %1030  ;;  %v1976_v14 = vld [vmem:[%s2316_s9 + $0x44] sm:$0x1] }
  0xa2   : > { %v858_v44 = vor.u32 %v857_v11, %v854_v32  ;;  %v1444_v32 = vshrl.u32 %v2026_v27, 16  ;;  %v1447_v11 = vshll.u32 %v2026_v27, 16 }
  0xa3   : > { %v822_v23 = vsel %vm2476_vm4, %v817_v16, %v821_v34  ;;  %v836_v26 = vsel %vm2476_vm4, %v831_v17, %v835_v33  ;;  %v1425_v34 = vshll.u32 %v2023_v3, 16 }
  0xa4   : > { %v871_v30 = vunpack.c.l.b16 %v822_v23  ;;  %v872_v31 = vunpack.c.l.b16 %v836_v26  ;;  %v859_v59 = vrot.slane %v858_v44, 4  ;;  %v1094_v26 = vshll.u32 %v1976_v14, 16 }
  0xa6   : > { %v877_v37 = vpack.c.b16 %v872_v31, %v871_v30  ;;  %v1427_v30 = vrot.slane %v1425_v34, 5 }
  0xa9   : > { %2013 = vmatmul.msk.bf16.vlgmr.msrb.gmra.mxu1 %vm409_vm1, %v1025_v7 }
  0xae   : > { %1966 = vmatmul.msk.bf16.vlgmr.msrb.gmra.mxu2 %vm409_vm1, %v2334_v24  ;;  %v794_v24 = vsel %vm2476_vm4, %v789_v53, %v793_v55  ;;  %v1419_v53 = vshll.u32 %v2022_v38, 16  ;;  %v1430_v55 = vshrl.u32 %v2024_v40, 16 }
  0xaf   : > { %2008 = vmatmul.msk.bf16.vlgmr.msrb.gmra.mxu0 %vm409_vm1, %v2368_v42  ;;  %v808_v42 = vsel %vm2476_vm4, %v803_v56, %v807_v57  ;;  %v869_v5 = vunpack.c.l.b16 %v794_v24  ;;  %v1433_v56 = vshll.u32 %v2024_v40, 16  ;;  %v1088_v24 = vshll.u32 %v1975_v49, 16  ;;  %v1981_v49 = vld [vmem:[%s2316_s9 + $0x58] sm:$0xf] }
  0xb0   : > { %1971 = vmatmul.msk.bf16.vlgmr.msrb.gmra.mxu3 %vm409_vm1, %v875_v41  ;;  %v870_v6 = vunpack.c.l.b16 %v808_v42  ;;  %v1102_v42 = vshll.u32 %v1977_v50, 16  ;;  %v1421_v0 = vrot.slane %v1419_v53, 5  ;;  %v1432_v1 = vrot.slane %v1430_v55, 4 }
  0xb1   : > { %v1435_v2 = vrot.slane %v1433_v56, 5  ;;  %v1090_v9 = vrot.slane %v1088_v24, 5  ;;  %v1460_v53 = vrot.slane %v1458_v10, 4  ;;  %v1127_v24 = vshrl.u32 %v1981_v49, 16 }
  0xb2   : > { %v876_v15 = vpack.c.b16 %v870_v6, %v869_v5  ;;  %v2025_v5 = vld [vmem:[%s2316_s9 + $0x8c] sm:$0x1]  ;;  %v864_v6 = vsel %vm2476_vm4, %v859_v59, %v863_v60  ;;  %v1104_v21 = vrot.slane %v1102_v42, 5  ;;  %v1113_v60 = vshrl.u32 %v1979_v46, 16 }
  0xb3   : > { %v1436_v17 = vor.u32 %v1435_v2, %v1432_v1  ;;  %v1439_v33 = vshll.u32 %v2025_v5, 16  ;;  %v874_v20 = vunpack.c.l.b16 %v864_v6  ;;  %v1091_v23 = vor.u32 %v1090_v9, %v1087_v8  ;;  %v1982_v6 = vld [vmem:[%s2316_s9 + $0x5c] sm:$0x1] }
  0xb4   : > { %v1115_v8 = vrot.slane %v1113_v60, 4  ;;  %v1118_v9 = vrot.slane %v1116_v62, 5  ;;  %v1984_v60 = vld [vmem:[%s2316_s9 + $0x64] sm:$0x1]  ;;  %v1986_v62 = vld [vmem:[%s2316_s9 + $0x6c] sm:$0x1] }
  0xb5   : > { %v1437_v31 = vrot.slane %v1436_v17, 4  ;;  %v1092_v40 = vrot.slane %v1091_v23, 4 }
  0xb6   : > { %v1119_v23 = vor.u32 %v1118_v9, %v1115_v8 }
  0xb8   : > { %v1120_v10 = vrot.slane %v1119_v23, 4  ;;  %v1987_v23 = vld [vmem:[%s2316_s9 + $0x70] sm:$0xf] }
  0xb9   : > { %2014 = vmatmul.msk.bf16.gmra.mxu1 %vm409_vm1, %v1027_v63  ;;  %v1418_v63 = vrot.slane %v1416_v52, 4  ;;  %v1449_v52 = vrot.slane %v1447_v11, 5 }
  0xbb   : > { %v1422_v16 = vor.u32 %v1421_v0, %v1418_v63 }
  0xbe   : > { %1967 = vmatmul.msk.bf16.gmra.mxu2 %vm409_vm1, %v2363_v39  ;;  %v838_v39 = vshrl.u32 %v627_v18, 16 }
  0xbf   : > { %2009 = vmatmul.msk.bf16.gmra.mxu0 %vm409_vm1, %v2376_v47  ;;  %v841_v47 = vshll.u32 %v627_v18, 16 }
  0xc0   : > { %1972 = vmatmul.msk.bf16.gmra.mxu3 %vm409_vm1, %v876_v15  ;;  %v840_v7 = vrot.slane %v838_v39, 4  ;;  %v1978_v15 = vld [vmem:[%s2316_s9 + $0x4c] sm:$0x1] }
  0xc1   : > { %v843_v4 = vrot.slane %v841_v47, 5  ;;  %v1108_v47 = vshll.u32 %v1978_v15, 16 }
  0xc3   : > { %v844_v41 = vor.u32 %v843_v4, %v840_v7  ;;  %v1441_v7 = vrot.slane %v1439_v33, 5  ;;  %v1110_v38 = vrot.slane %v1108_v47, 5  ;;  %v1136_v33 = vshll.u32 %v1982_v6, 16 }
  0xc5   : > { %v845_v57 = vrot.slane %v844_v41, 4  ;;  %v1442_v44 = vsel %vm2476_vm4, %v1437_v31, %v1441_v7  ;;  %v1138_v11 = vrot.slane %v1136_v33, 5 }
  0xc6   : > { %v1530_v56 = vunpack.c.l.b16 %v1442_v44 }
  0xc9   : > { %2015 = vmatmul.msk.bf16.gmra.mxu1 %vm409_vm1, %v1029_v29  ;;  %v1423_v29 = vrot.slane %v1422_v16, 4 }
  0xcb   : > { %v1428_v43 = vsel %vm2476_vm4, %v1423_v29, %v1427_v30  ;;  %v1985_v29 = vld [vmem:[%s2316_s9 + $0x68] sm:$0xf] }
  0xcc   : > { %v1529_v55 = vunpack.c.l.b16 %v1428_v43  ;;  %v1155_v43 = vshrl.u32 %v1985_v29, 16  ;;  %v1158_v44 = vshll.u32 %v1985_v29, 16 }
  0xce   : > { %1968 = vmatmul.msk.bf16.gmra.mxu2 %vm409_vm1, %v2336_v25  ;;  %v1099_v25 = vshrl.u32 %v1977_v50, 16  ;;  %v1446_v50 = vrot.slane %v1444_v32, 4  ;;  %v1537_v2 = vpack.c.b16 %v1530_v56, %v1529_v55 }
  0xcf   : > { %2010 = vmatmul.msk.bf16.gmra.mxu0 %vm409_vm1, %v2380_v48  ;;  %v850_v48 = vsel %vm2476_vm4, %v845_v57, %v849_v58  ;;  %v2027_v57 = vld [vmem:[%s2316_s9 + $0x94] sm:$0x1]  ;;  %v2029_v58 = vld [vmem:[%s2316_s9 + $0x9c] sm:$0x1] }
  0xd0   : > { %1973 = vmatmul.msk.bf16.gmra.mxu3 %vm409_vm1, %v877_v37  ;;  %v1101_v22 = vrot.slane %v1099_v25, 4  ;;  %v873_v18 = vunpack.c.l.b16 %v850_v48  ;;  %v1096_v37 = vrot.slane %v1094_v26, 5  ;;  %v1130_v25 = vshll.u32 %v1981_v49, 16  ;;  %v1980_v48 = vld [vmem:[%s2316_s9 + $0x54] sm:$0x1] }
  0xd1   : > { %v1450_v42 = vor.u32 %v1449_v52, %v1446_v50  ;;  %v1453_v63 = vshll.u32 %v2027_v57, 16  ;;  %v1467_v1 = vshll.u32 %v2029_v58, 16  ;;  %v1122_v17 = vshll.u32 %v1980_v48, 16 }
  0xd2   : > { %v1105_v39 = vor.u32 %v1104_v21, %v1101_v22  ;;  %v878_v4 = vpack.c.b16 %v874_v20, %v873_v18  ;;  %v1097_v59 = vsel %vm2476_vm4, %v1092_v40, %v1096_v37  ;;  %v1129_v22 = vrot.slane %v1127_v24, 4  ;;  %v2030_v18 = vld [vmem:[%s2316_s9 + $0xa0] sm:$0xf]  ;;  %v2032_v20 = vld [vmem:[%s2316_s9 + $0xa8] sm:$0xf] }
  0xd3   : > { %v1198_v3 = vunpack.c.l.b16 %v1097_v59  ;;  %v1132_v21 = vrot.slane %v1130_v25, 5  ;;  %v1455_v14 = vrot.slane %v1453_v63, 5  ;;  %v1469_v16 = vrot.slane %v1467_v1, 5 }
  0xd4   : > { %v1106_v41 = vrot.slane %v1105_v39, 4  ;;  %v1356_v39 = vpop.permute.xlu0 %1355  ;;  %v1472_v30 = vshrl.u32 %v2030_v18, 16  ;;  %v1475_v31 = vshll.u32 %v2030_v18, 16  ;;  %v1486_v7 = vshrl.u32 %v2032_v20, 16 }
  0xd5   : > { %v1133_v26 = vor.u32 %v1132_v21, %v1129_v22  ;;  %v1124_v32 = vrot.slane %v1122_v17, 5  ;;  %v1141_v40 = vshrl.u32 %v1983_v28, 16  ;;  %v1157_v59 = vrot.slane %v1155_v43, 4 }
  0xd6   : > { %v1474_v46 = vrot.slane %v1472_v30, 4  ;;  %v1477_v49 = vrot.slane %v1475_v31, 5  ;;  %v1488_v50 = vrot.slane %v1486_v7, 4  ;;  %v1164_v48 = vshll.u32 %v1986_v62, 16  ;;  %v1989_v30 = vld [vmem:[%s2316_s9 + $0x78] sm:$0xf] }
  0xd7   : > { %v1125_v55 = vsel %vm2476_vm4, %v1120_v10, %v1124_v32  ;;  %v1172_v32 = vshll.u32 %v1987_v23, 16 }
  0xd8   : > { %v1478_v24 = vor.u32 %v1477_v49, %v1474_v46  ;;  %v1166_v33 = vrot.slane %v1164_v48, 5 }
  0xd9   : > { %2016 = vmatmul.msk.bf16.gmra.mxu1 %vm409_vm1, %v1031_v12  ;;  %v1451_v12 = vrot.slane %v1450_v42, 4 }
  0xda   : > { %v1479_v6 = vrot.slane %v1478_v24, 4 }
  0xdb   : > { %v1456_v47 = vsel %vm2476_vm4, %v1451_v12, %v1455_v14  ;;  %v2034_v12 = vld [vmem:[%s2316_s9 + $0xb0] sm:$0xf]  ;;  %v2036_v14 = vld [vmem:[%s2316_s9 + $0xb8] sm:$0xf] }
  0xdc   : > { %v1531_v37 = vunpack.c.l.b16 %v1456_v47  ;;  %v1514_v47 = vshrl.u32 %v2036_v14, 16 }
  0xde   : > { %1969 = vmatmul.msk.bf16.gmra.mxu2 %vm409_vm1, %v2354_v35  ;;  %v1463_v35 = vrot.slane %v1461_v36, 5  ;;  %v1134_v36 = vrot.slane %v1133_v26, 4  ;;  %v1500_v26 = vshrl.u32 %v2034_v12, 16 }
  0xdf   : > { %2011 = vmatmul.msk.bf16.gmra.mxu0 %vm409_vm1, %v2386_v51  ;;  %v1111_v51 = vsel %vm2476_vm4, %v1106_v41, %v1110_v38  ;;  %v1144_v41 = vshll.u32 %v1983_v28, 16 }
  0xe0   : > { %1974 = vmatmul.msk.bf16.gmra.mxu3 %vm409_vm1, %v878_v4  ;;  %v1464_v0 = vor.u32 %v1463_v35, %v1460_v53  ;;  %v1199_v5 = vunpack.c.l.b16 %v1111_v51  ;;  %v1489_v4 = vshll.u32 %v2032_v20, 16  ;;  %v2031_v53 = vld [vmem:[%s2316_s9 + $0xa4] sm:$0x1]  ;;  %v2033_v35 = vld [vmem:[%s2316_s9 + $0xac] sm:$0x1]  ;;  %v1139_v56 = vsel %vm2476_vm4, %v1134_v36, %v1138_v11 }
  0xe1   : > { %v1146_v58 = vrot.slane %v1144_v41, 5  ;;  %v1160_v51 = vrot.slane %v1158_v44, 5  ;;  %v1481_v25 = vshll.u32 %v2031_v53, 16  ;;  %v1495_v63 = vshll.u32 %v2033_v35, 16  ;;  %v2037_v41 = vld [vmem:[%s2316_s9 + $0xbc] sm:$0x1] }
  0xe2   : > { %v1465_v15 = vrot.slane %v1464_v0, 4  ;;  %v1206_v34 = vpack.c.b16 %v1199_v5, %v1198_v3  ;;  %v1491_v52 = vrot.slane %v1489_v4, 5  ;;  %v1200_v0 = vunpack.c.l.b16 %v1125_v55 }
  0xe3   : > { %v1201_v1 = vunpack.c.l.b16 %v1139_v56  ;;  %v1150_v3 = vshll.u32 %v1984_v60, 16  ;;  %v1161_v5 = vor.u32 %v1160_v51, %v1157_v59  ;;  %v1483_v8 = vrot.slane %v1481_v25, 5  ;;  %v1990_v59 = vld [vmem:[%s2316_s9 + $0x7c] sm:$0x1]  ;;  %v2603_v51 = vld [vmem:[%s3003_s3] ss:$0 sm:$0xff] }
  0xe4   : > { %v1470_v27 = vsel %vm2476_vm4, %v1465_v15, %v1469_v16  ;;  %v1492_v42 = vor.u32 %v1491_v52, %v1488_v50  ;;  %v1497_v22 = vrot.slane %v1495_v63, 5  ;;  %v1358_v15 = vpop.permute.xlu1 %1357  ;;  %v1169_v4 = vshrl.u32 %v1987_v23, 16 }
  0xe5   : > { %v1532_v38 = vunpack.c.l.b16 %v1470_v27  ;;  %v1207_v21 = vpack.c.b16 %v1201_v1, %v1200_v0  ;;  %v1162_v17 = vrot.slane %v1161_v5, 4  ;;  %v1484_v18 = vsel %vm2476_vm4, %v1479_v6, %v1483_v8  ;;  %v1360_v5 = vpop.permute.xlu2 %1359 }
  0xe6   : > { %v1493_v9 = vrot.slane %v1492_v42, 4  ;;  %v1517_v27 = vshll.u32 %v2036_v14, 16  ;;  %v1533_v31 = vunpack.c.l.b16 %v1484_v18  ;;  %v1502_v11 = vrot.slane %v1500_v26, 4 }
  0xe7   : > { %v1538_v57 = vpack.c.b16 %v1532_v38, %v1531_v37  ;;  %v1167_v29 = vsel %vm2476_vm4, %v1162_v17, %v1166_v33  ;;  %v1516_v36 = vrot.slane %v1514_v47, 4  ;;  %v1183_v38 = vshrl.u32 %v1989_v30, 16 }
  0xe8   : > { %v1498_v20 = vsel %vm2476_vm4, %v1493_v9, %v1497_v22  ;;  %v1519_v37 = vrot.slane %v1517_v27, 5  ;;  %v1203_v46 = vunpack.c.l.b16 %v1167_v29  ;;  %v1171_v50 = vrot.slane %v1169_v4, 4 }
  0xe9   : > { %2065 = vmatmul.msk.bf16.vlgmr.msra.gmra.mxu1 %vm409_vm1, %v1537_v2  ;;  %v1534_v7 = vunpack.c.l.b16 %v1498_v20  ;;  %v1174_v52 = vrot.slane %v1172_v32, 5  ;;  %v1523_v56 = vshll.u32 %v2037_v41, 16 }
  0xea   : > { %v1520_v55 = vor.u32 %v1519_v37, %v1516_v36  ;;  %v1362_v37 = vpop.permute.xlu0 %1361 }
  0xeb   : > { %v1539_v49 = vpack.c.b16 %v1534_v7, %v1533_v31  ;;  %v1175_v62 = vor.u32 %v1174_v52, %v1171_v50  ;;  %v1525_v63 = vrot.slane %v1523_v56, 5 }
  0xec   : > { %v1521_v42 = vrot.slane %v1520_v55, 4 }
  0xed   : > { %v1176_v8 = vrot.slane %v1175_v62, 4 }
  0xee   : > { %2018 = vmatmul.msk.bf16.vlgmr.msra.gmra.mxu2 %vm409_vm1, %v1206_v34  ;;  %v1152_v34 = vrot.slane %v1150_v3, 5  ;;  %v1526_v22 = vsel %vm2476_vm4, %v1521_v42, %v1525_v63 }
  0xef   : > { %2060 = vmatmul.msk.bf16.vlgmr.msra.gmra.mxu0 %vm409_vm1, %v1356_v39  ;;  %v1503_v39 = vshll.u32 %v2034_v12, 16  ;;  %v2596_v43 = vpop.f32.mrf.mxu1  ;;  %v1536_v17 = vunpack.c.l.b16 %v1526_v22 }
  0xf0   : > { %2055 = vmatmul.msk.bf16.vlgmr.msra.gmra.mxu3 %vm409_vm1, %v2392_v54  ;;  %v1143_v54 = vrot.slane %v1141_v40, 4  ;;  %v1186_v40 = vshll.u32 %v1989_v30, 16 }
  0xf1   : > { %v1505_v10 = vrot.slane %v1503_v39, 5 }
  0xf2   : > { %v1147_v2 = vor.u32 %v1146_v58, %v1143_v54  ;;  %v1188_v54 = vrot.slane %v1186_v40, 5  ;;  %v1988_v58 = vld [vmem:[%s2316_s9 + $0x74] sm:$0x1] }
  0xf3   : > { %v1506_v53 = vor.u32 %v1505_v10, %v1502_v11  ;;  %v1178_v0 = vshll.u32 %v1988_v58, 16 }
  0xf4   : > { %v1148_v16 = vrot.slane %v1147_v2, 4  ;;  %v1192_v2 = vshll.u32 %v1990_v59, 16 }
  0xf5   : > { %v1507_v24 = vrot.slane %v1506_v53, 4  ;;  %v1180_v12 = vrot.slane %v1178_v0, 5 }
  0xf6   : > { %v1153_v28 = vsel %vm2476_vm4, %v1148_v16, %v1152_v34 }
  0xf7   : > { %v1202_v44 = vunpack.c.l.b16 %v1153_v28  ;;  %v2610_v6 = vpop.f32.mrf.mxu1  ;;  %v1181_v20 = vsel %vm2476_vm4, %v1176_v8, %v1180_v12 }
  0xf8   : > { %v1204_v27 = vunpack.c.l.b16 %v1181_v20 }
  0xf9   : > { %2066 = vmatmul.msk.bf16.gmra.mxu1 %vm409_vm1, %v1538_v57  ;;  %v1185_v57 = vrot.slane %v1183_v38, 4  ;;  %v1208_v60 = vpack.c.b16 %v1203_v46, %v1202_v44 }
  0xfb   : > { %v1189_v1 = vor.u32 %v1188_v54, %v1185_v57 }
  0xfd   : > { %v1190_v14 = vrot.slane %v1189_v1, 4 }
  0xfe   : > { %2019 = vmatmul.msk.bf16.gmra.mxu2 %vm409_vm1, %v1207_v21 }
  0xff   : > { %2061 = vmatmul.msk.bf16.gmra.mxu0 %vm409_vm1, %v1358_v15  ;;  %v1194_v15 = vrot.slane %v1192_v2, 5 }
 0x100   : > { %2056 = vmatmul.msk.bf16.gmra.mxu3 %vm409_vm1, %v2408_v61  ;;  %v2035_v61 = vld [vmem:[%s2316_s9 + $0xb4] sm:$0x1]  ;;  %s2233_s9 = smov 4  }
 0x101   : > { %v1509_v35 = vshll.u32 %v2035_v61, 16  ;;  %v1195_v23 = vsel %vm2476_vm4, %v1190_v14, %v1194_v15 }
 0x102   : > { %v1205_v28 = vunpack.c.l.b16 %v1195_v23 }
 0x103   : > { %v1511_v25 = vrot.slane %v1509_v35, 5 }
 0x104   : > { %v1209_v19 = vpack.c.b16 %v1205_v28, %v1204_v27 }
 0x105   : > { %v1512_v9 = vsel %vm2476_vm4, %v1507_v24, %v1511_v25 }
 0x106   : > { %v1535_v34 = vunpack.c.l.b16 %v1512_v9 }
 0x108   : > { %v1540_v47 = vpack.c.b16 %v1536_v17, %v1535_v34 }
 0x109   : > { %2067 = vmatmul.msk.bf16.gmra.mxu1 %vm409_vm1, %v1539_v49 }
 0x10c   : > { %v435_v3 = vpop.f32.mrf.mxu0 }
 0x10d   : > { %v2607_v48 = vadd.f32 %v2603_v51, %v435_v3 }
 0x10e   : > { %2020 = vmatmul.msk.bf16.gmra.mxu2 %vm409_vm1, %v1208_v60 }
 0x10f   : > { %v1937_v21 = vmul.f32 -1.442695, %v2607_v48  ;;  %2062 = vmatmul.msk.bf16.gmra.mxu0 %vm409_vm1, %v1360_v5 }
 0x110   : > { %2057 = vmatmul.msk.bf16.gmra.mxu3 %vm409_vm1, %v2460_v45 }
 0x111   : > { %2144 = vpow2.f32 %v1937_v21  ;;  %v445_v16 = vpop.f32.mrf.mxu2 }
 0x112   : > { %v2621_v33 = vadd.f32 %v2603_v51, %v445_v16 }
 0x113   : > { %v2623_v18 = vpop.f32.mrf.mxu3 }
 0x114   : > { %v1941_v26 = vmul.f32 -1.442695, %v2621_v33  ;;  %v437_v39 = vpop.f32.mrf.mxu0 }
 0x115   : > { %v2631_v45 = vadd.f32 %v2603_v51, %v437_v39 }
 0x116   : > { %2146 = vpow2.f32 %v1941_v26  ;;  %v2633_v29 = vpop.f32.mrf.mxu1 }
 0x117   : > { %v2145_v30 = vpop.eup %2144  ;;  %v1938_v31 = vmul.f32 -1.442695, %v2631_v45 }
 0x118   : > { %v479_v7 = vadd.f32 1.0, %v2145_v30 }
 0x119   : > { %2148 = vpow2.f32 %v1938_v31  ;;  %v447_v4 = vpop.f32.mrf.mxu2  ;;  %2068 = vmatmul.msk.bf16.gmra.mxu1 %vm409_vm1, %v1540_v47 }
 0x11a   : > { %2150 = vrcp.f32 %v479_v7  ;;  %v2638_v32 = vadd.f32 %v2603_v51, %v447_v4  ;;  %v496_v55 = vand.u32 2147483647, %v479_v7  ;;  %vm492_vm5 = vweird.f32 %v479_v7 }
 0x11b   : > { %v2640_v11 = vpop.f32.mrf.mxu3  ;;  %v498_v54 = vand.u32 2147483648, %v479_v7 }
 0x11c   : > { %v2147_v10 = vpop.eup %2146  ;;  %v440_v36 = vpop.f32.mrf.mxu0  ;;  %v1942_v40 = vmul.f32 -1.442695, %v2638_v32  ;;  %vm497_vm7 = vcmp.eq.f32.partialorder %v496_v55, 8.507059e+37 }
 0x11d   : > { %v2642_v38 = vadd.f32 1.0, %v2147_v10  ;;  %v2646_v61 = vadd.f32 %v2603_v51, %v440_v36  ;;  %v499_v2 = vor.u32 1.1754944e-38, %v498_v54 }
 0x11e   : > { %2021 = vmatmul.msk.bf16.gmra.mxu2 %vm409_vm1, %v1209_v19  ;;  %v2649_v41 = vpop.f32.mrf.mxu1 }
 0x11f   : > { %v2149_v44 = vpop.eup %2148  ;;  %2152 = vrcp.f32 %v2642_v38  ;;  %2063 = vmatmul.msk.bf16.gmra.mxu0 %vm409_vm1, %v1362_v37  ;;  %v1939_v50 = vmul.f32 -1.442695, %v2646_v61  ;;  %v556_v5 = vand.u32 2147483647, %v2642_v38  ;;  %v558_v21 = vand.u32 2147483648, %v2642_v38 }
 0x120   : > { %v2151_v46 = vpop.eup %2150  ;;  %v2653_v49 = vadd.f32 1.0, %v2149_v44  ;;  %2154 = vpow2.f32 %v1942_v40  ;;  %2058 = vmatmul.msk.bf16.gmra.mxu3 %vm409_vm1, %v2431_v13  ;;  %vm552_vm10 = vweird.f32 %v2642_v38 }
 0x121   : > { %v488_v52 = vmul.f32 %v2151_v46, %v479_v7  ;;  %v450_v53 = vpop.f32.mrf.mxu2  ;;  %vm493_vm6 = vweird.f32 %v2151_v46  ;;  %vm2685_vm11 = vcmp.eq.f32.partialorder %v556_v5, 8.507059e+37 }
 0x122   : > { %2156 = vrcp.f32 %v2653_v49  ;;  %v2660_v56 = vadd.f32 %v2603_v51, %v450_v53  ;;  %vm494_vm8 = vmor %vm492_vm5, %vm493_vm6  ;;  %vm507_vm14 = vweird.f32 %v2653_v49  ;;  %v513_v7 = vand.u32 2147483648, %v2653_v49 }
 0x123   : > { %v489_v35 = vsub.f32 1.0, %v488_v52  ;;  %2158 = vpow2.f32 %v1939_v50  ;;  %v2662_v57 = vpop.f32.mrf.mxu3  ;;  %v511_v37 = vand.u32 2147483647, %v2653_v49 }
 0x124   : > { %v442_v58 = vpop.f32.mrf.mxu0  ;;  %v1943_v13 = vmul.f32 -1.442695, %v2660_v56  ;;  %v514_v53 = vor.u32 1.1754944e-38, %v513_v7 }
 0x125   : > { %v2153_v59 = vpop.eup %2152  ;;  %v490_v60 = vmul.f32 %v2151_v46, %v489_v35  ;;  %v2666_v62 = vadd.f32 %v2603_v51, %v442_v58  ;;  %vm512_vm0 = vcmp.eq.f32.partialorder %v511_v37, 8.507059e+37 }
 0x126   : > { %v2155_v24 = vpop.eup %2154  ;;  %v548_v25 = vmul.f32 %v2153_v59, %v2642_v38  ;;  %v2669_v42 = vpop.f32.mrf.mxu1  ;;  %2160 = vpow2.f32 %v1943_v13  ;;  %vm553_vm9 = vweird.f32 %v2153_v59 }
 0x127   : > { %v491_v63 = vadd.f32 %v2151_v46, %v490_v60  ;;  %v2671_v0 = vadd.f32 1.0, %v2155_v24  ;;  %v1940_v8 = vmul.f32 -1.442695, %v2666_v62  ;;  %vm554_vm12 = vmor %vm552_vm10, %vm553_vm9 }
 0x128   : > { %v2157_v1 = vpop.eup %2156  ;;  %v549_v3 = vsub.f32 1.0, %v548_v25 }
 0x129   : > { %v2159_v9 = vpop.eup %2158  ;;  %v495_v22 = vsel %vm494_vm8, %v2151_v46, %v491_v63  ;;  %v503_v12 = vmul.f32 %v2157_v1, %v2653_v49  ;;  %2162 = vrcp.f32 %v2671_v0  ;;  %v452_v14 = vpop.f32.mrf.mxu2  ;;  %vm508_vm13 = vweird.f32 %v2157_v1 }
 0x12a   : > { %v500_v15 = vsel %vm497_vm7, %v499_v2, %v495_v22  ;;  %v550_v16 = vmul.f32 %v2153_v59, %v549_v3  ;;  %v2681_v20 = vadd.f32 1.0, %v2159_v9  ;;  %2164 = vpow2.f32 %v1940_v8  ;;  %vm509_vm15 = vmor %vm507_vm14, %vm508_vm13 }
 0x12b   : > { %v607_v34 = vmul.f32 %v500_v15, %v2607_v48  ;;  %v504_v17 = vsub.f32 1.0, %v503_v12  ;;  %v2683_v23 = vpop.f32.mrf.mxu3  ;;  %v2690_v47 = vadd.f32 %v2603_v51, %v452_v14  ;;  %v559_v48 = vor.u32 1.1754944e-38, %v558_v21 }
 0x12c   : > { %v551_v26 = vadd.f32 %v2153_v59, %v550_v16  ;;  %v2692_v27 = vpop.f32.mrf.mxu0  ;;  %v2161_v28 = vpop.eup %2160  ;;  %2166 = vrcp.f32 %v2681_v20  ;;  %vm522_vm2 = vweird.f32 %v2681_v20  ;;  %v526_v63 = vand.u32 2147483647, %v2681_v20 }
 0x12d   : > { %v505_v30 = vmul.f32 %v2157_v1, %v504_v17  ;;  %1773 = vrot.lane.b32.xlu1 %v607_v34, %s2233_s9  ;;  %v2698_v4 = vadd.f32 1.0, %v2161_v28  ;;  %v1944_v38 = vmul.f32 -1.442695, %v2690_v47  ;;  %vm567_vm7 = vweird.f32 %v2671_v0 }
 0x12e   : > { %v555_v31 = vsel %vm554_vm12, %v2153_v59, %v551_v26  ;;  %v2700_v51 = vpop.f32.mrf.mxu1  ;;  %vm527_vm6 = vcmp.eq.f32.partialorder %v526_v63, 8.507059e+37  ;;  %v573_v26 = vand.u32 2147483648, %v2671_v0  ;;  %v571_v28 = vand.u32 2147483647, %v2671_v0 }
 0x12f   : > { %v2702_v19 = vpop.eup %2162  ;;  %v560_v10 = vsel %vm2685_vm11, %v559_v48, %v555_v31  ;;  %v506_v36 = vadd.f32 %v2157_v1, %v505_v30  ;;  %2168 = vrcp.f32 %v2698_v4 }
 0x130   : > { %v611_v40 = vmul.f32 %v560_v10, %v2621_v33  ;;  %v563_v44 = vmul.f32 %v2702_v19, %v2671_v0  ;;  %v2165_v52 = vpop.eup %2164  ;;  %2170 = vpow2.f32 %v1944_v38  ;;  %vm568_vm4 = vweird.f32 %v2702_v19 }
 0x131   : > { %v510_v46 = vsel %vm509_vm15, %v2157_v1, %v506_v36  ;;  %v2713_v50 = vpop.f32.mrf.mxu2  ;;  %v482_v49 = vadd.f32 1.0, %v2165_v52  ;;  %v528_v1 = vand.u32 2147483648, %v2681_v20  ;;  %vm2750_vm8 = vmor %vm567_vm7, %vm568_vm4  ;;  %vm572_vm10 = vcmp.eq.f32.partialorder %v571_v28, 8.507059e+37 }
 0x132   : > { %1781 = vrot.lane.b32.xlu2 %v611_v40, %s2233_s9  ;;  %v2167_v35 = vpop.eup %2166  ;;  %v515_v33 = vsel %vm512_vm0, %v514_v53, %v510_v46  ;;  %v564_v54 = vsub.f32 1.0, %v563_v44  ;;  %vm582_vm15 = vweird.f32 %v2698_v4 }
 0x133   : > { %v2716_v55 = vpop.f32.mrf.mxu3  ;;  %v518_v58 = vmul.f32 %v2167_v35, %v2681_v20  ;;  %2172 = vrcp.f32 %v482_v49  ;;  %v608_v25 = vmul.f32 %v515_v33, %v2631_v45  ;;  %vm523_vm3 = vweird.f32 %v2167_v35 }
 0x134   : > { %v2719_v59 = vpop.f32.mrf.mxu0  ;;  %v565_v2 = vmul.f32 %v2702_v19, %v564_v54  ;;  %vm524_vm5 = vmor %vm522_vm2, %vm523_vm3  ;;  %v529_v12 = vor.u32 1.1754944e-38, %v528_v1  ;;  %v541_v10 = vand.u32 2147483647, %v482_v49  ;;  %v543_v36 = vand.u32 2147483648, %v482_v49 }
 0x135   : > { %v519_v60 = vsub.f32 1.0, %v518_v58  ;;  %v2723_v24 = vpop.eup %2168  ;;  %vm537_vm11 = vweird.f32 %v482_v49 }
 0x136   : > { %v2721_v13 = vpop.f32.mrf.mxu1  ;;  %v578_v5 = vmul.f32 %v2723_v24, %v2698_v4  ;;  %v2171_v8 = vpop.eup %2170  ;;  %v566_v15 = vadd.f32 %v2702_v19, %v565_v2  ;;  %vm583_vm12 = vweird.f32 %v2723_v24  ;;  %vm542_vm14 = vcmp.eq.f32.partialorder %v541_v10, 8.507059e+37 }
 0x137   : > { %v520_v3 = vmul.f32 %v2167_v35, %v519_v60  ;;  %v2734_v21 = vadd.f32 1.0, %v2171_v8  ;;  %vm2772_vm0 = vmor %vm582_vm15, %vm583_vm12  ;;  %vm1805_vm12 = vcmask 64512  }
 0x138   : > { %v579_v34 = vsub.f32 1.0, %v578_v5  ;;  %v570_v37 = vsel %vm2750_vm8, %v2702_v19, %v566_v15  ;;  %v544_v19 = vor.u32 1.1754944e-38, %v543_v36 }
 0x139   : > { %v2732_v9 = vpop.f32.mrf.mxu2  ;;  %v521_v22 = vadd.f32 %v2167_v35, %v520_v3  ;;  %v2173_v45 = vpop.eup %2172  ;;  %2174 = vrcp.f32 %v2734_v21  ;;  %vm597_vm4 = vweird.f32 %v2734_v21 }
 0x13a   : > { %1775 = vrot.lane.b32.xlu2 %v608_v25, %s2233_s9  ;;  %v533_v17 = vmul.f32 %v2173_v45, %v482_v49  ;;  %v580_v38 = vmul.f32 %v2723_v24, %v579_v34  ;;  %vm538_vm9 = vweird.f32 %v2173_v45  ;;  %v586_v49 = vand.u32 2147483647, %v2698_v4 }
 0x13b   : > { %v2738_v14 = vpop.f32.mrf.mxu3  ;;  %v525_v16 = vsel %vm524_vm5, %v2167_v35, %v521_v22  ;;  %vm539_vm13 = vmor %vm537_vm11, %vm538_vm9 }
 0x13c   : > { %v999_v20 = vpop.f32.mrf.mxu0  ;;  %v530_v39 = vsel %vm527_vm6, %v529_v12, %v525_v16  ;;  %v534_v30 = vsub.f32 1.0, %v533_v17  ;;  %v581_v33 = vadd.f32 %v2723_v24, %v580_v38  ;;  %v603_v12 = vand.u32 2147483648, %v2734_v21 }
 0x13d   : > { %v609_v48 = vmul.f32 %v530_v39, %v2646_v61  ;;  %v574_v61 = vor.u32 1.1754944e-38, %v573_v26  ;;  %vm587_vm3 = vcmp.eq.f32.partialorder %v586_v49, 8.507059e+37 }
 0x13e   : > { %v2746_v31 = vpop.f32.mrf.mxu1  ;;  %v535_v0 = vmul.f32 %v2173_v45, %v534_v30 }
 0x13f   : > { %1777 = vrot.lane.b32.xlu0 %v609_v48, %s2233_s9  ;;  %v2175_v52 = vpop.eup %2174  ;;  %v575_v53 = vsel %vm572_vm10, %v574_v61, %v570_v37 }
 0x140   : > { %v536_v44 = vadd.f32 %v2173_v45, %v535_v0  ;;  %v593_v58 = vmul.f32 %v2175_v52, %v2734_v21  ;;  %v612_v1 = vmul.f32 %v575_v53, %v2638_v32  ;;  %v585_v32 = vsel %vm2772_vm0, %v2723_v24, %v581_v33 }
 0x141   : > { %v735_v40 = vpop.f32.mrf.mxu2  ;;  %vm598_vm2 = vweird.f32 %v2175_v52  ;;  %v604_v24 = vor.u32 1.1754944e-38, %v603_v12 }
 0x142   : > { %v736_v46 = vadd.f32 %v735_v40, %v2633_v29  ;;  %v540_v54 = vsel %vm539_vm13, %v2173_v45, %v536_v44  ;;  %v588_v29 = vand.u32 2147483648, %v2698_v4  ;;  %v594_v3 = vsub.f32 1.0, %v593_v58  ;;  %vm599_vm5 = vmor %vm597_vm4, %vm598_vm2 }
 0x143   : > { %v908_v35 = vpop.f32.mrf.mxu3  ;;  %v545_v63 = vsel %vm542_vm14, %v544_v19, %v540_v54  ;;  %v601_v45 = vand.u32 2147483647, %v2734_v21  ;;  %v733_v58 = vadd.f32 %v2732_v9, %v2610_v6 }
 0x144   : > { %v925_v60 = vadd.f32 %v908_v35, %v736_v46  ;;  %v1001_v25 = vpop.f32.mrf.mxu0  ;;  %v610_v2 = vmul.f32 %v545_v63, %v2666_v62  ;;  %v595_v4 = vmul.f32 %v2175_v52, %v594_v3  ;;  %v589_v15 = vor.u32 1.1754944e-38, %v588_v29 }
 0x145   : > { %vm602_vm6 = vcmp.eq.f32.partialorder %v601_v45, 8.507059e+37 }
 0x146   : > { %v1016_v5 = vadd.f32 %v999_v20, %v925_v60  ;;  %v2768_v8 = vpop.f32.mrf.mxu1  ;;  %1779 = vrot.lane.b32.xlu1 %v610_v2, %s2233_s9  ;;  %v596_v34 = vadd.f32 %v2175_v52, %v595_v4  ;;  %v590_v20 = vsel %vm587_vm3, %v589_v15, %v585_v32 }
 0x147   : > { %1783 = vrot.lane.b32.xlu0 %v612_v1, %s2233_s9 }
 0x148   : > { %v2784_v62 = vadd.f32 %v2721_v13, %v1016_v5  ;;  %v600_v39 = vsel %vm599_vm5, %v2175_v52, %v596_v34  ;;  %v613_v13 = vmul.f32 %v590_v20, %v2660_v56 }
 0x149   : > { %v737_v16 = vpop.f32.mrf.mxu2  ;;  %v605_v30 = vsel %vm602_vm6, %v604_v24, %v600_v39 }
 0x14a   : > { %v738_v17 = vadd.f32 %v737_v16, %v2649_v41  ;;  %v614_v7 = vmul.f32 %v605_v30, %v2690_v47 }
 0x14b   : > { %v910_v26 = vpop.f32.mrf.mxu3 }
 0x14c   : > { %v926_v28 = vadd.f32 %v910_v26, %v738_v17  ;;  %v2788_v48 = vpop.f32.mrf.mxu0  ;;  %1787 = vrot.lane.b32.xlu2 %v614_v7, %s2233_s9 }
 0x14e   : > { %v1017_v10 = vadd.f32 %v1001_v25, %v926_v28  ;;  %v2792_v36 = vpop.f32.mrf.mxu1  ;;  %1785 = vrot.lane.b32.xlu1 %v613_v13, %s2233_s9  ;;  %v924_v25 = vadd.f32 %v2738_v14, %v733_v58 }
 0x150   : > { %v1079_v41 = vadd.f32 %v2746_v31, %v1017_v10  ;;  %v731_v31 = vadd.f32 %v2713_v50, %v2596_v43 }
 0x151   : > { %v740_v21 = vpop.f32.mrf.mxu2 }
 0x152   : > { %v923_v53 = vadd.f32 %v2716_v55, %v731_v31  ;;  %v1015_v55 = vadd.f32 %v2719_v59, %v924_v25  ;;  %v741_v24 = vadd.f32 %v740_v21, %v2623_v18 }
 0x153   : > { %v913_v37 = vpop.f32.mrf.mxu3 }
 0x154   : > { %v2797_v38 = vpop.f32.mrf.mxu0  ;;  %v1014_v54 = vadd.f32 %v2692_v27, %v923_v53  ;;  %v2829_v27 = vld [vmem:[%s3005_s5] ss:$0 sm:$0xff]  ;;  %v1077_v9 = vadd.f32 %v2700_v51, %v1015_v55  ;;  %v927_v10 = vadd.f32 %v913_v37, %v741_v24 }
 0x156   : > { %v2799_v0 = vpop.f32.mrf.mxu1  ;;  %v1076_v49 = vadd.f32 %v2669_v42, %v1014_v54  ;;  %v1018_v58 = vadd.f32 %v2788_v48, %v927_v10 }
 0x159   : > { %v742_v61 = vpop.f32.mrf.mxu2 }
 0x15a   : > { %v743_v18 = vadd.f32 %v742_v61, %v2640_v11  ;;  %v1080_v61 = vadd.f32 %v2768_v8, %v1018_v58 }
 0x15b   : > { %v2801_v40 = vpop.f32.mrf.mxu3 }
 0x15c   : > { %v2803_v56 = vpop.f32.mrf.mxu0 }
 0x15e   : > { %v2805_v47 = vpop.f32.mrf.mxu1 }
 0x161   : > { %v2807_v44 = vpop.f32.mrf.mxu2 }
 0x163   : > { %v2809_v46 = vpop.f32.mrf.mxu3 }
 0x164   : > { %v2813_v52 = vpop.f32.mrf.mxu0 }
 0x166   : > { %v1565_v35 = vpop.f32.mrf.mxu1 }
 0x169   : > { %v2816_v19 = vpop.f32.mrf.mxu2 }
 0x16b   : > { %v2818_v33 = vpop.f32.mrf.mxu3 }
 0x16c   : > { %v1387_v60 = vpop.f32.mrf.mxu0 }
 0x16e   : > { %v1567_v63 = vpop.f32.mrf.mxu1 }
 0x171   : > { %v1234_v43 = vpop.f32.mrf.mxu2 }
 0x172   : > { %v1254_v50 = vadd.f32 %v1234_v43, %v1076_v49 }
 0x173   : > { %v1325_v29 = vpop.f32.mrf.mxu3 }
 0x174   : > { %v1345_v1 = vadd.f32 %v1325_v29, %v1254_v50  ;;  %v1389_v2 = vpop.f32.mrf.mxu0  ;;  %v928_v29 = vadd.f32 %v2801_v40, %v743_v18 }
 0x176   : > { %v1407_v3 = vadd.f32 %v1387_v60, %v1345_v1  ;;  %v1570_v32 = vpop.f32.mrf.mxu1 }
 0x178   : > { %v1585_v6 = vadd.f32 %v1565_v35, %v1407_v3 }
 0x179   : > { %v1236_v14 = vpop.f32.mrf.mxu2 }
 0x17a   : > { %v2833_v42 = vadd.f32 %v2829_v27, %v1585_v6  ;;  %v1255_v5 = vadd.f32 %v1236_v14, %v1077_v9  ;;  %v1019_v6 = vadd.f32 %v2797_v38, %v928_v29  ;;  %v746_v9 = vadd.f32 %v2807_v44, %v2662_v57 }
 0x17b   : > { %v1327_v22 = vpop.f32.mrf.mxu3 }
 0x17c   : > { %v2069_v45 = vmul.f32 -1.442695, %v2833_v42  ;;  %v1346_v59 = vadd.f32 %v1327_v22, %v1255_v5  ;;  %v1392_v12 = vpop.f32.mrf.mxu0 }
 0x17e   : > { %2176 = vpow2.f32 %v2069_v45  ;;  %v1408_v4 = vadd.f32 %v1389_v2, %v1346_v59  ;;  %v1572_v7 = vpop.f32.mrf.mxu1 }
 0x180   : > { %v1586_v15 = vadd.f32 %v1567_v63, %v1408_v4  ;;  %v929_v4 = vadd.f32 %v2809_v46, %v746_v9 }
 0x181   : > { %v1239_v16 = vpop.f32.mrf.mxu2 }
 0x182   : > { %v2837_v34 = vadd.f32 %v2829_v27, %v1586_v15  ;;  %v1256_v51 = vadd.f32 %v1239_v16, %v2784_v62 }
 0x183   : > { %v1330_v17 = vpop.f32.mrf.mxu3 }
 0x184   : > { %v2177_v20 = vpop.eup %2176  ;;  %v2070_v26 = vmul.f32 -1.442695, %v2837_v34  ;;  %v1347_v39 = vadd.f32 %v1330_v17, %v1256_v51  ;;  %v1394_v30 = vpop.f32.mrf.mxu0 }
 0x185   : > { %v2842_v28 = vadd.f32 1.0, %v2177_v20  ;;  %v1081_v20 = vadd.f32 %v2792_v36, %v1019_v6  ;;  %v748_v36 = vadd.f32 %v2816_v19, %v2683_v23 }
 0x186   : > { %2178 = vpow2.f32 %v2070_v26  ;;  %v1409_v13 = vadd.f32 %v1392_v12, %v1347_v39  ;;  %v1575_v48 = vpop.f32.mrf.mxu1 }
 0x187   : > { %2180 = vrcp.f32 %v2842_v28  ;;  %v1648_v45 = vand.u32 2147483648, %v2842_v28  ;;  %vm1642_vm8 = vweird.f32 %v2842_v28 }
 0x188   : > { %v1587_v31 = vadd.f32 %v1570_v32, %v1409_v13  ;;  %v1646_v32 = vand.u32 2147483647, %v2842_v28 }
 0x189   : > { %v1241_v53 = vpop.f32.mrf.mxu2  ;;  %v1649_v24 = vor.u32 1.1754944e-38, %v1648_v45 }
 0x18a   : > { %v2846_v62 = vadd.f32 %v2829_v27, %v1587_v31  ;;  %v1257_v35 = vadd.f32 %v1241_v53, %v1079_v41  ;;  %vm1647_vm11 = vcmp.eq.f32.partialorder %v1646_v32, 8.507059e+37  ;;  %v1020_v31 = vadd.f32 %v2803_v56, %v929_v4 }
 0x18b   : > { %v1332_v21 = vpop.f32.mrf.mxu3 }
 0x18c   : > { %v2179_v54 = vpop.eup %2178  ;;  %v2071_v60 = vmul.f32 -1.442695, %v2846_v62  ;;  %v1348_v25 = vadd.f32 %v1332_v21, %v1257_v35  ;;  %v1397_v41 = vpop.f32.mrf.mxu0 }
 0x18d   : > { %v2181_v49 = vpop.eup %2180  ;;  %v2851_v43 = vadd.f32 1.0, %v2179_v54  ;;  %v2876_v15 = vpop.permute.xlu2 %1781 }
 0x18e   : > { %2182 = vpow2.f32 %v2071_v60  ;;  %v1410_v37 = vadd.f32 %v1394_v30, %v1348_v25  ;;  %v1638_v50 = vmul.f32 %v2181_v49, %v2842_v28  ;;  %vm1643_vm7 = vweird.f32 %v2181_v49  ;;  %v1577_v53 = vpop.f32.mrf.mxu1 }
 0x18f   : > { %2184 = vrcp.f32 %v2851_v43  ;;  %vm2870_vm9 = vmor %vm1642_vm8, %vm1643_vm7  ;;  %v1661_v26 = vand.u32 2147483647, %v2851_v43  ;;  %v1663_v39 = vand.u32 2147483648, %v2851_v43  ;;  %vm1657_vm13 = vweird.f32 %v2851_v43 }
 0x190   : > { %v1588_v11 = vadd.f32 %v1572_v7, %v1410_v37  ;;  %v1639_v63 = vsub.f32 1.0, %v1638_v50  ;;  %v930_v37 = vadd.f32 %v2818_v33, %v748_v36 }
 0x191   : > { %v1244_v55 = vpop.f32.mrf.mxu2  ;;  %vm1662_vm15 = vcmp.eq.f32.partialorder %v1661_v26, 8.507059e+37  ;;  %v1664_v56 = vor.u32 1.1754944e-38, %v1663_v39 }
 0x192   : > { %v2858_v1 = vadd.f32 %v2829_v27, %v1588_v11  ;;  %v1258_v2 = vadd.f32 %v1244_v55, %v1080_v61  ;;  %v1640_v3 = vmul.f32 %v2181_v49, %v1639_v63 }
 0x193   : > { %v1335_v40 = vpop.f32.mrf.mxu3 }
 0x194   : > { %v2183_v14 = vpop.eup %2182  ;;  %v2072_v5 = vmul.f32 -1.442695, %v2858_v1  ;;  %v1349_v22 = vadd.f32 %v1335_v40, %v1258_v2  ;;  %v1641_v8 = vadd.f32 %v2181_v49, %v1640_v3  ;;  %v1399_v28 = vpop.f32.mrf.mxu0  ;;  %v1021_v40 = vadd.f32 %v2813_v52, %v930_v37 }
 0x195   : > { %v2185_v59 = vpop.eup %2184  ;;  %v2865_v12 = vadd.f32 1.0, %v2183_v14 }
 0x196   : > { %2186 = vpow2.f32 %v2072_v5  ;;  %v1411_v38 = vadd.f32 %v1397_v41, %v1349_v22  ;;  %v1653_v57 = vmul.f32 %v2185_v59, %v2851_v43  ;;  %v1645_v16 = vsel %vm2870_vm9, %v2181_v49, %v1641_v8  ;;  %v1580_v45 = vpop.f32.mrf.mxu1 }
 0x197   : > { %2188 = vrcp.f32 %v2865_v12  ;;  %vm1658_vm10 = vweird.f32 %v2185_v59  ;;  %v1650_v10 = vsel %vm1647_vm11, %v1649_v24, %v1645_v16  ;;  %v1083_v52 = vadd.f32 %v2805_v47, %v1021_v40 }
 0x198   : > { %v1589_v51 = vadd.f32 %v1575_v48, %v1411_v38  ;;  %v1654_v17 = vsub.f32 1.0, %v1653_v57  ;;  %vm1659_vm14 = vmor %vm1657_vm13, %vm1658_vm10  ;;  %v1757_v23 = vmul.f32 %v1650_v10, %v2833_v42  ;;  %v1082_v42 = vadd.f32 %v2799_v0, %v1020_v31  ;;  %v1776_v48 = vpop.permute.xlu2 %1775 }
 0x199   : > { %v1246_v46 = vpop.f32.mrf.mxu2  ;;  %v1678_v44 = vand.u32 2147483648, %v2865_v12  ;;  %vm1672_vm2 = vweird.f32 %v2865_v12 }
 0x19a   : > { %v2884_v30 = vadd.f32 %v2829_v27, %v1589_v51  ;;  %v1655_v13 = vmul.f32 %v2185_v59, %v1654_v17  ;;  %v1259_v7 = vadd.f32 %v1246_v46, %v1081_v20  ;;  %v1676_v51 = vand.u32 2147483647, %v2865_v12 }
 0x19b   : > { %v1337_v35 = vpop.f32.mrf.mxu3 }
 0x19c   : > { %v2187_v18 = vpop.eup %2186  ;;  %v2073_v21 = vmul.f32 -1.442695, %v2884_v30  ;;  %v1656_v54 = vadd.f32 %v2185_v59, %v1655_v13  ;;  %v1350_v58 = vadd.f32 %v1337_v35, %v1259_v7  ;;  %v1402_v6 = vpop.f32.mrf.mxu0  ;;  %vm1677_vm4 = vcmp.eq.f32.partialorder %v1676_v51, 8.507059e+37 }
 0x19d   : > { %v2892_v60 = vpop.eup %2188  ;;  %v2894_v25 = vadd.f32 1.0, %v2187_v18 }
 0x19e   : > { %2190 = vpow2.f32 %v2073_v21  ;;  %v1660_v19 = vsel %vm1659_vm14, %v2185_v59, %v1656_v54  ;;  %v1412_v49 = vadd.f32 %v1399_v28, %v1350_v58  ;;  %v1668_v43 = vmul.f32 %v2892_v60, %v2865_v12  ;;  %v1582_v18 = vpop.f32.mrf.mxu1 }
 0x19f   : > { %2192 = vrcp.f32 %v2894_v25  ;;  %v1665_v50 = vsel %vm1662_vm15, %v1664_v56, %v1660_v19  ;;  %v1774_v29 = vpop.permute.xlu1 %1773  ;;  %vm1673_vm0 = vweird.f32 %v2892_v60  ;;  %v1679_v12 = vor.u32 1.1754944e-38, %v1678_v44 }
 0x1a0   : > { %v1758_v41 = vmul.f32 %v1665_v50, %v2837_v34  ;;  %v1590_v11 = vadd.f32 %v1577_v53, %v1412_v49  ;;  %v1797_v61 = vsel %vm409_vm1, %v1757_v23, %v1774_v29  ;;  %v1669_v63 = vsub.f32 1.0, %v1668_v43  ;;  %vm2934_vm3 = vmor %vm1672_vm2, %vm1673_vm0 }
 0x1a1   : > { %1806 = vst.msk [vmem:[%s2901_s18] sm:$0xff] %vm1805_vm12, %v1797_v61  ;;  %v1249_v55 = vpop.f32.mrf.mxu2  ;;  %vm1687_vm6 = vweird.f32 %v2894_v25  ;;  %v1691_v49 = vand.u32 2147483647, %v2894_v25 }
 0x1a2   : > { %v1798_v2 = vsel %vm409_vm1, %v1758_v41, %v1776_v48  ;;  %v2914_v33 = vadd.f32 %v2829_v27, %v1590_v11  ;;  %v1260_v3 = vadd.f32 %v1249_v55, %v1082_v42  ;;  %v1670_v34 = vmul.f32 %v2892_v60, %v1669_v63 }
 0x1a3   : > { %1807 = vst.msk [vmem:[%s2901_s18 + $0x8] sm:$0xff] %vm1805_vm12, %v1798_v2  ;;  %v1340_v0 = vpop.f32.mrf.mxu3  ;;  %vm1692_vm13 = vcmp.eq.f32.partialorder %v1691_v49, 8.507059e+37 }
 0x1a4   : > { %v2191_v9 = vpop.eup %2190  ;;  %v2074_v14 = vmul.f32 -1.442695, %v2914_v33  ;;  %v1351_v5 = vadd.f32 %v1340_v0, %v1260_v3  ;;  %v1671_v38 = vadd.f32 %v2892_v60, %v1670_v34  ;;  %v1404_v31 = vpop.f32.mrf.mxu0 }
 0x1a5   : > { %v2921_v22 = vpop.eup %2192  ;;  %v1633_v8 = vadd.f32 1.0, %v2191_v9 }
 0x1a6   : > { %2194 = vpow2.f32 %v2074_v14  ;;  %v1413_v59 = vadd.f32 %v1402_v6, %v1351_v5  ;;  %v1683_v32 = vmul.f32 %v2921_v22, %v2894_v25  ;;  %v1675_v47 = vsel %vm2934_vm3, %v2892_v60, %v1671_v38 }
 0x1a7   : > { %2196 = vrcp.f32 %v1633_v8  ;;  %v1680_v35 = vsel %vm1677_vm4, %v1679_v12, %v1675_v47  ;;  %vm1688_vm5 = vweird.f32 %v2921_v22  ;;  %v1693_v60 = vand.u32 2147483648, %v2894_v25 }
 0x1a8   : > { %v1591_v57 = vadd.f32 %v1580_v45, %v1413_v59  ;;  %v1684_v4 = vsub.f32 1.0, %v1683_v32  ;;  %v1706_v56 = vand.u32 2147483647, %v1633_v8  ;;  %v1708_v23 = vand.u32 2147483648, %v1633_v8  ;;  %vm2955_vm8 = vmor %vm1687_vm6, %vm1688_vm5 }
 0x1a9   : > { %v1251_v16 = vpop.f32.mrf.mxu2  ;;  %v1759_v19 = vmul.f32 %v1680_v35, %v2846_v62  ;;  %vm1702_vm9 = vweird.f32 %v1633_v8 }
 0x1aa   : > { %v2932_v17 = vadd.f32 %v2829_v27, %v1591_v57  ;;  %v1261_v20 = vadd.f32 %v1251_v16, %v1083_v52  ;;  %v1685_v39 = vmul.f32 %v2921_v22, %v1684_v4  ;;  %vm1707_vm11 = vcmp.eq.f32.partialorder %v1706_v56, 8.507059e+37 }
 0x1ab   : > { %v1342_v26 = vpop.f32.mrf.mxu3  ;;  %v1709_v63 = vor.u32 1.1754944e-38, %v1708_v23 }
 0x1ac   : > { %v2195_v28 = vpop.eup %2194  ;;  %v2075_v46 = vmul.f32 -1.442695, %v2932_v17  ;;  %v1352_v13 = vadd.f32 %v1342_v26, %v1261_v20  ;;  %v1686_v21 = vadd.f32 %v2921_v22, %v1685_v39 }
 0x1ad   : > { %v2197_v7 = vpop.eup %2196  ;;  %v2943_v10 = vadd.f32 1.0, %v2195_v28 }
 0x1ae   : > { %v1698_v36 = vmul.f32 %v2197_v7, %v1633_v8  ;;  %2198 = vpow2.f32 %v2075_v46  ;;  %v1414_v53 = vadd.f32 %v1404_v31, %v1352_v13  ;;  %vm1703_vm7 = vweird.f32 %v2197_v7 }
 0x1af   : > { %2200 = vrcp.f32 %v2943_v10  ;;  %v1690_v41 = vsel %vm2955_vm8, %v2921_v22, %v1686_v21  ;;  %vm1704_vm10 = vmor %vm1702_vm9, %vm1703_vm7  ;;  %v1723_v5 = vand.u32 2147483648, %v2943_v10  ;;  %v1721_v8 = vand.u32 2147483647, %v2943_v10 }
 0x1b0   : > { %v1699_v54 = vsub.f32 1.0, %v1698_v36  ;;  %v1592_v58 = vadd.f32 %v1582_v18, %v1414_v53  ;;  %vm1717_vm15 = vweird.f32 %v2943_v10 }
 0x1b1   : > { %v1778_v50 = vpop.permute.xlu0 %1777  ;;  %v1724_v38 = vor.u32 1.1754944e-38, %v1723_v5  ;;  %vm1722_vm2 = vcmp.eq.f32.partialorder %v1721_v8, 8.507059e+37 }
 0x1b2   : > { %v1700_v43 = vmul.f32 %v2197_v7, %v1699_v54  ;;  %v2953_v37 = vadd.f32 %v2829_v27, %v1592_v58  ;;  %v1799_v42 = vsel %vm409_vm1, %v1759_v19, %v1778_v50  ;;  %v1694_v27 = vor.u32 1.1754944e-38, %v1693_v60 }
 0x1b3   : > { %1808 = vst.msk [vmem:[%s2901_s18 + $0x10] sm:$0xff] %vm1805_vm12, %v1799_v42 }
 0x1b4   : > { %v2199_v11 = vpop.eup %2198  ;;  %v1701_v62 = vadd.f32 %v2197_v7, %v1700_v43  ;;  %v2076_v25 = vmul.f32 -1.442695, %v2953_v37  ;;  %v1695_v3 = vsel %vm1692_vm13, %v1694_v27, %v1690_v41 }
 0x1b5   : > { %v2201_v61 = vpop.eup %2200  ;;  %v1635_v48 = vadd.f32 1.0, %v2199_v11  ;;  %v1760_v9 = vmul.f32 %v1695_v3, %v2858_v1 }
 0x1b6   : > { %v1705_v55 = vsel %vm1704_vm10, %v2197_v7, %v1701_v62  ;;  %2202 = vpow2.f32 %v2076_v25  ;;  %v1713_v2 = vmul.f32 %v2201_v61, %v2943_v10  ;;  %vm1718_vm14 = vweird.f32 %v2201_v61 }
 0x1b7   : > { %v1710_v6 = vsel %vm1707_vm11, %v1709_v63, %v1705_v55  ;;  %2204 = vrcp.f32 %v1635_v48  ;;  %vm1719_vm0 = vmor %vm1717_vm15, %vm1718_vm14  ;;  %v1738_v16 = vand.u32 2147483648, %v1635_v48  ;;  %v1736_v24 = vand.u32 2147483647, %v1635_v48 }
 0x1b8   : > { %v1761_v0 = vmul.f32 %v1710_v6, %v2884_v30  ;;  %v1714_v34 = vsub.f32 1.0, %v1713_v2  ;;  %v1780_v22 = vpop.permute.xlu1 %1779  ;;  %vm1732_vm4 = vweird.f32 %v1635_v48 }
 0x1b9   : > { %v1800_v45 = vsel %vm409_vm1, %v1760_v9, %v1780_v22  ;;  %v1784_v51 = vpop.permute.xlu0 %1783  ;;  %v1739_v28 = vor.u32 1.1754944e-38, %v1738_v16  ;;  %vm1737_vm6 = vcmp.eq.f32.partialorder %v1736_v24, 8.507059e+37 }
 0x1ba   : > { %v1801_v40 = vsel %vm409_vm1, %v1761_v0, %v2876_v15  ;;  %v1715_v14 = vmul.f32 %v2201_v61, %v1714_v34  ;;  %1809 = vst.msk [vmem:[%s2901_s18 + $0x18] sm:$0xff] %vm1805_vm12, %v1800_v45 }
 0x1bb   : > { %1810 = vst.msk [vmem:[%s2901_s18 + $0x20] sm:$0xff] %vm1805_vm12, %v1801_v40 }
 0x1bc   : > { %v2203_v59 = vpop.eup %2202  ;;  %v1716_v32 = vadd.f32 %v2201_v61, %v1715_v14 }
 0x1bd   : > { %v2205_v1 = vpop.eup %2204  ;;  %v1636_v30 = vadd.f32 1.0, %v2203_v59 }
 0x1be   : > { %v1720_v15 = vsel %vm1719_vm0, %v2201_v61, %v1716_v32  ;;  %v1728_v57 = vmul.f32 %v2205_v1, %v1635_v48  ;;  %vm1733_vm3 = vweird.f32 %v2205_v1 }
 0x1bf   : > { %2206 = vrcp.f32 %v1636_v30  ;;  %v1725_v52 = vsel %vm1722_vm2, %v1724_v38, %v1720_v15  ;;  %vm1734_vm5 = vmor %vm1732_vm4, %vm1733_vm3  ;;  %v1753_v10 = vand.u32 2147483648, %v1636_v30  ;;  %v1751_v53 = vand.u32 2147483647, %v1636_v30 }
 0x1c0   : > { %v1729_v44 = vsub.f32 1.0, %v1728_v57  ;;  %v1762_v4 = vmul.f32 %v1725_v52, %v2914_v33  ;;  %v1786_v31 = vpop.permute.xlu1 %1785  ;;  %vm1747_vm8 = vweird.f32 %v1636_v30 }
 0x1c1   : > { %v1754_v21 = vor.u32 1.1754944e-38, %v1753_v10  ;;  %vm1752_vm10 = vcmp.eq.f32.partialorder %v1751_v53, 8.507059e+37 }
 0x1c2   : > { %v1730_v20 = vmul.f32 %v2205_v1, %v1729_v44  ;;  %v1802_v26 = vsel %vm409_vm1, %v1762_v4, %v1784_v51 }
 0x1c3   : > { %1811 = vst.msk [vmem:[%s2901_s18 + $0x28] sm:$0xff] %vm1805_vm12, %v1802_v26 }
 0x1c4   : > { %v1731_v47 = vadd.f32 %v2205_v1, %v1730_v20 }
 0x1c5   : > { %v2207_v39 = vpop.eup %2206 }
 0x1c6   : > { %v1743_v46 = vmul.f32 %v2207_v39, %v1636_v30  ;;  %v1735_v13 = vsel %vm1734_vm5, %v2205_v1, %v1731_v47  ;;  %vm1748_vm7 = vweird.f32 %v2207_v39 }
 0x1c7   : > { %v1740_v12 = vsel %vm1737_vm6, %v1739_v28, %v1735_v13  ;;  %vm1749_vm9 = vmor %vm1747_vm8, %vm1748_vm7 }
 0x1c8   : > { %v1744_v33 = vsub.f32 1.0, %v1743_v46  ;;  %v1763_v7 = vmul.f32 %v1740_v12, %v2932_v17  ;;  %v1788_v17 = vpop.permute.xlu2 %1787 }
 0x1ca   : > { %v1745_v36 = vmul.f32 %v2207_v39, %v1744_v33  ;;  %v1803_v35 = vsel %vm409_vm1, %v1763_v7, %v1786_v31 }
 0x1cb   : > { %1812 = vst.msk [vmem:[%s2901_s18 + $0x30] sm:$0xff] %vm1805_vm12, %v1803_v35 }
 0x1cc   : > { %v1746_v18 = vadd.f32 %v2207_v39, %v1745_v36 }
 0x1ce   : > { %v1750_v54 = vsel %vm1749_vm9, %v2207_v39, %v1746_v18 }
 0x1cf   : > { %v1755_v58 = vsel %vm1752_vm10, %v1754_v21, %v1750_v54 }
 0x1d0   : > { %v1764_v60 = vmul.f32 %v1755_v58, %v2953_v37 }
 0x1d2   : > { %v1804_v56 = vsel %vm409_vm1, %v1764_v60, %v1788_v17 }
 0x1d3   : > { %1813 = vst.msk [vmem:[%s2901_s18 + $0x38] sm:$0xff] %vm1805_vm12, %v1804_v56 }
 0x1d4 PF: > { %s16_s23 = sadd.s32 1, %s2230_s23   ;;  %s3021_s21 = smov %s2226_s22 }
 0x1d5   : > { %p13_p6 = scmp.ge.s32.totalorder %s16_s23, 4   ;;  %s3022_s22 = smov %s3024_s24 }
 0x1d7   :  { %15 = sbr.rel (!%p13_p6) target bundleno = 2 (0x2), region = 87 }

</bundles_post_ra>
